<compile_context>
chip_gen: v7x
topology: tpu7x:2x2x1
jax: 0.10.0
libtpu: 0.0.40
codegen_flags: <defaults>
</compile_context>

<pallas_src>
import math

import jax
import jax.numpy as jnp
from jax.experimental import pallas as pl
from jax.experimental.pallas import tpu as pltpu


def _round_up(x, m):
    return (x + m - 1) // m * m


# ----------------------------- Pallas GEMM (K-tiled, fused epilogue) --------

def matmul_bias_act(a, b, bias, relu=False, residual=None,
                    operand_dtype=jnp.float32):
    """(M,K) @ (K,N) + bias[N] (+ residual) (+ ReLU).

    Grid = (M tiles, K tiles); f32 VMEM accumulator; operands optionally bf16
    (MXU-native) with f32 accumulation and f32 epilogue.
    """
    M, K = a.shape
    _, N = b.shape
    a = a.astype(operand_dtype)
    b = b.astype(operand_dtype)
    bias2 = bias.reshape(1, N).astype(jnp.float32)

    # --- M tiling ---
    if M <= 1024:
        Mp = _round_up(M, 8)
        tm = Mp
    else:
        Mp = _round_up(M, 1024)
        tm = 1024
    if Mp != M:
        a = jnp.pad(a, ((0, Mp - M), (0, 0)))
        if residual is not None:
            residual = jnp.pad(residual, ((0, Mp - M), (0, 0)))

    # --- K tiling (only for large K; keeps weight tiles small enough for VMEM) ---
    if K <= 2048:
        Kp, tk = K, K
    else:
        Kp = _round_up(K, 128)
        tk = 128
        d = 128
        while d <= 2048:
            if Kp % d == 0:
                tk = d
            d += 128
        if Kp != K:
            a = jnp.pad(a, ((0, 0), (0, Kp - K)))
            b = jnp.pad(b, ((0, Kp - K), (0, 0)))
    nk = Kp // tk

    has_res = residual is not None

    def kernel(*refs):
        if has_res:
            a_ref, b_ref, bias_ref, res_ref, o_ref, acc_ref = refs
        else:
            a_ref, b_ref, bias_ref, o_ref, acc_ref = refs
        k = pl.program_id(1)

        @pl.when(k == 0)
        def _():
            acc_ref[...] = jnp.zeros_like(acc_ref)

        acc_ref[...] += jnp.dot(a_ref[...], b_ref[...],
                                preferred_element_type=jnp.float32)

        @pl.when(k == nk - 1)
        def _():
            r = acc_ref[...] + bias_ref[...]
            if has_res:
                r = r + res_ref[...]
            if relu:
                r = jnp.maximum(r, 0.0)
            o_ref[...] = r

    in_specs = [
        pl.BlockSpec((tm, tk), lambda i, k: (i, k)),
        pl.BlockSpec((tk, N), lambda i, k: (k, 0)),
        pl.BlockSpec((1, N), lambda i, k: (0, 0)),
    ]
    inputs = [a, b, bias2]
    if has_res:
        in_specs.append(pl.BlockSpec((tm, N), lambda i, k: (i, 0)))
        inputs.append(residual.astype(jnp.float32))

    out = pl.pallas_call(
        kernel,
        out_shape=jax.ShapeDtypeStruct((Mp, N), jnp.float32),
        grid=(Mp // tm, nk),
        in_specs=in_specs,
        out_specs=pl.BlockSpec((tm, N), lambda i, k: (i, 0)),
        scratch_shapes=[pltpu.VMEM((tm, N), jnp.float32)],
        compiler_params=pltpu.CompilerParams(
            dimension_semantics=("parallel", "arbitrary"),
            vmem_limit_bytes=48 * 1024 * 1024,
        ),
    )(*inputs)
    return out[:M]


# ----------------------------- conv glue (im2col) ---------------------------

def _extract_patches_3d(x, ksize, stride, padding):
    B, T, H, W, C = x.shape
    kt, kh, kw = ksize
    st, sh, sw = stride
    pt, ph, pw = padding
    xp = jnp.pad(x, ((0, 0), (pt, pt), (ph, ph), (pw, pw), (0, 0)))
    To = (T + 2 * pt - kt) // st + 1
    Ho = (H + 2 * ph - kh) // sh + 1
    Wo = (W + 2 * pw - kw) // sw + 1
    patches = []
    for dt in range(kt):
        for dh in range(kh):
            for dw in range(kw):
                patches.append(
                    xp[:, dt:dt + To * st:st, dh:dh + Ho * sh:sh, dw:dw + Wo * sw:sw, :])
    p = jnp.stack(patches, axis=-2)  # (B, To, Ho, Wo, kt*kh*kw, C)
    return p.reshape(B, To, Ho, Wo, kt * kh * kw * C), (To, Ho, Wo)


def conv3d_bn_act(x, w, bn_scale, bn_shift, stride, padding, relu, residual=None):
    """Conv3d(bias=False) + eval-mode BatchNorm3d (folded) + optional residual/ReLU.
    x: (B,T,H,W,Cin), w: (kt,kh,kw,Cin,Cout).  bf16 operands, f32 accumulation."""
    kt, kh, kw, cin, cout = w.shape
    patches, (To, Ho, Wo) = _extract_patches_3d(
        x.astype(jnp.bfloat16), (kt, kh, kw), stride, padding)
    B = x.shape[0]
    a = patches.reshape(B * To * Ho * Wo, kt * kh * kw * cin)
    wf = (w.reshape(kt * kh * kw * cin, cout) * bn_scale[None, :]).astype(jnp.bfloat16)
    out = matmul_bias_act(a, wf, bn_shift, relu=relu, residual=residual,
                          operand_dtype=jnp.bfloat16)
    return out.reshape(B, To, Ho, Wo, cout)


def basic_block(x, p):
    """torchvision VideoResNet BasicBlock; residual add + ReLU fused into conv2 GEMM."""
    stride = p['stride']
    if 'down_w' in p:
        identity = conv3d_bn_act(x, p['down_w'], p['down_bn'][0], p['down_bn'][1],
                                 stride, (0, 0, 0), relu=False)
    else:
        identity = x
    out = conv3d_bn_act(x, p['conv1_w'], p['bn1'][0], p['bn1'][1],
                        stride, (1, 1, 1), relu=True)
    C = identity.shape[-1]
    out = conv3d_bn_act(out, p['conv2_w'], p['bn2'][0], p['bn2'][1],
                        (1, 1, 1), (1, 1, 1), relu=True,
                        residual=identity.reshape(-1, C).astype(jnp.float32))
    return out


# ----------------------------- transformer (fused encoder layer) ------------

def positional_encoding(seq_len, d_model):
    position = jnp.arange(seq_len, dtype=jnp.float32)[:, None]
    div_term = jnp.exp(jnp.arange(0, d_model, 2, dtype=jnp.float32)
                       * (-math.log(10000.0) / d_model))
    pe = jnp.zeros((seq_len, d_model), jnp.float32)
    pe = pe.at[:, 0::2].set(jnp.sin(position * div_term))
    pe = pe.at[:, 1::2].set(jnp.cos(position * div_term))
    return pe


def _full_spec(a):
    nd = a.ndim
    return pl.BlockSpec(a.shape, lambda i, _nd=nd: (0,) * _nd)


def encoder_layer_fused(h, p, B, S, D, nhead, eps=1e-5):
    """One post-norm TransformerEncoderLayer (activation=relu, eval mode) in a single
    pallas_call: QKV proj, per-head attention, out proj, add+LN, FFN, add+LN."""
    M = B * S
    dh = D // nhead
    scale = 1.0 / math.sqrt(dh)

    in_w, in_b = p['in_w'], p['in_b']                       # (D,3D), (3D,)
    wq = in_w[:, 0 * D:1 * D].reshape(D, nhead, dh).transpose(1, 0, 2)  # (nhead,D,dh)
    wk = in_w[:, 1 * D:2 * D].reshape(D, nhead, dh).transpose(1, 0, 2)
    wv = in_w[:, 2 * D:3 * D].reshape(D, nhead, dh).transpose(1, 0, 2)
    bq = in_b[0 * D:1 * D].reshape(nhead, 1, dh)
    bk = in_b[1 * D:2 * D].reshape(nhead, 1, dh)
    bv = in_b[2 * D:3 * D].reshape(nhead, 1, dh)
    wo = p['out_w'].reshape(nhead, dh, D)                   # per-head out-proj rows
    ob = p['out_b'].reshape(1, D)
    g1 = p['ln1_g'].reshape(1, D)
    b1 = p['ln1_b'].reshape(1, D)
    w1 = p['ff1_w']
    fb1 = p['ff1_b'].reshape(1, -1)
    w2 = p['ff2_w']
    fb2 = p['ff2_b'].reshape(1, D)
    g2 = p['ln2_g'].reshape(1, D)
    b2 = p['ln2_b'].reshape(1, D)

    def kernel(h_ref, wq_ref, wk_ref, wv_ref, bq_ref, bk_ref, bv_ref,
               wo_ref, ob_ref, g1_ref, b1_ref, w1_ref, fb1_ref,
               w2_ref, fb2_ref, g2_ref, b2_ref, o_ref, attn_ref):
        hv = h_ref[...]                                     # (M, D) f32
        for b in range(B):
            h_b = hv[b * S:(b + 1) * S, :]                  # (S, D)
            acc = jnp.zeros((S, D), jnp.float32)
            for hd in range(nhead):
                q = jnp.dot(h_b, wq_ref[hd],
                            preferred_element_type=jnp.float32) + bq_ref[hd]
                k = jnp.dot(h_b, wk_ref[hd],
                            preferred_element_type=jnp.float32) + bk_ref[hd]
                v = jnp.dot(h_b, wv_ref[hd],
                            preferred_element_type=jnp.float32) + bv_ref[hd]
                s = jax.lax.dot_general(q, k, (((1,), (1,)), ((), ())),
                                        preferred_element_type=jnp.float32) * scale
                s = s - jnp.max(s, axis=-1, keepdims=True)
                e = jnp.exp(s)
                p_attn = e * pl.reciprocal(jnp.sum(e, axis=-1, keepdims=True),
                                           approx=True)
                oh = jnp.dot(p_attn, v, preferred_element_type=jnp.float32)  # (S, dh)
                acc = acc + jnp.dot(oh, wo_ref[hd],
                                    preferred_element_type=jnp.float32)      # (S, D)
            attn_ref[b * S:(b + 1) * S, :] = acc
        x1 = hv + attn_ref[...] + ob_ref[...]
        mu = jnp.mean(x1, axis=-1, keepdims=True)
        var = jnp.mean((x1 - mu) * (x1 - mu), axis=-1, keepdims=True)
        x1 = (x1 - mu) * jax.lax.rsqrt(var + eps) * g1_ref[...] + b1_ref[...]
        ff = jnp.maximum(
            jnp.dot(x1, w1_ref[...], preferred_element_type=jnp.float32) + fb1_ref[...],
            0.0)
        ff = jnp.dot(ff, w2_ref[...], preferred_element_type=jnp.float32) + fb2_ref[...]
        x2 = x1 + ff
        mu2 = jnp.mean(x2, axis=-1, keepdims=True)
        var2 = jnp.mean((x2 - mu2) * (x2 - mu2), axis=-1, keepdims=True)
        o_ref[...] = (x2 - mu2) * jax.lax.rsqrt(var2 + eps) * g2_ref[...] + b2_ref[...]

    args = (h.astype(jnp.float32), wq, wk, wv, bq, bk, bv, wo, ob,
            g1, b1, w1, fb1, w2, fb2, g2, b2)
    return pl.pallas_call(
        kernel,
        out_shape=jax.ShapeDtypeStruct((M, D), jnp.float32),
        grid=(1,),
        in_specs=[_full_spec(a) for a in args],
        out_specs=pl.BlockSpec((M, D), lambda i: (0, 0)),
        scratch_shapes=[pltpu.VMEM((M, D), jnp.float32)],
    )(*args)


# ----------------------------- full model -----------------------------------

def lip_reading_forward(x, params, hidden_dim, vocab_size, nhead=4):
    """x: (B, 3, T, H, W) NCDHW.  Returns (time, batch, vocab_size)."""
    x = jnp.transpose(x, (0, 2, 3, 4, 1)).astype(jnp.float32)   # -> NDHWC
    # --- r3d_18 backbone (children[:-2]) ---
    sw, sbn = params['stem']
    x = conv3d_bn_act(x, sw, sbn[0], sbn[1], (1, 2, 2), (1, 3, 3), relu=True)
    for name in ('layer1', 'layer2', 'layer3', 'layer4'):
        for blk in params[name]:
            x = basic_block(x, blk)
    B, T, H, W, C = x.shape
    S = T * H * W
    feat = x.reshape(B * S, C)               # == view(B,C,THW).permute(0,2,1)
    # --- reduce_dim with positional encoding fused into the GEMM epilogue ---
    pe = positional_encoding(S, hidden_dim)
    h = matmul_bias_act(feat, params['reduce_w'], params['reduce_b'],
                        residual=jnp.tile(pe, (B, 1)))
    # --- transformer encoder (one fused kernel per layer) ---
    for lp in params['encoder']:
        h = encoder_layer_fused(h, lp, B, S, hidden_dim, nhead)
    # --- classifier (lane-dense padded output, sliced back) ---
    Np = _round_up(vocab_size, 128)
    cls_w = jnp.pad(params['cls_w'], ((0, 0), (0, Np - vocab_size)))
    cls_b = jnp.pad(params['cls_b'], ((0, Np - vocab_size),))
    logits = matmul_bias_act(h, cls_w, cls_b)[:, :vocab_size]
    return logits.reshape(B, S, vocab_size).transpose(1, 0, 2)   # (time, batch, vocab)


# ----------------------------- deterministic init ---------------------------

def init_params(key, hidden_dim, vocab_size, ff_dim=2048, num_layers=3):
    keys = list(jax.random.split(key, 256))
    it = iter(keys)

    def w(shape):
        fan_in = 1
        for s in shape[:-1]:
            fan_in *= s
        return jax.random.normal(next(it), shape, jnp.float32) / math.sqrt(fan_in)

    def bn(c, eps=1e-5):
        gamma = jnp.ones((c,), jnp.float32)
        beta = jnp.zeros((c,), jnp.float32)
        mean = jnp.zeros((c,), jnp.float32)
        var = jnp.ones((c,), jnp.float32)
        scale = gamma / jnp.sqrt(var + eps)
        shift = beta - mean * scale
        return (scale, shift)

    params = {}
    params['stem'] = (w((3, 7, 7, 3, 64)), bn(64))
    specs = [('layer1', 64, 64, 1), ('layer2', 64, 128, 2),
             ('layer3', 128, 256, 2), ('layer4', 256, 512, 2)]
    for name, cin, cout, s in specs:
        b0 = dict(conv1_w=w((3, 3, 3, cin, cout)),
                  conv2_w=w((3, 3, 3, cout, cout)),
                  bn1=bn(cout), bn2=bn(cout), stride=(s, s, s))
        if s != 1 or cin != cout:
            b0['down_w'] = w((1, 1, 1, cin, cout))
            b0['down_bn'] = bn(cout)
        b1 = dict(conv1_w=w((3, 3, 3, cout, cout)),
                  conv2_w=w((3, 3, 3, cout, cout)),
                  bn1=bn(cout), bn2=bn(cout), stride=(1, 1, 1))
        params[name] = [b0, b1]
    params['reduce_w'] = w((512, hidden_dim))
    params['reduce_b'] = jnp.zeros((hidden_dim,), jnp.float32)
    enc = []
    for _ in range(num_layers):
        enc.append(dict(
            in_w=w((hidden_dim, 3 * hidden_dim)),
            in_b=jnp.zeros((3 * hidden_dim,), jnp.float32),
            out_w=w((hidden_dim, hidden_dim)),
            out_b=jnp.zeros((hidden_dim,), jnp.float32),
            ff1_w=w((hidden_dim, ff_dim)),
            ff1_b=jnp.zeros((ff_dim,), jnp.float32),
            ff2_w=w((ff_dim, hidden_dim)),
            ff2_b=jnp.zeros((hidden_dim,), jnp.float32),
            ln1_g=jnp.ones((hidden_dim,), jnp.float32),
            ln1_b=jnp.zeros((hidden_dim,), jnp.float32),
            ln2_g=jnp.ones((hidden_dim,), jnp.float32),
            ln2_b=jnp.zeros((hidden_dim,), jnp.float32),
        ))
    params['encoder'] = enc
    params['cls_w'] = w((hidden_dim, vocab_size))
    params['cls_b'] = jnp.zeros((vocab_size,), jnp.float32)
    return params


if __name__ == "__main__":
    key = jax.random.PRNGKey(0)
    pkey, xkey = jax.random.split(key)
    hidden_dim = 32
    vocab_size = 40
    B, Cin, T, H, W = 2, 3, 16, 32, 32          # backbone -> (B, 512, 2, 2, 2) -> seq = 8
    params = init_params(pkey, hidden_dim, vocab_size)
    x = jax.random.normal(xkey, (B, Cin, T, H, W), jnp.float32)

    logits = lip_reading_forward(x, params, hidden_dim, vocab_size)
    logits = jax.block_until_ready(logits)

    assert logits.shape == (8, B, vocab_size), logits.shape
    assert bool(jnp.all(jnp.isfinite(logits)))
    print("KERNEL_OK")
</pallas_src>

<mosaic_0001>
module attributes {stable_mosaic.version = 11 : i64} {
  func.func @kernel(%arg0: i32, %arg1: i32, %arg2: memref<1024x441xbf16, #tpu.memory_space<vmem>>, %arg3: memref<441x64xbf16, #tpu.memory_space<vmem>>, %arg4: memref<1x64xf32, #tpu.memory_space<vmem>>, %arg5: memref<1024x64xf32, #tpu.memory_space<vmem>>, %arg6: memref<1024x64xf32, #tpu.memory_space<vmem>>) attributes {dimension_semantics = [#tpu.dimension_semantics<parallel>, #tpu.dimension_semantics<arbitrary>], iteration_bounds = array<i64: 8, 1>, scalar_prefetch = 0 : i64, scratch_operands = 1 : i64, tpu.core_type = #tpu.core_type<tc>, window_params = [{transform_indices = @transform_0, window_bounds = array<i64: 1024, 441>}, {transform_indices = @transform_1, window_bounds = array<i64: 441, 64>}, {pipeline_mode = #tpu.pipeline_mode<synchronous>, transform_indices = @transform_2, window_bounds = array<i64: 1, 64>}, {transform_indices = @transform_3, window_bounds = array<i64: 1024, 64>}]} {
    %c0_i32 = arith.constant 0 : i32
    %0 = arith.cmpi eq, %arg1, %c0_i32 : i32
    %1 = arith.extui %0 : i1 to i32
    %c0_i32_0 = arith.constant 0 : i32
    %2 = arith.cmpi ne, %1, %c0_i32_0 : i32
    scf.if %2 {
      %cst_10 = arith.constant 0.000000e+00 : f32
      %12 = vector.broadcast %cst_10 : f32 to vector<1024x64xf32>
      %c0_11 = arith.constant 0 : index
      %c0_12 = arith.constant 0 : index
      %13 = vector.load %arg6[%c0_11, %c0_12] : memref<1024x64xf32, #tpu.memory_space<vmem>>, vector<1024x64xf32>
      tpu.vector_store %arg6[%c0_11, %c0_12], %12 {strides = array<i32>} : memref<1024x64xf32, #tpu.memory_space<vmem>>, vector<1024x64xf32>,
    } else {
    }
    %c0 = arith.constant 0 : index
    %c0_1 = arith.constant 0 : index
    %3 = vector.load %arg6[%c0, %c0_1] : memref<1024x64xf32, #tpu.memory_space<vmem>>, vector<1024x64xf32>
    %c0_2 = arith.constant 0 : index
    %c0_3 = arith.constant 0 : index
    %4 = vector.load %arg2[%c0_2, %c0_3] : memref<1024x441xbf16, #tpu.memory_space<vmem>>, vector<1024x441xbf16>
    %c0_4 = arith.constant 0 : index
    %c0_5 = arith.constant 0 : index
    %5 = vector.load %arg3[%c0_4, %c0_5] : memref<441x64xbf16, #tpu.memory_space<vmem>>, vector<441x64xbf16>
    %cst = arith.constant dense<0.000000e+00> : vector<1024x64xf32>
    %6 = tpu.matmul %4, %5, %cst {dimension_numbers = #tpu.dot_dimension_numbers<[1], [0], [0], [1], [0, 0, 1, 1], [], []>} : vector<1024x441xbf16>, vector<441x64xbf16>, vector<1024x64xf32> -> vector<1024x64xf32>
    %7 = arith.addf %3, %6 : vector<1024x64xf32>
    %c0_6 = arith.constant 0 : index
    %c0_7 = arith.constant 0 : index
    %8 = vector.load %arg6[%c0_6, %c0_7] : memref<1024x64xf32, #tpu.memory_space<vmem>>, vector<1024x64xf32>
    tpu.vector_store %arg6[%c0_6, %c0_7], %7 {strides = array<i32>} : memref<1024x64xf32, #tpu.memory_space<vmem>>, vector<1024x64xf32>,
    %c0_i32_8 = arith.constant 0 : i32
    %9 = arith.cmpi eq, %arg1, %c0_i32_8 : i32
    %10 = arith.extui %9 : i1 to i32
    %c0_i32_9 = arith.constant 0 : i32
    %11 = arith.cmpi ne, %10, %c0_i32_9 : i32
    scf.if %11 {
      %c0_10 = arith.constant 0 : index
      %c0_11 = arith.constant 0 : index
      %12 = vector.load %arg6[%c0_10, %c0_11] : memref<1024x64xf32, #tpu.memory_space<vmem>>, vector<1024x64xf32>
      %c0_12 = arith.constant 0 : index
      %c0_13 = arith.constant 0 : index
      %13 = vector.load %arg4[%c0_12, %c0_13] : memref<1x64xf32, #tpu.memory_space<vmem>>, vector<1x64xf32>
      %14 = vector.broadcast %13 : vector<1x64xf32> to vector<1024x64xf32>
      %15 = arith.addf %12, %14 : vector<1024x64xf32>
      %cst_14 = arith.constant 0.000000e+00 : f32
      %16 = vector.broadcast %cst_14 : f32 to vector<1024x64xf32>
      %17 = arith.maximumf %15, %16 : vector<1024x64xf32>
      %c0_15 = arith.constant 0 : index
      %c0_16 = arith.constant 0 : index
      %18 = vector.load %arg5[%c0_15, %c0_16] : memref<1024x64xf32, #tpu.memory_space<vmem>>, vector<1024x64xf32>
      tpu.vector_store %arg5[%c0_15, %c0_16], %17 {strides = array<i32>} : memref<1024x64xf32, #tpu.memory_space<vmem>>, vector<1024x64xf32>,
    } else {
    }
    return
  }
  func.func @transform_0(%arg0: i32, %arg1: i32) -> (i32, i32) {
    %c0_i32 = arith.constant 0 : i32
    return %arg0, %arg1 : i32, i32
  }
  func.func @transform_1(%arg0: i32, %arg1: i32) -> (i32, i32) {
    %c0_i32 = arith.constant 0 : i32
    %c0_i32_0 = arith.constant 0 : i32
    return %arg1, %c0_i32 : i32, i32
  }
  func.func @transform_2(%arg0: i32, %arg1: i32) -> (i32, i32) {
    %c0_i32 = arith.constant 0 : i32
    %c0_i32_0 = arith.constant 0 : i32
    %c0_i32_1 = arith.constant 0 : i32
    return %c0_i32, %c0_i32_0 : i32, i32
  }
  func.func @transform_3(%arg0: i32, %arg1: i32) -> (i32, i32) {
    %c0_i32 = arith.constant 0 : i32
    %c0_i32_0 = arith.constant 0 : i32
    return %arg0, %c0_i32 : i32, i32
  }
}

</mosaic_0001>

<bundles_post_ra>
// kernel: tpu_custom_call.1
= control target key start
LH: loop header
LB: loop body
LE: loop exit
PB: predicated region body
PF: predicated region fallthrough
CT: control target
= control target key end

     0   :  { %s5154_s12 = smov 0   ;;  %s5156_s13 = smov 0   ;;  %s6461_s0 = inlined_call_operand.vmem [shape: bf16[8192,441], index: 0, kind: input, shape index: {}]   ;;  %s6462_s1 = inlined_call_operand.vmem [shape: bf16[441,64], index: 1, kind: input, shape index: {}]   ;;  %s6463_s2 = inlined_call_operand.vmem [shape: f32[1,64], index: 2, kind: input, shape index: {}]   ;;  %s6464_s3 = inlined_call_operand.vmem [shape: f32[8192,64], index: 3, kind: output, shape index: {}]  }
   0x1   :  { %s5158_s14 = smov 0  }
   0x2 LB: > { %s25_s15 = sadd.s32 1, %s5125_s13  ;;  %p4344_p0 = scmp.ge.s32.totalorder %s5129_s14, 1  ;;  %s5129_s14 = sphi %s5158_s14, %s13_s14   ;;  %s5125_s13 = sphi %s5156_s13, %s6466_s13   ;;  %s5121_s12 = sphi %s5154_s12, %s6465_s12  }
   0x3   : > { %p27_p1 = scmp.ge.s32.totalorder %s25_s15, 8  ;;  %p169_p2 = scmp.lt.s32.totalorder %s5129_s14, 9 }
   0x5   : > { %s6468_s15 = smov (%p27_p1, %s25_s15), 0  ;;  %p170_p3 = pnand %p4344_p0, %p169_p2 }
   0x6   : > { %v4729_v0 = vld [vmem:[%s6462_s1] sm:$0xff] (!%p170_p3)   ;;  %v5131_v1 = vmov (!%p170_p3), 0   ;;  %v4730_v2 = vld [vmem:[%s6462_s1 + $0x8] sm:$0xff] (!%p170_p3)   ;;  %v4731_v4 = vld [vmem:[%s6462_s1 + $0x10] sm:$0xff] (!%p170_p3)   ;;  %s4345_s30 = sshll.u32 (!%p170_p3), %s5121_s12, 7  ;;  %vm2184_vm0 = vcmask (!%p170_p3), 465920  }
   0x7   : > { %173 = sbr.rel (%p170_p3) target bundleno = 806 (0x326), region = 32  ;;  %2384 = vmatprep.subr.bf16.mxu0 (!%p170_p3), %v5131_v1  ;;  %2929 = vmatprep.subr.bf16.mxu1 (!%p170_p3), %v5131_v1  ;;  %v4733_v3 = vld [vmem:[%s6462_s1 + $0x80] sm:$0xff] (!%p170_p3)   ;;  %v4735_v5 = vld [vmem:[%s6462_s1 + $0x88] sm:$0xff] (!%p170_p3)   ;;  %v4732_v6 = vld [vmem:[%s6462_s1 + $0x18] sm:$0xff] (!%p170_p3)   ;;  %p205_p4 = scmp.lt.s32.totalorder (!%p170_p3), %s4345_s30, 1023  ;;  %vm2377_vm1 = vcmask (!%p170_p3), 1043456  }
   0x8   : > { %2385 = vmatpush1.bf16.msra.mxu0 (!%p170_p3), %v4729_v0  ;;  %2930 = vmatpush1.bf16.msra.mxu1 (!%p170_p3), %v4733_v3  ;;  %v4737_v7 = vld [vmem:[%s6462_s1 + $0x90] sm:$0xff] (!%p170_p3)   ;;  %v4734_v8 = vld [vmem:[%s6462_s1 + $0x20] sm:$0xff] (!%p170_p3)   ;;  %v4739_v9 = vld [vmem:[%s6462_s1 + $0x98] sm:$0xff] (!%p170_p3)   ;;  %vm2378_vm2 = vcmask (!%p170_p3), 1044480   ;;  %v5132_v24 = vmov (!%p170_p3), 65535   ;;  %vm232_vm3 = vcmask (!%p170_p3), 523264  }
   0x9   : > { %2386 = vmatprep.subr.bf16.mxu0 (!%p170_p3), %v5131_v1  ;;  %2931 = vmatprep.subr.bf16.mxu1 (!%p170_p3), %v5131_v1  ;;  %v4736_v10 = vld [vmem:[%s6462_s1 + $0x28] sm:$0xff] (!%p170_p3)   ;;  %v4741_v11 = vld [vmem:[%s6462_s1 + $0xa0] sm:$0xff] (!%p170_p3)   ;;  %v4738_v12 = vld [vmem:[%s6462_s1 + $0x30] sm:$0xff] (!%p170_p3)   ;;  %v2379_v25 = vsel (!%p170_p3), %vm2377_vm1, 4294967295, %v5132_v24 }
   0xa   : > { %v4743_v13 = vld [vmem:[%s6462_s1 + $0xa8] sm:$0xff] (!%p170_p3)   ;;  %v4740_v14 = vld [vmem:[%s6462_s1 + $0x38] sm:$0xff] (!%p170_p3)   ;;  %v4745_v15 = vld [vmem:[%s6462_s1 + $0xb0] sm:$0xff] (!%p170_p3)   ;;  %v2380_v29 = vsel (!%p170_p3), %vm2378_vm2, %v2379_v25, 0 }
   0xb   : > { %v4742_v17 = vld [vmem:[%s6462_s1 + $0x40] sm:$0xff] (!%p170_p3)   ;;  %v4747_v18 = vld [vmem:[%s6462_s1 + $0xb8] sm:$0xff] (!%p170_p3)   ;;  %v4744_v20 = vld [vmem:[%s6462_s1 + $0x48] sm:$0xff] (!%p170_p3)  }
   0xc   : > { %2387 = vmatpush1.bf16.msra.mxu0 (!%p170_p3), %v4730_v2  ;;  %2932 = vmatpush1.bf16.msra.mxu1 (!%p170_p3), %v4735_v5  ;;  %v4749_v21 = vld [vmem:[%s6462_s1 + $0xc0] sm:$0xff] (!%p170_p3)   ;;  %v4746_v22 = vld [vmem:[%s6462_s1 + $0x50] sm:$0xff] (!%p170_p3)   ;;  %v4751_v23 = vld [vmem:[%s6462_s1 + $0xc8] sm:$0xff] (!%p170_p3)  }
   0xd   : > { %2388 = vmatprep.subr.bf16.mxu0 (!%p170_p3), %v5131_v1  ;;  %2933 = vmatprep.subr.bf16.mxu1 (!%p170_p3), %v5131_v1  ;;  %v4748_v26 = vld [vmem:[%s6462_s1 + $0x58] sm:$0xff] (!%p170_p3)   ;;  %v4753_v27 = vld [vmem:[%s6462_s1 + $0xd0] sm:$0xff] (!%p170_p3)   ;;  %v4750_v30 = vld [vmem:[%s6462_s1 + $0x60] sm:$0xff] (!%p170_p3)  }
   0xe   : > { %s6470_s30 = smov (!%p205_p4, %s4345_s30), 1023  ;;  %v4755_v28 = vld [vmem:[%s6462_s1 + $0xd8] sm:$0x1f]   ;;  %v4752_v33 = vld [vmem:[%s6462_s1 + $0x68] sm:$0xff]   ;;  %v4754_v35 = vld [vmem:[%s6462_s1 + $0x70] sm:$0xff]  }
   0xf   : > { %s4701_s19 = sshll.u32 %s6470_s30, 4  ;;  %v2382_v31 = vand.u32 %v4755_v28, %v2380_v29  ;;  %v4759_v37 = vld [vmem:[%s6462_s1 + $0x78] sm:$0xff]   ;;  %s4349_s7 = sshll.u32 %s6470_s30, 3 }
  0x10   : > { %2389 = vmatpush1.bf16.msra.mxu0 %v4731_v4  ;;  %2934 = vmatpush1.bf16.msra.mxu1 %v4737_v7  ;;  %s5236_s24 = scalar_lea.vmem %s6461_s0, %s4701_s19  ;;  %s5726_s10 = scalar_lea.vmem %s6464_s3, %s4349_s7 }
  0x11   : > { %2390 = vmatprep.subr.bf16.mxu0 %v5131_v1  ;;  %2935 = vmatprep.subr.bf16.mxu1 %v5131_v1  ;;  %v4758_v16 = vld [vmem:[%s5236_s24 + $0xc] ss:$16 sps:$4 sm:$0xff]   ;;  %v4762_v19 = vld [vmem:[%s5236_s24 + $0x4] ss:$16 sps:$4 sm:$0xff]   ;;  %v4756_v32 = vld [vmem:[%s5236_s24 + $0x8] ss:$16 sps:$4 sm:$0xff]  }
  0x12   : > { %4634 = vmatprep.mubr.msk.bf16.mxu1 %vm2184_vm0, %v4758_v16  ;;  %2416 = vmatprep.mubr.bf16.mxu0 %v4762_v19  ;;  %v4763_v34 = vld [vmem:[%s5236_s24 + $0x2c] ss:$16 sps:$4 sm:$0xff]   ;;  %v4765_v36 = vld [vmem:[%s5236_s24 + $0x28] ss:$16 sps:$4 sm:$0xff]   ;;  %v4760_v39 = vld [vmem:[%s5236_s24] ss:$16 sps:$4 sm:$0xff]  }
  0x13   : > { %v4769_v38 = vld [vmem:[%s5236_s24 + $0x4c] ss:$16 sps:$4 sm:$0xff]   ;;  %v4766_v40 = vld [vmem:[%s5236_s24 + $0x24] ss:$16 sps:$4 sm:$0xff]   ;;  %v4771_v41 = vld [vmem:[%s5236_s24 + $0x48] ss:$16 sps:$4 sm:$0xff]  }
  0x14   : > { %2391 = vmatpush1.bf16.msra.mxu0 %v4732_v6  ;;  %2936 = vmatpush1.bf16.msra.mxu1 %v4739_v9  ;;  %v4775_v42 = vld [vmem:[%s5236_s24 + $0x6c] ss:$16 sps:$4 sm:$0xff]   ;;  %v4768_v43 = vld [vmem:[%s5236_s24 + $0x20] ss:$16 sps:$4 sm:$0xff]   ;;  %v4772_v44 = vld [vmem:[%s5236_s24 + $0x44] ss:$16 sps:$4 sm:$0xff]  }
  0x15   : > { %2392 = vmatprep.subr.bf16.mxu0 %v5131_v1  ;;  %2937 = vmatprep.subr.bf16.mxu1 %v5131_v1  ;;  %v4777_v45 = vld [vmem:[%s5236_s24 + $0x68] ss:$16 sps:$4 sm:$0xff]   ;;  %v4781_v46 = vld [vmem:[%s5236_s24 + $0x8c] ss:$16 sps:$4 sm:$0xff]   ;;  %v4774_v47 = vld [vmem:[%s5236_s24 + $0x40] ss:$16 sps:$4 sm:$0xff]  }
  0x16   : > { %v4778_v48 = vld [vmem:[%s5236_s24 + $0x64] ss:$16 sps:$4 sm:$0xff]   ;;  %v4783_v49 = vld [vmem:[%s5236_s24 + $0x88] ss:$16 sps:$4 sm:$0xff]   ;;  %v4787_v50 = vld [vmem:[%s5236_s24 + $0xac] ss:$16 sps:$4 sm:$0xff]  }
  0x17   : > { %v4780_v51 = vld [vmem:[%s5236_s24 + $0x60] ss:$16 sps:$4 sm:$0xff]   ;;  %v4784_v52 = vld [vmem:[%s5236_s24 + $0x84] ss:$16 sps:$4 sm:$0xff]   ;;  %v4789_v53 = vld [vmem:[%s5236_s24 + $0xa8] ss:$16 sps:$4 sm:$0xff]  }
  0x18   : > { %2393 = vmatpush1.bf16.msra.mxu0 %v4734_v8  ;;  %2938 = vmatpush1.bf16.msra.mxu1 %v4741_v11  ;;  %v4793_v54 = vld [vmem:[%s5236_s24 + $0xcc] ss:$16 sps:$4 sm:$0xff]   ;;  %v4786_v55 = vld [vmem:[%s5236_s24 + $0x80] ss:$16 sps:$4 sm:$0xff]   ;;  %v4790_v56 = vld [vmem:[%s5236_s24 + $0xa4] ss:$16 sps:$4 sm:$0xff]  }
  0x19   : > { %2394 = vmatprep.subr.bf16.mxu0 %v5131_v1  ;;  %2939 = vmatprep.subr.bf16.mxu1 %v5131_v1  ;;  %v4795_v57 = vld [vmem:[%s5236_s24 + $0xc8] ss:$16 sps:$4 sm:$0xff]   ;;  %v4799_v58 = vld [vmem:[%s5236_s24 + $0xec] ss:$16 sps:$4 sm:$0xff]   ;;  %v4792_v59 = vld [vmem:[%s5236_s24 + $0xa0] ss:$16 sps:$4 sm:$0xff]  }
  0x1a   : > { %v4796_v60 = vld [vmem:[%s5236_s24 + $0xc4] ss:$16 sps:$4 sm:$0xff]   ;;  %v4801_v61 = vld [vmem:[%s5236_s24 + $0xe8] ss:$16 sps:$4 sm:$0xff]   ;;  %v4805_v62 = vld [vmem:[%s5236_s24 + $0x10c] ss:$16 sps:$4 sm:$0xff]  }
  0x1b   : > { %v4798_v63 = vld [vmem:[%s5236_s24 + $0xc0] ss:$16 sps:$4 sm:$0xff]   ;;  %v4802_v0 = vld [vmem:[%s5236_s24 + $0xe4] ss:$16 sps:$4 sm:$0xff]   ;;  %v4811_v2 = vld [vmem:[%s5236_s24 + $0x12c] ss:$16 sps:$4 sm:$0xff]  }
  0x1c   : > { %2395 = vmatpush1.bf16.msra.mxu0 %v4736_v10  ;;  %2940 = vmatpush1.bf16.msra.mxu1 %v4743_v13  ;;  %v4804_v3 = vld [vmem:[%s5236_s24 + $0xe0] ss:$16 sps:$4 sm:$0xff]   ;;  %v4808_v4 = vld [vmem:[%s5236_s24 + $0x104] ss:$16 sps:$4 sm:$0xff]   ;;  %v4813_v5 = vld [vmem:[%s5236_s24 + $0x128] ss:$16 sps:$4 sm:$0xff]  }
  0x1d   : > { %2396 = vmatprep.subr.bf16.mxu0 %v5131_v1  ;;  %2941 = vmatprep.subr.bf16.mxu1 %v5131_v1  ;;  %v4817_v6 = vld [vmem:[%s5236_s24 + $0x14c] ss:$16 sps:$4 sm:$0xff]   ;;  %v4810_v7 = vld [vmem:[%s5236_s24 + $0x100] ss:$16 sps:$4 sm:$0xff]   ;;  %v4814_v8 = vld [vmem:[%s5236_s24 + $0x124] ss:$16 sps:$4 sm:$0xff]  }
  0x1e   : > { %v4819_v9 = vld [vmem:[%s5236_s24 + $0x148] ss:$16 sps:$4 sm:$0xff]   ;;  %v4823_v10 = vld [vmem:[%s5236_s24 + $0x16c] ss:$16 sps:$4 sm:$0xff]   ;;  %v4816_v11 = vld [vmem:[%s5236_s24 + $0x120] ss:$16 sps:$4 sm:$0xff]  }
  0x1f   : > { %v4825_v13 = vld [vmem:[%s5236_s24 + $0x168] ss:$16 sps:$4 sm:$0xff]   ;;  %v5357_v16 = vld [vmem:[%s5236_s24 + $0x164] ss:$16 sps:$4 sm:$0xff]   ;;  %v4835_v19 = vld [vmem:[%s5236_s24 + $0x1ac] ss:$16 sps:$4 sm:$0xff]  }
  0x20   : > { %2397 = vmatpush1.bf16.msra.mxu0 %v4738_v12  ;;  %2942 = vmatpush1.bf16.msra.mxu1 %v4745_v15  ;;  %v4820_v12 = vld [vmem:[%s5236_s24 + $0x144] ss:$16 sps:$4 sm:$0xff]   ;;  %v5354_v15 = vld [vmem:[%s5236_s24 + $0x140] ss:$16 sps:$4 sm:$0xff]  }
  0x21   : > { %2398 = vmatprep.subr.bf16.mxu0 %v5131_v1  ;;  %2943 = vmatprep.subr.bf16.mxu1 %v5131_v1  ;;  %v4834_v24 = vld [vmem:[%s5236_s24 + $0x180] ss:$16 sps:$4 sm:$0xff]   ;;  %v4838_v25 = vld [vmem:[%s5236_s24 + $0x1a4] ss:$16 sps:$4 sm:$0xff]  }
  0x22   : > { %v4840_v28 = vld [vmem:[%s5236_s24 + $0x1a0] ss:$16 sps:$4 sm:$0xff]   ;;  %v4844_v29 = vld [vmem:[%s5236_s24 + $0x1c4] ss:$16 sps:$4 sm:$0xff]  }
  0x24   : > { %2399 = vmatpush1.bf16.msra.mxu0 %v4740_v14  ;;  %2944 = vmatpush1.bf16.msra.mxu1 %v4747_v18  ;;  %v4829_v14 = vld [vmem:[%s5236_s24 + $0x18c] ss:$16 sps:$4 sm:$0xff]   ;;  %v4831_v18 = vld [vmem:[%s5236_s24 + $0x188] ss:$16 sps:$4 sm:$0xff]  }
  0x25   : > { %2400 = vmatprep.subr.bf16.mxu0 %v5131_v1  ;;  %2945 = vmatprep.subr.bf16.mxu1 %v5131_v1 }
  0x28   : > { %2401 = vmatpush1.bf16.msra.mxu0 %v4742_v17  ;;  %2946 = vmatpush1.bf16.msra.mxu1 %v4749_v21  ;;  %v5133_v17 = vmov 0.0   ;;  %v4832_v21 = vld [vmem:[%s5236_s24 + $0x184] ss:$16 sps:$4 sm:$0xff]  }
  0x29   : > { %2402 = vmatprep.subr.bf16.mxu0 %v5131_v1  ;;  %2947 = vmatprep.subr.bf16.mxu1 %v5131_v1  ;;  %233 = vst.msk [vmem:[#allocation2] sm:$0xff] %vm232_vm3, %v5133_v17  ;;  %234 = vst.msk [vmem:[#allocation2 + $0x8] sm:$0xff] %vm232_vm3, %v5133_v17 }
  0x2a   : > { %235 = vst.msk [vmem:[#allocation2 + $0x10] sm:$0xff] %vm232_vm3, %v5133_v17  ;;  %236 = vst.msk [vmem:[#allocation2 + $0x18] sm:$0xff] %vm232_vm3, %v5133_v17 }
  0x2b   : > { %237 = vst.msk [vmem:[#allocation2 + $0x20] sm:$0xff] %vm232_vm3, %v5133_v17  ;;  %238 = vst.msk [vmem:[#allocation2 + $0x28] sm:$0xff] %vm232_vm3, %v5133_v17 }
  0x2c   : > { %2403 = vmatpush1.bf16.msra.mxu0 %v4744_v20  ;;  %2948 = vmatpush1.bf16.msra.mxu1 %v4751_v23  ;;  %239 = vst.msk [vmem:[#allocation2 + $0x30] sm:$0xff] %vm232_vm3, %v5133_v17  ;;  %240 = vst.msk [vmem:[#allocation2 + $0x38] sm:$0xff] %vm232_vm3, %v5133_v17  ;;  %v4828_v20 = vld [vmem:[%s5236_s24 + $0x160] ss:$16 sps:$4 sm:$0xff]   ;;  %v4841_v23 = vld [vmem:[%s5236_s24 + $0x1cc] ss:$16 sps:$4 sm:$0xff]  }
  0x2d   : > { %2404 = vmatprep.subr.bf16.mxu0 %v5131_v1  ;;  %2949 = vmatprep.subr.bf16.mxu1 %v5131_v1  ;;  %241 = vst.msk [vmem:[#allocation2 + $0x40] sm:$0xff] %vm232_vm3, %v5133_v17  ;;  %242 = vst.msk [vmem:[#allocation2 + $0x48] sm:$0xff] %vm232_vm3, %v5133_v17 }
  0x2e   : > { %243 = vst.msk [vmem:[#allocation2 + $0x50] sm:$0xff] %vm232_vm3, %v5133_v17  ;;  %244 = vst.msk [vmem:[#allocation2 + $0x58] sm:$0xff] %vm232_vm3, %v5133_v17 }
  0x2f   : > { %245 = vst.msk [vmem:[#allocation2 + $0x60] sm:$0xff] %vm232_vm3, %v5133_v17  ;;  %246 = vst.msk [vmem:[#allocation2 + $0x68] sm:$0xff] %vm232_vm3, %v5133_v17 }
  0x30   : > { %2405 = vmatpush1.bf16.msra.mxu0 %v4746_v22  ;;  %2950 = vmatpush1.bf16.msra.mxu1 %v4753_v27  ;;  %247 = vst.msk [vmem:[#allocation2 + $0x70] sm:$0xff] %vm232_vm3, %v5133_v17  ;;  %248 = vst.msk [vmem:[#allocation2 + $0x78] sm:$0xff] %vm232_vm3, %v5133_v17  ;;  %v4837_v22 = vld [vmem:[%s5236_s24 + $0x1a8] ss:$16 sps:$4 sm:$0xff]   ;;  %v4847_v27 = vld [vmem:[%s5236_s24 + $0x1ec] ss:$16 sps:$4 sm:$0xff]  }
  0x31   : > { %2406 = vmatprep.subr.bf16.mxu0 %v5131_v1  ;;  %2951 = vmatprep.subr.bf16.mxu1 %v5131_v1  ;;  %249 = vst.msk [vmem:[#allocation2 + $0x80] sm:$0xff] %vm232_vm3, %v5133_v17  ;;  %250 = vst.msk [vmem:[#allocation2 + $0x88] sm:$0xff] %vm232_vm3, %v5133_v17 }
  0x32   : > { %251 = vst.msk [vmem:[#allocation2 + $0x90] sm:$0xff] %vm232_vm3, %v5133_v17  ;;  %252 = vst.msk [vmem:[#allocation2 + $0x98] sm:$0xff] %vm232_vm3, %v5133_v17 }
  0x33   : > { %253 = vst.msk [vmem:[#allocation2 + $0xa0] sm:$0xff] %vm232_vm3, %v5133_v17  ;;  %254 = vst.msk [vmem:[#allocation2 + $0xa8] sm:$0xff] %vm232_vm3, %v5133_v17 }
  0x34   : > { %2407 = vmatpush1.bf16.msra.mxu0 %v4748_v26  ;;  %2952 = vmatpush1.bf16.msra.mxu1 %v2382_v31  ;;  %255 = vst.msk [vmem:[#allocation2 + $0xb0] sm:$0xff] %vm232_vm3, %v5133_v17  ;;  %256 = vst.msk [vmem:[#allocation2 + $0xb8] sm:$0xff] %vm232_vm3, %v5133_v17  ;;  %v4843_v26 = vld [vmem:[%s5236_s24 + $0x1c8] ss:$16 sps:$4 sm:$0xff]   ;;  %v4853_v31 = vld [vmem:[%s5236_s24 + $0x20c] ss:$16 sps:$4 sm:$0xff]  }
  0x35   : > { %2408 = vmatprep.subr.bf16.mxu0 %v5131_v1  ;;  %257 = vst.msk [vmem:[#allocation2 + $0xc0] sm:$0xff] %vm232_vm3, %v5133_v17  ;;  %258 = vst.msk [vmem:[#allocation2 + $0xc8] sm:$0xff] %vm232_vm3, %v5133_v17 }
  0x36   : > { %259 = vst.msk [vmem:[#allocation2 + $0xd0] sm:$0xff] %vm232_vm3, %v5133_v17  ;;  %260 = vst.msk [vmem:[#allocation2 + $0xd8] sm:$0xff] %vm232_vm3, %v5133_v17 }
  0x37   : > { %2962 = vmatmul.mubr.bf16.vlgmr.msra.gmra.mrb[0].mxu1 %v4756_v32  ;;  %261 = vst.msk [vmem:[#allocation2 + $0xe0] sm:$0xff] %vm232_vm3, %v5133_v17  ;;  %262 = vst.msk [vmem:[#allocation2 + $0xe8] sm:$0xff] %vm232_vm3, %v5133_v17  ;;  %v4846_v32 = vld [vmem:[%s5236_s24 + $0x1c0] ss:$16 sps:$4 sm:$0xff]  }
  0x38   : > { %2409 = vmatpush1.bf16.msra.mxu0 %v4750_v30  ;;  %4635 = vmatprep.mubr.msk.bf16.mxu1 %vm2184_vm0, %v4763_v34  ;;  %263 = vst.msk [vmem:[#allocation2 + $0xf0] sm:$0xff] %vm232_vm3, %v5133_v17  ;;  %264 = vst.msk [vmem:[#allocation2 + $0xf8] sm:$0xff] %vm232_vm3, %v5133_v17  ;;  %v4849_v30 = vld [vmem:[%s5236_s24 + $0x1e8] ss:$16 sps:$4 sm:$0xff]  }
  0x39   : > { %2410 = vmatprep.subr.bf16.mxu0 %v5131_v1  ;;  %265 = vst.msk [vmem:[#allocation2 + $0x100] sm:$0xff] %vm232_vm3, %v5133_v17  ;;  %266 = vst.msk [vmem:[#allocation2 + $0x108] sm:$0xff] %vm232_vm3, %v5133_v17  ;;  %v4855_v34 = vld [vmem:[%s5236_s24 + $0x208] ss:$16 sps:$4 sm:$0xff]  }
  0x3a   : > { %267 = vst.msk [vmem:[#allocation2 + $0x110] sm:$0xff] %vm232_vm3, %v5133_v17  ;;  %268 = vst.msk [vmem:[#allocation2 + $0x118] sm:$0xff] %vm232_vm3, %v5133_v17 }
  0x3b   : > { %269 = vst.msk [vmem:[#allocation2 + $0x120] sm:$0xff] %vm232_vm3, %v5133_v17  ;;  %270 = vst.msk [vmem:[#allocation2 + $0x128] sm:$0xff] %vm232_vm3, %v5133_v17 }
  0x3c   : > { %2411 = vmatpush1.bf16.msra.mxu0 %v4752_v33  ;;  %271 = vst.msk [vmem:[#allocation2 + $0x130] sm:$0xff] %vm232_vm3, %v5133_v17  ;;  %272 = vst.msk [vmem:[#allocation2 + $0x138] sm:$0xff] %vm232_vm3, %v5133_v17  ;;  %v4850_v33 = vld [vmem:[%s5236_s24 + $0x1e4] ss:$16 sps:$4 sm:$0xff]  }
  0x3d   : > { %2412 = vmatprep.subr.bf16.mxu0 %v5131_v1  ;;  %273 = vst.msk [vmem:[#allocation2 + $0x140] sm:$0xff] %vm232_vm3, %v5133_v17  ;;  %274 = vst.msk [vmem:[#allocation2 + $0x148] sm:$0xff] %vm232_vm3, %v5133_v17 }
  0x3e   : > { %275 = vst.msk [vmem:[#allocation2 + $0x150] sm:$0xff] %vm232_vm3, %v5133_v17  ;;  %276 = vst.msk [vmem:[#allocation2 + $0x158] sm:$0xff] %vm232_vm3, %v5133_v17 }
  0x3f   : > { %2970 = vmatmul.mubr.bf16.gmra.mrb[4].mxu1 %v4765_v36  ;;  %277 = vst.msk [vmem:[#allocation2 + $0x160] sm:$0xff] %vm232_vm3, %v5133_v17  ;;  %278 = vst.msk [vmem:[#allocation2 + $0x168] sm:$0xff] %vm232_vm3, %v5133_v17  ;;  %v4852_v36 = vld [vmem:[%s5236_s24 + $0x1e0] ss:$16 sps:$4 sm:$0xff]  }
  0x40   : > { %2413 = vmatpush1.bf16.msra.mxu0 %v4754_v35  ;;  %4636 = vmatprep.mubr.msk.bf16.mxu1 %vm2184_vm0, %v4769_v38  ;;  %279 = vst.msk [vmem:[#allocation2 + $0x170] sm:$0xff] %vm232_vm3, %v5133_v17  ;;  %280 = vst.msk [vmem:[#allocation2 + $0x178] sm:$0xff] %vm232_vm3, %v5133_v17  ;;  %v4859_v35 = vld [vmem:[%s5236_s24 + $0x22c] ss:$16 sps:$4 sm:$0xff]   ;;  %v4861_v38 = vld [vmem:[%s5236_s24 + $0x228] ss:$16 sps:$4 sm:$0xff]  }
  0x41   : > { %2414 = vmatprep.subr.bf16.mxu0 %v5131_v1  ;;  %v4807_v1 = vld [vmem:[%s5236_s24 + $0x108] ss:$16 sps:$4 sm:$0xff]   ;;  %281 = vst.msk [vmem:[#allocation2 + $0x180] sm:$0xff] %vm232_vm3, %v5133_v17  ;;  %282 = vst.msk [vmem:[#allocation2 + $0x188] sm:$0xff] %vm232_vm3, %v5133_v17 }
  0x42   : > { %283 = vst.msk [vmem:[#allocation2 + $0x190] sm:$0xff] %vm232_vm3, %v5133_v17  ;;  %284 = vst.msk [vmem:[#allocation2 + $0x198] sm:$0xff] %vm232_vm3, %v5133_v17 }
  0x43   : > { %285 = vst.msk [vmem:[#allocation2 + $0x1a0] sm:$0xff] %vm232_vm3, %v5133_v17  ;;  %286 = vst.msk [vmem:[#allocation2 + $0x1a8] sm:$0xff] %vm232_vm3, %v5133_v17 }
  0x44   : > { %2415 = vmatpush1.bf16.msra.mxu0 %v4759_v37  ;;  %287 = vst.msk [vmem:[#allocation2 + $0x1b0] sm:$0xff] %vm232_vm3, %v5133_v17  ;;  %288 = vst.msk [vmem:[#allocation2 + $0x1b8] sm:$0xff] %vm232_vm3, %v5133_v17  ;;  %v4856_v37 = vld [vmem:[%s5236_s24 + $0x204] ss:$16 sps:$4 sm:$0xff]  }
  0x45   : > { %289 = vst.msk [vmem:[#allocation2 + $0x1c0] sm:$0xff] %vm232_vm3, %v5133_v17  ;;  %290 = vst.msk [vmem:[#allocation2 + $0x1c8] sm:$0xff] %vm232_vm3, %v5133_v17 }
  0x46   : > { %291 = vst.msk [vmem:[#allocation2 + $0x1d0] sm:$0xff] %vm232_vm3, %v5133_v17  ;;  %292 = vst.msk [vmem:[#allocation2 + $0x1d8] sm:$0xff] %vm232_vm3, %v5133_v17 }
  0x47   : > { %2417 = vmatmul.mubr.bf16.vlgmr.msra.gmra.mrb[0].mxu0 %v4760_v39  ;;  %2978 = vmatmul.mubr.bf16.gmra.mrb[8].mxu1 %v4771_v41  ;;  %293 = vst.msk [vmem:[#allocation2 + $0x1e0] sm:$0xff] %vm232_vm3, %v5133_v17  ;;  %294 = vst.msk [vmem:[#allocation2 + $0x1e8] sm:$0xff] %vm232_vm3, %v5133_v17  ;;  %v4865_v39 = vld [vmem:[%s5236_s24 + $0x24c] ss:$16 sps:$4 sm:$0xff]   ;;  %v4862_v41 = vld [vmem:[%s5236_s24 + $0x224] ss:$16 sps:$4 sm:$0xff]  }
  0x48   : > { %2424 = vmatprep.mubr.bf16.mxu0 %v4766_v40  ;;  %4637 = vmatprep.mubr.msk.bf16.mxu1 %vm2184_vm0, %v4775_v42  ;;  %295 = vst.msk [vmem:[#allocation2 + $0x1f0] sm:$0xff] %vm232_vm3, %v5133_v17  ;;  %296 = vst.msk [vmem:[#allocation2 + $0x1f8] sm:$0xff] %vm232_vm3, %v5133_v17  ;;  %v4858_v40 = vld [vmem:[%s5236_s24 + $0x200] ss:$16 sps:$4 sm:$0xff]   ;;  %v4867_v42 = vld [vmem:[%s5236_s24 + $0x248] ss:$16 sps:$4 sm:$0xff]  }
  0x49   : > { %297 = vst.msk [vmem:[#allocation2 + $0x200] sm:$0xff] %vm232_vm3, %v5133_v17  ;;  %298 = vst.msk [vmem:[#allocation2 + $0x208] sm:$0xff] %vm232_vm3, %v5133_v17 }
  0x4a   : > { %299 = vst.msk [vmem:[#allocation2 + $0x210] sm:$0xff] %vm232_vm3, %v5133_v17  ;;  %300 = vst.msk [vmem:[#allocation2 + $0x218] sm:$0xff] %vm232_vm3, %v5133_v17 }
  0x4b   : > { %301 = vst.msk [vmem:[#allocation2 + $0x220] sm:$0xff] %vm232_vm3, %v5133_v17  ;;  %302 = vst.msk [vmem:[#allocation2 + $0x228] sm:$0xff] %vm232_vm3, %v5133_v17 }
  0x4c   : > { %303 = vst.msk [vmem:[#allocation2 + $0x230] sm:$0xff] %vm232_vm3, %v5133_v17  ;;  %304 = vst.msk [vmem:[#allocation2 + $0x238] sm:$0xff] %vm232_vm3, %v5133_v17 }
  0x4d   : > { %305 = vst.msk [vmem:[#allocation2 + $0x240] sm:$0xff] %vm232_vm3, %v5133_v17  ;;  %306 = vst.msk [vmem:[#allocation2 + $0x248] sm:$0xff] %vm232_vm3, %v5133_v17 }
  0x4e   : > { %307 = vst.msk [vmem:[#allocation2 + $0x250] sm:$0xff] %vm232_vm3, %v5133_v17  ;;  %308 = vst.msk [vmem:[#allocation2 + $0x258] sm:$0xff] %vm232_vm3, %v5133_v17 }
  0x4f   : > { %2425 = vmatmul.mubr.bf16.gmra.mrb[4].mxu0 %v4768_v43  ;;  %2986 = vmatmul.mubr.bf16.gmra.mrb[12].mxu1 %v4777_v45  ;;  %309 = vst.msk [vmem:[#allocation2 + $0x260] sm:$0xff] %vm232_vm3, %v5133_v17  ;;  %310 = vst.msk [vmem:[#allocation2 + $0x268] sm:$0xff] %vm232_vm3, %v5133_v17  ;;  %v4871_v43 = vld [vmem:[%s5236_s24 + $0x26c] ss:$16 sps:$4 sm:$0xff]   ;;  %v4868_v45 = vld [vmem:[%s5236_s24 + $0x244] ss:$16 sps:$4 sm:$0xff]  }
  0x50   : > { %2432 = vmatprep.mubr.bf16.mxu0 %v4772_v44  ;;  %4638 = vmatprep.mubr.msk.bf16.mxu1 %vm2184_vm0, %v4781_v46  ;;  %311 = vst.msk [vmem:[#allocation2 + $0x270] sm:$0xff] %vm232_vm3, %v5133_v17  ;;  %312 = vst.msk [vmem:[#allocation2 + $0x278] sm:$0xff] %vm232_vm3, %v5133_v17  ;;  %v4864_v44 = vld [vmem:[%s5236_s24 + $0x220] ss:$16 sps:$4 sm:$0xff]   ;;  %v4873_v46 = vld [vmem:[%s5236_s24 + $0x268] ss:$16 sps:$4 sm:$0xff]  }
  0x51   : > { %313 = vst.msk [vmem:[#allocation2 + $0x280] sm:$0xff] %vm232_vm3, %v5133_v17  ;;  %314 = vst.msk [vmem:[#allocation2 + $0x288] sm:$0xff] %vm232_vm3, %v5133_v17 }
  0x52   : > { %315 = vst.msk [vmem:[#allocation2 + $0x290] sm:$0xff] %vm232_vm3, %v5133_v17  ;;  %316 = vst.msk [vmem:[#allocation2 + $0x298] sm:$0xff] %vm232_vm3, %v5133_v17 }
  0x53   : > { %317 = vst.msk [vmem:[#allocation2 + $0x2a0] sm:$0xff] %vm232_vm3, %v5133_v17  ;;  %318 = vst.msk [vmem:[#allocation2 + $0x2a8] sm:$0xff] %vm232_vm3, %v5133_v17 }
  0x54   : > { %319 = vst.msk [vmem:[#allocation2 + $0x2b0] sm:$0xff] %vm232_vm3, %v5133_v17  ;;  %320 = vst.msk [vmem:[#allocation2 + $0x2b8] sm:$0xff] %vm232_vm3, %v5133_v17 }
  0x55   : > { %321 = vst.msk [vmem:[#allocation2 + $0x2c0] sm:$0xff] %vm232_vm3, %v5133_v17  ;;  %322 = vst.msk [vmem:[#allocation2 + $0x2c8] sm:$0xff] %vm232_vm3, %v5133_v17 }
  0x56   : > { %323 = vst.msk [vmem:[#allocation2 + $0x2d0] sm:$0xff] %vm232_vm3, %v5133_v17  ;;  %324 = vst.msk [vmem:[#allocation2 + $0x2d8] sm:$0xff] %vm232_vm3, %v5133_v17 }
  0x57   : > { %2433 = vmatmul.mubr.bf16.gmra.mrb[8].mxu0 %v4774_v47  ;;  %2994 = vmatmul.mubr.bf16.gmra.mrb[16].mxu1 %v4783_v49  ;;  %325 = vst.msk [vmem:[#allocation2 + $0x2e0] sm:$0xff] %vm232_vm3, %v5133_v17  ;;  %326 = vst.msk [vmem:[#allocation2 + $0x2e8] sm:$0xff] %vm232_vm3, %v5133_v17  ;;  %v4877_v47 = vld [vmem:[%s5236_s24 + $0x28c] ss:$16 sps:$4 sm:$0xff]   ;;  %v4874_v49 = vld [vmem:[%s5236_s24 + $0x264] ss:$16 sps:$4 sm:$0xff]  }
  0x58   : > { %2440 = vmatprep.mubr.bf16.mxu0 %v4778_v48  ;;  %4639 = vmatprep.mubr.msk.bf16.mxu1 %vm2184_vm0, %v4787_v50  ;;  %327 = vst.msk [vmem:[#allocation2 + $0x2f0] sm:$0xff] %vm232_vm3, %v5133_v17  ;;  %328 = vst.msk [vmem:[#allocation2 + $0x2f8] sm:$0xff] %vm232_vm3, %v5133_v17  ;;  %v4870_v48 = vld [vmem:[%s5236_s24 + $0x240] ss:$16 sps:$4 sm:$0xff]   ;;  %v4879_v50 = vld [vmem:[%s5236_s24 + $0x288] ss:$16 sps:$4 sm:$0xff]  }
  0x59   : > { %329 = vst.msk [vmem:[#allocation2 + $0x300] sm:$0xff] %vm232_vm3, %v5133_v17  ;;  %330 = vst.msk [vmem:[#allocation2 + $0x308] sm:$0xff] %vm232_vm3, %v5133_v17 }
  0x5a   : > { %331 = vst.msk [vmem:[#allocation2 + $0x310] sm:$0xff] %vm232_vm3, %v5133_v17  ;;  %332 = vst.msk [vmem:[#allocation2 + $0x318] sm:$0xff] %vm232_vm3, %v5133_v17 }
  0x5b   : > { %333 = vst.msk [vmem:[#allocation2 + $0x320] sm:$0xff] %vm232_vm3, %v5133_v17  ;;  %334 = vst.msk [vmem:[#allocation2 + $0x328] sm:$0xff] %vm232_vm3, %v5133_v17 }
  0x5c   : > { %335 = vst.msk [vmem:[#allocation2 + $0x330] sm:$0xff] %vm232_vm3, %v5133_v17  ;;  %336 = vst.msk [vmem:[#allocation2 + $0x338] sm:$0xff] %vm232_vm3, %v5133_v17 }
  0x5d   : > { %337 = vst.msk [vmem:[#allocation2 + $0x340] sm:$0xff] %vm232_vm3, %v5133_v17  ;;  %338 = vst.msk [vmem:[#allocation2 + $0x348] sm:$0xff] %vm232_vm3, %v5133_v17 }
  0x5e   : > { %339 = vst.msk [vmem:[#allocation2 + $0x350] sm:$0xff] %vm232_vm3, %v5133_v17  ;;  %340 = vst.msk [vmem:[#allocation2 + $0x358] sm:$0xff] %vm232_vm3, %v5133_v17 }
  0x5f   : > { %2441 = vmatmul.mubr.bf16.gmra.mrb[12].mxu0 %v4780_v51  ;;  %3002 = vmatmul.mubr.bf16.gmra.mrb[20].mxu1 %v4789_v53  ;;  %341 = vst.msk [vmem:[#allocation2 + $0x360] sm:$0xff] %vm232_vm3, %v5133_v17  ;;  %342 = vst.msk [vmem:[#allocation2 + $0x368] sm:$0xff] %vm232_vm3, %v5133_v17  ;;  %v4883_v51 = vld [vmem:[%s5236_s24 + $0x2ac] ss:$16 sps:$4 sm:$0xff]   ;;  %v4880_v53 = vld [vmem:[%s5236_s24 + $0x284] ss:$16 sps:$4 sm:$0xff]  }
  0x60   : > { %2448 = vmatprep.mubr.bf16.mxu0 %v4784_v52  ;;  %4640 = vmatprep.mubr.msk.bf16.mxu1 %vm2184_vm0, %v4793_v54  ;;  %343 = vst.msk [vmem:[#allocation2 + $0x370] sm:$0xff] %vm232_vm3, %v5133_v17  ;;  %344 = vst.msk [vmem:[#allocation2 + $0x378] sm:$0xff] %vm232_vm3, %v5133_v17  ;;  %v4876_v52 = vld [vmem:[%s5236_s24 + $0x260] ss:$16 sps:$4 sm:$0xff]   ;;  %v4885_v54 = vld [vmem:[%s5236_s24 + $0x2a8] ss:$16 sps:$4 sm:$0xff]  }
  0x61   : > { %345 = vst.msk [vmem:[#allocation2 + $0x380] sm:$0xff] %vm232_vm3, %v5133_v17  ;;  %346 = vst.msk [vmem:[#allocation2 + $0x388] sm:$0xff] %vm232_vm3, %v5133_v17 }
  0x62   : > { %347 = vst.msk [vmem:[#allocation2 + $0x390] sm:$0xff] %vm232_vm3, %v5133_v17  ;;  %348 = vst.msk [vmem:[#allocation2 + $0x398] sm:$0xff] %vm232_vm3, %v5133_v17 }
  0x63   : > { %349 = vst.msk [vmem:[#allocation2 + $0x3a0] sm:$0xff] %vm232_vm3, %v5133_v17  ;;  %350 = vst.msk [vmem:[#allocation2 + $0x3a8] sm:$0xff] %vm232_vm3, %v5133_v17 }
  0x64   : > { %351 = vst.msk [vmem:[#allocation2 + $0x3b0] sm:$0xff] %vm232_vm3, %v5133_v17  ;;  %352 = vst.msk [vmem:[#allocation2 + $0x3b8] sm:$0xff] %vm232_vm3, %v5133_v17 }
  0x65   : > { %353 = vst.msk [vmem:[#allocation2 + $0x3c0] sm:$0xff] %vm232_vm3, %v5133_v17  ;;  %354 = vst.msk [vmem:[#allocation2 + $0x3c8] sm:$0xff] %vm232_vm3, %v5133_v17 }
  0x66   : > { %355 = vst.msk [vmem:[#allocation2 + $0x3d0] sm:$0xff] %vm232_vm3, %v5133_v17  ;;  %356 = vst.msk [vmem:[#allocation2 + $0x3d8] sm:$0xff] %vm232_vm3, %v5133_v17 }
  0x67   : > { %2449 = vmatmul.mubr.bf16.gmra.mrb[16].mxu0 %v4786_v55  ;;  %3010 = vmatmul.mubr.bf16.gmra.mrb[24].mxu1 %v4795_v57  ;;  %357 = vst.msk [vmem:[#allocation2 + $0x3e0] sm:$0xff] %vm232_vm3, %v5133_v17  ;;  %358 = vst.msk [vmem:[#allocation2 + $0x3e8] sm:$0xff] %vm232_vm3, %v5133_v17  ;;  %v4889_v55 = vld [vmem:[%s5236_s24 + $0x2cc] ss:$16 sps:$4 sm:$0xff]   ;;  %v4886_v57 = vld [vmem:[%s5236_s24 + $0x2a4] ss:$16 sps:$4 sm:$0xff]  }
  0x68   : > { %2456 = vmatprep.mubr.bf16.mxu0 %v4790_v56  ;;  %4641 = vmatprep.mubr.msk.bf16.mxu1 %vm2184_vm0, %v4799_v58  ;;  %359 = vst.msk [vmem:[#allocation2 + $0x3f0] sm:$0xff] %vm232_vm3, %v5133_v17  ;;  %360 = vst.msk [vmem:[#allocation2 + $0x3f8] sm:$0xff] %vm232_vm3, %v5133_v17  ;;  %v4882_v56 = vld [vmem:[%s5236_s24 + $0x280] ss:$16 sps:$4 sm:$0xff]   ;;  %v4891_v58 = vld [vmem:[%s5236_s24 + $0x2c8] ss:$16 sps:$4 sm:$0xff]  }
  0x6f   : > { %2457 = vmatmul.mubr.bf16.gmra.mrb[20].mxu0 %v4792_v59  ;;  %3018 = vmatmul.mubr.bf16.gmra.mrb[28].mxu1 %v4801_v61  ;;  %v4895_v59 = vld [vmem:[%s5236_s24 + $0x2ec] ss:$16 sps:$4 sm:$0xff]   ;;  %v4892_v61 = vld [vmem:[%s5236_s24 + $0x2c4] ss:$16 sps:$4 sm:$0xff]  }
  0x70   : > { %2464 = vmatprep.mubr.bf16.mxu0 %v4796_v60  ;;  %4642 = vmatprep.mubr.msk.bf16.mxu1 %vm2184_vm0, %v4805_v62  ;;  %v4888_v60 = vld [vmem:[%s5236_s24 + $0x2a0] ss:$16 sps:$4 sm:$0xff]   ;;  %v4897_v62 = vld [vmem:[%s5236_s24 + $0x2e8] ss:$16 sps:$4 sm:$0xff]  }
  0x77   : > { %2465 = vmatmul.mubr.bf16.gmra.mrb[24].mxu0 %v4798_v63  ;;  %3026 = vmatmul.mubr.bf16.gmra.mrb[32].mxu1 %v4807_v1  ;;  %v4901_v63 = vld [vmem:[%s5236_s24 + $0x30c] ss:$16 sps:$4 sm:$0xff]   ;;  %v4898_v1 = vld [vmem:[%s5236_s24 + $0x2e4] ss:$16 sps:$4 sm:$0xff]  }
  0x78   : > { %2472 = vmatprep.mubr.bf16.mxu0 %v4802_v0  ;;  %4643 = vmatprep.mubr.msk.bf16.mxu1 %vm2184_vm0, %v4811_v2  ;;  %v4894_v0 = vld [vmem:[%s5236_s24 + $0x2c0] ss:$16 sps:$4 sm:$0xff]   ;;  %v4903_v2 = vld [vmem:[%s5236_s24 + $0x308] ss:$16 sps:$4 sm:$0xff]  }
  0x7f   : > { %2473 = vmatmul.mubr.bf16.gmra.mrb[28].mxu0 %v4804_v3  ;;  %3034 = vmatmul.mubr.bf16.gmra.mrb[36].mxu1 %v4813_v5  ;;  %v4907_v3 = vld [vmem:[%s5236_s24 + $0x32c] ss:$16 sps:$4 sm:$0xff]   ;;  %v4904_v5 = vld [vmem:[%s5236_s24 + $0x304] ss:$16 sps:$4 sm:$0xff]  }
  0x80   : > { %2480 = vmatprep.mubr.bf16.mxu0 %v4808_v4  ;;  %4644 = vmatprep.mubr.msk.bf16.mxu1 %vm2184_vm0, %v4817_v6  ;;  %v4900_v4 = vld [vmem:[%s5236_s24 + $0x2e0] ss:$16 sps:$4 sm:$0xff]   ;;  %v4909_v6 = vld [vmem:[%s5236_s24 + $0x328] ss:$16 sps:$4 sm:$0xff]  }
  0x87   : > { %2481 = vmatmul.mubr.bf16.gmra.mrb[32].mxu0 %v4810_v7  ;;  %3042 = vmatmul.mubr.bf16.gmra.mrb[40].mxu1 %v4819_v9  ;;  %v4913_v7 = vld [vmem:[%s5236_s24 + $0x34c] ss:$16 sps:$4 sm:$0xff]   ;;  %v4910_v9 = vld [vmem:[%s5236_s24 + $0x324] ss:$16 sps:$4 sm:$0xff]  }
  0x88   : > { %2488 = vmatprep.mubr.bf16.mxu0 %v4814_v8  ;;  %4645 = vmatprep.mubr.msk.bf16.mxu1 %vm2184_vm0, %v4823_v10  ;;  %v4906_v8 = vld [vmem:[%s5236_s24 + $0x300] ss:$16 sps:$4 sm:$0xff]   ;;  %v4915_v10 = vld [vmem:[%s5236_s24 + $0x348] ss:$16 sps:$4 sm:$0xff]  }
  0x8f   : > { %2489 = vmatmul.mubr.bf16.gmra.mrb[36].mxu0 %v4816_v11  ;;  %3050 = vmatmul.mubr.bf16.gmra.mrb[44].mxu1 %v4825_v13  ;;  %v4919_v11 = vld [vmem:[%s5236_s24 + $0x36c] ss:$16 sps:$4 sm:$0xff]   ;;  %v4916_v13 = vld [vmem:[%s5236_s24 + $0x344] ss:$16 sps:$4 sm:$0xff]  }
  0x90   : > { %2496 = vmatprep.mubr.bf16.mxu0 %v4820_v12  ;;  %4646 = vmatprep.mubr.msk.bf16.mxu1 %vm2184_vm0, %v4829_v14  ;;  %v4912_v12 = vld [vmem:[%s5236_s24 + $0x320] ss:$16 sps:$4 sm:$0xff]   ;;  %v598_v14 = vld [vmem:[%s5236_s24 + $0x368] sm:$0xff] }
  0x97   : > { %2497 = vmatmul.mubr.bf16.gmra.mrb[40].mxu0 %v5354_v15  ;;  %3058 = vmatmul.mubr.bf16.gmra.mrb[48].mxu1 %v4831_v18  ;;  %v600_v15 = vld [vmem:[%s5236_s24 + $0x378] sm:$0xff] }
  0x98   : > { %2504 = vmatprep.mubr.bf16.mxu0 %v5357_v16  ;;  %4647 = vmatprep.mubr.msk.bf16.mxu1 %vm2184_vm0, %v4835_v19  ;;  %v4460_v18 = vcombine.low %v598_v14, %v600_v15  ;;  %v365_v14 = vld [vmem:[#allocation2 + $0x20] sm:$0xff] }
  0x9f   : > { %2505 = vmatmul.mubr.bf16.gmra.mrb[44].mxu0 %v4828_v20  ;;  %3066 = vmatmul.mubr.bf16.gmra.mrb[52].mxu1 %v4837_v22  ;;  %v4924_v20 = vld [vmem:[%s5236_s24 + $0x38c] ss:$16 sps:$4 sm:$0xff]   ;;  %v4918_v22 = vld [vmem:[%s5236_s24 + $0x340] ss:$16 sps:$4 sm:$0xff]  }
  0xa0   : > { %2512 = vmatprep.mubr.bf16.mxu0 %v4832_v21  ;;  %4648 = vmatprep.mubr.msk.bf16.mxu1 %vm2184_vm0, %v4841_v23  ;;  %v4921_v23 = vld [vmem:[%s5236_s24 + $0x364] ss:$16 sps:$4 sm:$0xff]  }
  0xa7   : > { %2513 = vmatmul.mubr.bf16.gmra.mrb[48].mxu0 %v4834_v24  ;;  %3074 = vmatmul.mubr.bf16.gmra.mrb[56].mxu1 %v4843_v26  ;;  %v602_v24 = vld [vmem:[%s5236_s24 + $0x388] sm:$0xff] }
  0xa8   : > { %2520 = vmatprep.mubr.bf16.mxu0 %v4838_v25  ;;  %4649 = vmatprep.mubr.msk.bf16.mxu1 %vm2184_vm0, %v4847_v27  ;;  %v604_v25 = vld [vmem:[%s5236_s24 + $0x398] sm:$0xff] }
  0xaf   : > { %2521 = vmatmul.mubr.bf16.gmra.mrb[52].mxu0 %v4840_v28  ;;  %3082 = vmatmul.mubr.bf16.gmra.mrb[60].mxu1 %v4849_v30  ;;  %v4464_v28 = vcombine.low %v602_v24, %v604_v25  ;;  %v4929_v30 = vld [vmem:[%s5236_s24 + $0x3ac] ss:$16 sps:$4 sm:$0xff]  }
  0xb0   : > { %2528 = vmatprep.mubr.bf16.mxu0 %v4844_v29  ;;  %4650 = vmatprep.mubr.msk.bf16.mxu1 %vm2184_vm0, %v4853_v31  ;;  %v616_v24 = vld [vmem:[%s5236_s24 + $0x3f8] sm:$0xff] }
  0xb7   : > { %2529 = vmatmul.mubr.bf16.gmra.mrb[56].mxu0 %v4846_v32  ;;  %3090 = vmatmul.mubr.bf16.gmra.mrb[64].mxu1 %v4855_v34  ;;  %v361_v32 = vld [vmem:[#allocation2] sm:$0xff] }
  0xb8   : > { %2536 = vmatprep.mubr.bf16.mxu0 %v4850_v33  ;;  %4651 = vmatprep.mubr.msk.bf16.mxu1 %vm2184_vm0, %v4859_v35 }
  0xbf   : > { %2537 = vmatmul.mubr.bf16.gmra.mrb[60].mxu0 %v4852_v36  ;;  %3098 = vmatmul.mubr.bf16.gmra.mrb[68].mxu1 %v4861_v38  ;;  %v362_v36 = vld [vmem:[#allocation2 + $0x8] sm:$0xff] }
  0xc0   : > { %2544 = vmatprep.mubr.bf16.mxu0 %v4856_v37  ;;  %4652 = vmatprep.mubr.msk.bf16.mxu1 %vm2184_vm0, %v4865_v39  ;;  %v4923_v37 = vld [vmem:[%s5236_s24 + $0x360] ss:$16 sps:$4 sm:$0xff]   ;;  %v4926_v39 = vld [vmem:[%s5236_s24 + $0x384] ss:$16 sps:$4 sm:$0xff]  }
  0xc7   : > { %2545 = vmatmul.mubr.bf16.gmra.mrb[64].mxu0 %v4858_v40  ;;  %3106 = vmatmul.mubr.bf16.gmra.mrb[72].mxu1 %v4867_v42  ;;  %v606_v40 = vld [vmem:[%s5236_s24 + $0x3a8] sm:$0xff] }
  0xc8   : > { %2552 = vmatprep.mubr.bf16.mxu0 %v4862_v41  ;;  %4653 = vmatprep.mubr.msk.bf16.mxu1 %vm2184_vm0, %v4871_v43  ;;  %v608_v41 = vld [vmem:[%s5236_s24 + $0x3b8] sm:$0xff] }
  0xcf   : > { %2553 = vmatmul.mubr.bf16.gmra.mrb[68].mxu0 %v4864_v44  ;;  %3114 = vmatmul.mubr.bf16.gmra.mrb[76].mxu1 %v4873_v46 }
  0xd0   : > { %2560 = vmatprep.mubr.bf16.mxu0 %v4868_v45  ;;  %4654 = vmatprep.mubr.msk.bf16.mxu1 %vm2184_vm0, %v4877_v47 }
  0xd7   : > { %2561 = vmatmul.mubr.bf16.gmra.mrb[72].mxu0 %v4870_v48  ;;  %3122 = vmatmul.mubr.bf16.gmra.mrb[80].mxu1 %v4879_v50  ;;  %v4468_v48 = vcombine.low %v606_v40, %v608_v41  ;;  %v4934_v50 = vld [vmem:[%s5236_s24 + $0x3cc] ss:$16 sps:$4 sm:$0xff]   ;;  %v367_v40 = vld [vmem:[#allocation2 + $0x30] sm:$0xff] }
  0xd8   : > { %2568 = vmatprep.mubr.bf16.mxu0 %v4874_v49  ;;  %4655 = vmatprep.mubr.msk.bf16.mxu1 %vm2184_vm0, %v4883_v51 }
  0xdf   : > { %2569 = vmatmul.mubr.bf16.gmra.mrb[76].mxu0 %v4876_v52  ;;  %3130 = vmatmul.mubr.bf16.gmra.mrb[84].mxu1 %v4885_v54  ;;  %v363_v52 = vld [vmem:[#allocation2 + $0x10] sm:$0xff]  ;;  %v5713_v54 = vld [vmem:[%s6463_s2] ss:$0 sm:$0xff] }
  0xe0   : > { %2576 = vmatprep.mubr.bf16.mxu0 %v4880_v53  ;;  %4656 = vmatprep.mubr.msk.bf16.mxu1 %vm2184_vm0, %v4889_v55 }
  0xe7   : > { %2577 = vmatmul.mubr.bf16.gmra.mrb[80].mxu0 %v4882_v56  ;;  %3138 = vmatmul.mubr.bf16.gmra.mrb[88].mxu1 %v4891_v58  ;;  %v4928_v58 = vld [vmem:[%s5236_s24 + $0x380] ss:$16 sps:$4 sm:$0xff]  }
  0xe8   : > { %2584 = vmatprep.mubr.bf16.mxu0 %v4886_v57  ;;  %4657 = vmatprep.mubr.msk.bf16.mxu1 %vm2184_vm0, %v4895_v59  ;;  %v364_v57 = vld [vmem:[#allocation2 + $0x18] sm:$0xff] }
  0xef   : > { %2585 = vmatmul.mubr.bf16.gmra.mrb[84].mxu0 %v4888_v60  ;;  %3146 = vmatmul.mubr.bf16.gmra.mrb[92].mxu1 %v4897_v62  ;;  %v4931_v60 = vld [vmem:[%s5236_s24 + $0x3a4] ss:$16 sps:$4 sm:$0xff]   ;;  %v612_v62 = vld [vmem:[%s5236_s24 + $0x3d8] sm:$0xff] }
  0xf0   : > { %2592 = vmatprep.mubr.bf16.mxu0 %v4892_v61  ;;  %4658 = vmatprep.mubr.msk.bf16.mxu1 %vm2184_vm0, %v4901_v63  ;;  %v610_v61 = vld [vmem:[%s5236_s24 + $0x3c8] sm:$0xff] }
  0xf7   : > { %2593 = vmatmul.mubr.bf16.gmra.mrb[88].mxu0 %v4894_v0  ;;  %3154 = vmatmul.mubr.bf16.gmra.mrb[96].mxu1 %v4903_v2 }
  0xf8   : > { %2600 = vmatprep.mubr.bf16.mxu0 %v4898_v1  ;;  %4659 = vmatprep.mubr.msk.bf16.mxu1 %vm2184_vm0, %v4907_v3 }
  0xff   : > { %2601 = vmatmul.mubr.bf16.gmra.mrb[92].mxu0 %v4900_v4  ;;  %3162 = vmatmul.mubr.bf16.gmra.mrb[100].mxu1 %v4909_v6 }
 0x100   : > { %2608 = vmatprep.mubr.bf16.mxu0 %v4904_v5  ;;  %4660 = vmatprep.mubr.msk.bf16.mxu1 %vm2184_vm0, %v4913_v7  ;;  %v4472_v7 = vcombine.low %v610_v61, %v612_v62 }
 0x107   : > { %2609 = vmatmul.mubr.bf16.gmra.mrb[96].mxu0 %v4906_v8  ;;  %3170 = vmatmul.mubr.bf16.gmra.mrb[104].mxu1 %v4915_v10  ;;  %v4939_v10 = vld [vmem:[%s5236_s24 + $0x3ec] ss:$16 sps:$4 sm:$0xff]  }
 0x108   : > { %2616 = vmatprep.mubr.bf16.mxu0 %v4910_v9  ;;  %4661 = vmatprep.mubr.msk.bf16.mxu1 %vm2184_vm0, %v4919_v11 }
 0x10a   : > { %v2963_v16 = vpop.f32.mrb[0].mxu1 }
 0x10b   : > { %v2965_v17 = vpop.f32.mrb[1].mxu1 }
 0x10c   : > { %v2966_v19 = vpop.f32.mrb[2].mxu1 }
 0x10d   : > { %v2968_v21 = vpop.f32.mrb[3].mxu1 }
 0x10f   : > { %2617 = vmatmul.mubr.bf16.gmra.mrb[100].mxu0 %v4912_v12  ;;  %3178 = vmatmul.mubr.bf16.gmra.mrb[108].mxu1 %v4460_v18 }
 0x110   : > { %2624 = vmatprep.mubr.bf16.mxu0 %v4916_v13  ;;  %4662 = vmatprep.mubr.msk.bf16.mxu1 %vm2184_vm0, %v4924_v20  ;;  %v4933_v20 = vld [vmem:[%s5236_s24 + $0x3a0] ss:$16 sps:$4 sm:$0xff]  }
 0x112   : > { %v2971_v26 = vpop.f32.mrb[4].mxu1 }
 0x113   : > { %v2973_v27 = vpop.f32.mrb[5].mxu1 }
 0x114   : > { %v2974_v29 = vpop.f32.mrb[6].mxu1 }
 0x115   : > { %v2976_v31 = vpop.f32.mrb[7].mxu1 }
 0x117   : > { %2625 = vmatmul.mubr.bf16.gmra.mrb[104].mxu0 %v4918_v22  ;;  %3186 = vmatmul.mubr.bf16.gmra.mrb[112].mxu1 %v4464_v28  ;;  %v4936_v22 = vld [vmem:[%s5236_s24 + $0x3c4] ss:$16 sps:$4 sm:$0xff]  }
 0x118   : > { %2632 = vmatprep.mubr.bf16.mxu0 %v4921_v23  ;;  %4663 = vmatprep.mubr.msk.bf16.mxu1 %vm2184_vm0, %v4929_v30  ;;  %v614_v23 = vld [vmem:[%s5236_s24 + $0x3e8] sm:$0xff] }
 0x11a   : > { %v2418_v33 = vpop.f32.mrb[0].mxu0  ;;  %v2979_v45 = vpop.f32.mrb[8].mxu1 }
 0x11b   : > { %v2964_v34 = vadd.f32 %v2963_v16, %v2418_v33  ;;  %v2420_v35 = vpop.f32.mrb[1].mxu0  ;;  %v2981_v47 = vpop.f32.mrb[9].mxu1  ;;  %v4476_v33 = vcombine.low %v614_v23, %v616_v24 }
 0x11c   : > { %v2421_v38 = vpop.f32.mrb[2].mxu0  ;;  %v2982_v49 = vpop.f32.mrb[10].mxu1 }
 0x11d   : > { %v3474_v42 = vadd.f32 %v2964_v34, %v361_v32  ;;  %v2967_v43 = vadd.f32 %v2966_v19, %v2421_v38  ;;  %v2423_v44 = vpop.f32.mrb[3].mxu0  ;;  %v2984_v51 = vpop.f32.mrb[11].mxu1  ;;  %v366_v19 = vld [vmem:[#allocation2 + $0x28] sm:$0xff] }
 0x11f   : > { %3603 = vst.msk [vmem:[#allocation2] sm:$0xff] %vm232_vm3, %v3474_v42  ;;  %v3475_v46 = vadd.f32 %v2967_v43, %v362_v36  ;;  %2633 = vmatmul.mubr.bf16.gmra.mrb[108].mxu0 %v4923_v37  ;;  %3194 = vmatmul.mubr.bf16.gmra.mrb[116].mxu1 %v4468_v48  ;;  %v4944_v36 = vld [vmem:[%s5236_s24 + $0x40c] ss:$16 sps:$4 sm:$0xff]   ;;  %v4941_v48 = vld [vmem:[%s5236_s24 + $0x3e4] ss:$16 sps:$4 sm:$0xff]  }
 0x120   : > { %2640 = vmatprep.mubr.bf16.mxu0 %v4926_v39  ;;  %4664 = vmatprep.mubr.msk.bf16.mxu1 %vm2184_vm0, %v4934_v50  ;;  %v620_v50 = vld [vmem:[%s5236_s24 + $0x418] sm:$0xff] }
 0x121   : > { %3604 = vst.msk [vmem:[#allocation2 + $0x8] sm:$0xff] %vm232_vm3, %v3475_v46  ;;  %v4938_v46 = vld [vmem:[%s5236_s24 + $0x3c0] ss:$16 sps:$4 sm:$0xff]  }
 0x122   : > { %v2426_v53 = vpop.f32.mrb[4].mxu0  ;;  %v2987_v3 = vpop.f32.mrb[12].mxu1 }
 0x123   : > { %v2972_v55 = vadd.f32 %v2971_v26, %v2426_v53  ;;  %v2428_v56 = vpop.f32.mrb[5].mxu0  ;;  %v2989_v6 = vpop.f32.mrb[13].mxu1 }
 0x124   : > { %v2429_v59 = vpop.f32.mrb[6].mxu0  ;;  %v2990_v9 = vpop.f32.mrb[14].mxu1 }
 0x125   : > { %v3476_v63 = vadd.f32 %v2972_v55, %v363_v52  ;;  %v2975_v0 = vadd.f32 %v2974_v29, %v2429_v59  ;;  %v2431_v1 = vpop.f32.mrb[7].mxu0  ;;  %v2992_v13 = vpop.f32.mrb[15].mxu1 }
 0x126   : > { %v3734_v2 = vld [vmem:[#allocation2] sm:$0xff]  ;;  %v624_v13 = vld [vmem:[%s5236_s24 + $0x438] sm:$0xff] }
 0x127   : > { %v3869_v4 = vadd.f32 %v5713_v54, %v3734_v2  ;;  %3605 = vst.msk [vmem:[#allocation2 + $0x10] sm:$0xff] %vm232_vm3, %v3476_v63  ;;  %v3477_v5 = vadd.f32 %v2975_v0, %v364_v57  ;;  %2641 = vmatmul.mubr.bf16.gmra.mrb[112].mxu0 %v4928_v58  ;;  %3202 = vmatmul.mubr.bf16.gmra.mrb[120].mxu1 %v4472_v7  ;;  %v4949_v63 = vld [vmem:[%s5236_s24 + $0x42c] ss:$16 sps:$4 sm:$0xff]  }
 0x128   : > { %v3735_v8 = vld [vmem:[#allocation2 + $0x8] sm:$0xff]  ;;  %2648 = vmatprep.mubr.bf16.mxu0 %v4931_v60  ;;  %4665 = vmatprep.mubr.msk.bf16.mxu1 %vm2184_vm0, %v4939_v10 }
 0x129   : > { %v3997_v11 = vmax.f32 %v3869_v4, 0.0  ;;  %v3870_v12 = vadd.f32 %v5713_v54, %v3735_v8  ;;  %3606 = vst.msk [vmem:[#allocation2 + $0x18] sm:$0xff] %vm232_vm3, %v3477_v5  ;;  %v370_v8 = vld [vmem:[#allocation2 + $0x48] sm:$0xff] }
 0x12a   : > { %v2434_v15 = vpop.f32.mrb[8].mxu0  ;;  %v2995_v29 = vpop.f32.mrb[16].mxu1 }
 0x12b   : > { %4125 = vst.msk [vmem:[%s5726_s10] sm:$0xff] %vm232_vm3, %v3997_v11  ;;  %v3998_v16 = vmax.f32 %v3870_v12, 0.0  ;;  %v2980_v17 = vadd.f32 %v2979_v45, %v2434_v15  ;;  %v2436_v18 = vpop.f32.mrb[9].mxu0  ;;  %v2997_v32 = vpop.f32.mrb[17].mxu1  ;;  %v368_v45 = vld [vmem:[#allocation2 + $0x38] sm:$0xff]  ;;  %v622_v12 = vld [vmem:[%s5236_s24 + $0x428] sm:$0xff] }
 0x12c   : > { %v2437_v21 = vpop.f32.mrb[10].mxu0  ;;  %v2998_v35 = vpop.f32.mrb[18].mxu1  ;;  %v4946_v11 = vld [vmem:[%s5236_s24 + $0x404] ss:$16 sps:$4 sm:$0xff]  }
 0x12d   : > { %4126 = vst.msk [vmem:[%s5726_s10 + $0x8] sm:$0xff] %vm232_vm3, %v3998_v16  ;;  %v3478_v25 = vadd.f32 %v2980_v17, %v365_v14  ;;  %v2983_v26 = vadd.f32 %v2982_v49, %v2437_v21  ;;  %v2439_v27 = vpop.f32.mrb[11].mxu0  ;;  %v3000_v39 = vpop.f32.mrb[19].mxu1  ;;  %v618_v49 = vld [vmem:[%s5236_s24 + $0x408] sm:$0xff] }
 0x12e   : > { %v3736_v28 = vld [vmem:[#allocation2 + $0x10] sm:$0xff]  ;;  %v4480_v60 = vcombine.low %v618_v49, %v620_v50  ;;  %v628_v39 = vld [vmem:[%s5236_s24 + $0x458] sm:$0xff] }
 0x12f   : > { %v3871_v30 = vadd.f32 %v5713_v54, %v3736_v28  ;;  %3607 = vst.msk [vmem:[#allocation2 + $0x20] sm:$0xff] %vm232_vm3, %v3478_v25  ;;  %v3479_v31 = vadd.f32 %v2983_v26, %v366_v19  ;;  %2649 = vmatmul.mubr.bf16.gmra.mrb[116].mxu0 %v4933_v20  ;;  %3210 = vmatmul.mubr.bf16.gmra.mrb[124].mxu1 %v4476_v33  ;;  %v4954_v25 = vld [vmem:[%s5236_s24 + $0x44c] ss:$16 sps:$4 sm:$0xff]  }
 0x130   : > { %v3737_v34 = vld [vmem:[#allocation2 + $0x18] sm:$0xff]  ;;  %2656 = vmatprep.mubr.bf16.mxu0 %v4936_v22  ;;  %4666 = vmatprep.mubr.msk.bf16.mxu1 %vm2184_vm0, %v4944_v36  ;;  %v4484_v22 = vcombine.low %v622_v12, %v624_v13 }
 0x131   : > { %v3999_v37 = vmax.f32 %v3871_v30, 0.0  ;;  %v3872_v38 = vadd.f32 %v5713_v54, %v3737_v34  ;;  %3608 = vst.msk [vmem:[#allocation2 + $0x28] sm:$0xff] %vm232_vm3, %v3479_v31  ;;  %v372_v34 = vld [vmem:[#allocation2 + $0x58] sm:$0xff] }
 0x132   : > { %v2442_v41 = vpop.f32.mrb[12].mxu0  ;;  %v3003_v56 = vpop.f32.mrb[20].mxu1 }
 0x133   : > { %4127 = vst.msk [vmem:[%s5726_s10 + $0x10] sm:$0xff] %vm232_vm3, %v3999_v37  ;;  %v4000_v42 = vmax.f32 %v3872_v38, 0.0  ;;  %v2988_v43 = vadd.f32 %v2987_v3, %v2442_v41  ;;  %v2444_v44 = vpop.f32.mrb[13].mxu0  ;;  %v3005_v59 = vpop.f32.mrb[21].mxu1  ;;  %v369_v3 = vld [vmem:[#allocation2 + $0x40] sm:$0xff]  ;;  %v626_v38 = vld [vmem:[%s5236_s24 + $0x448] sm:$0xff] }
 0x134   : > { %v2445_v47 = vpop.f32.mrb[14].mxu0  ;;  %v3006_v62 = vpop.f32.mrb[22].mxu1  ;;  %v4951_v37 = vld [vmem:[%s5236_s24 + $0x424] ss:$16 sps:$4 sm:$0xff]  }
 0x135   : > { %4128 = vst.msk [vmem:[%s5726_s10 + $0x18] sm:$0xff] %vm232_vm3, %v4000_v42  ;;  %v3480_v51 = vadd.f32 %v2988_v43, %v367_v40  ;;  %v2991_v52 = vadd.f32 %v2990_v9, %v2445_v47  ;;  %v2447_v53 = vpop.f32.mrb[15].mxu0  ;;  %v3008_v2 = vpop.f32.mrb[23].mxu1  ;;  %v4943_v9 = vld [vmem:[%s5236_s24 + $0x3e0] ss:$16 sps:$4 sm:$0xff]  }
 0x136   : > { %v3738_v55 = vld [vmem:[#allocation2 + $0x20] sm:$0xff]  ;;  %v632_v2 = vld [vmem:[%s5236_s24 + $0x478] sm:$0xff] }
 0x137   : > { %v3873_v57 = vadd.f32 %v5713_v54, %v3738_v55  ;;  %3609 = vst.msk [vmem:[#allocation2 + $0x30] sm:$0xff] %vm232_vm3, %v3480_v51  ;;  %v3481_v58 = vadd.f32 %v2991_v52, %v368_v45  ;;  %2657 = vmatmul.mubr.bf16.gmra.mrb[120].mxu0 %v4938_v46  ;;  %3218 = vmatmul.mubr.bf16.gmra.mrb[128].mxu1 %v4480_v60  ;;  %v4959_v51 = vld [vmem:[%s5236_s24 + $0x46c] ss:$16 sps:$4 sm:$0xff]  }
 0x138   : > { %v3739_v61 = vld [vmem:[#allocation2 + $0x28] sm:$0xff]  ;;  %2664 = vmatprep.mubr.bf16.mxu0 %v4941_v48  ;;  %4667 = vmatprep.mubr.msk.bf16.mxu1 %vm2184_vm0, %v4949_v63  ;;  %v4488_v48 = vcombine.low %v626_v38, %v628_v39 }
 0x139   : > { %v4001_v0 = vmax.f32 %v3873_v57, 0.0  ;;  %v3874_v1 = vadd.f32 %v5713_v54, %v3739_v61  ;;  %3610 = vst.msk [vmem:[#allocation2 + $0x38] sm:$0xff] %vm232_vm3, %v3481_v58  ;;  %v374_v61 = vld [vmem:[#allocation2 + $0x68] sm:$0xff] }
 0x13a   : > { %v2450_v4 = vpop.f32.mrb[16].mxu0  ;;  %v3011_v18 = vpop.f32.mrb[24].mxu1 }
 0x13b   : > { %4129 = vst.msk [vmem:[%s5726_s10 + $0x20] sm:$0xff] %vm232_vm3, %v4001_v0  ;;  %v4002_v5 = vmax.f32 %v3874_v1, 0.0  ;;  %v2996_v6 = vadd.f32 %v2995_v29, %v2450_v4  ;;  %v2452_v7 = vpop.f32.mrb[17].mxu0  ;;  %v3013_v21 = vpop.f32.mrb[25].mxu1  ;;  %v371_v29 = vld [vmem:[#allocation2 + $0x50] sm:$0xff]  ;;  %v630_v1 = vld [vmem:[%s5236_s24 + $0x468] sm:$0xff] }
 0x13c   : > { %v2453_v10 = vpop.f32.mrb[18].mxu0  ;;  %v3014_v24 = vpop.f32.mrb[26].mxu1  ;;  %v4956_v0 = vld [vmem:[%s5236_s24 + $0x444] ss:$16 sps:$4 sm:$0xff]  }
 0x13d   : > { %4130 = vst.msk [vmem:[%s5726_s10 + $0x28] sm:$0xff] %vm232_vm3, %v4002_v5  ;;  %v3482_v14 = vadd.f32 %v2996_v6, %v369_v3  ;;  %v2999_v15 = vadd.f32 %v2998_v35, %v2453_v10  ;;  %v2455_v16 = vpop.f32.mrb[19].mxu0  ;;  %v3016_v28 = vpop.f32.mrb[27].mxu1  ;;  %v4948_v35 = vld [vmem:[%s5236_s24 + $0x400] ss:$16 sps:$4 sm:$0xff]  }
 0x13e   : > { %v3740_v17 = vld [vmem:[#allocation2 + $0x30] sm:$0xff]  ;;  %v636_v28 = vld [vmem:[%s5236_s24 + $0x498] sm:$0xff] }
 0x13f   : > { %v3875_v19 = vadd.f32 %v5713_v54, %v3740_v17  ;;  %3611 = vst.msk [vmem:[#allocation2 + $0x40] sm:$0xff] %vm232_vm3, %v3482_v14  ;;  %v3483_v20 = vadd.f32 %v2999_v15, %v370_v8  ;;  %2665 = vmatmul.mubr.bf16.gmra.mrb[124].mxu0 %v4943_v9  ;;  %3226 = vmatmul.mubr.bf16.gmra.mrb[132].mxu1 %v4484_v22  ;;  %v4964_v14 = vld [vmem:[%s5236_s24 + $0x48c] ss:$16 sps:$4 sm:$0xff]  }
 0x140   : > { %v3741_v23 = vld [vmem:[#allocation2 + $0x38] sm:$0xff]  ;;  %2672 = vmatprep.mubr.bf16.mxu0 %v4946_v11  ;;  %4668 = vmatprep.mubr.msk.bf16.mxu1 %vm2184_vm0, %v4954_v25  ;;  %v4492_v11 = vcombine.low %v630_v1, %v632_v2 }
 0x141   : > { %v4003_v26 = vmax.f32 %v3875_v19, 0.0  ;;  %v3876_v27 = vadd.f32 %v5713_v54, %v3741_v23  ;;  %3612 = vst.msk [vmem:[#allocation2 + $0x48] sm:$0xff] %vm232_vm3, %v3483_v20  ;;  %v376_v23 = vld [vmem:[#allocation2 + $0x78] sm:$0xff] }
 0x142   : > { %v2458_v30 = vpop.f32.mrb[20].mxu0  ;;  %v3019_v44 = vpop.f32.mrb[28].mxu1 }
 0x143   : > { %4131 = vst.msk [vmem:[%s5726_s10 + $0x30] sm:$0xff] %vm232_vm3, %v4003_v26  ;;  %v4004_v31 = vmax.f32 %v3876_v27, 0.0  ;;  %v3004_v32 = vadd.f32 %v3003_v56, %v2458_v30  ;;  %v2460_v33 = vpop.f32.mrb[21].mxu0  ;;  %v3021_v47 = vpop.f32.mrb[29].mxu1  ;;  %v373_v56 = vld [vmem:[#allocation2 + $0x60] sm:$0xff]  ;;  %v634_v27 = vld [vmem:[%s5236_s24 + $0x488] sm:$0xff] }
 0x144   : > { %v2461_v36 = vpop.f32.mrb[22].mxu0  ;;  %v3022_v50 = vpop.f32.mrb[30].mxu1  ;;  %v4961_v26 = vld [vmem:[%s5236_s24 + $0x464] ss:$16 sps:$4 sm:$0xff]  }
 0x145   : > { %4132 = vst.msk [vmem:[%s5726_s10 + $0x38] sm:$0xff] %vm232_vm3, %v4004_v31  ;;  %v3484_v40 = vadd.f32 %v3004_v32, %v371_v29  ;;  %v3007_v41 = vadd.f32 %v3006_v62, %v2461_v36  ;;  %v2463_v42 = vpop.f32.mrb[23].mxu0  ;;  %v3024_v55 = vpop.f32.mrb[31].mxu1  ;;  %v4953_v62 = vld [vmem:[%s5236_s24 + $0x420] ss:$16 sps:$4 sm:$0xff]  }
 0x146   : > { %v3742_v43 = vld [vmem:[#allocation2 + $0x40] sm:$0xff]  ;;  %v640_v55 = vld [vmem:[%s5236_s24 + $0x4b8] sm:$0xff] }
 0x147   : > { %v3877_v45 = vadd.f32 %v5713_v54, %v3742_v43  ;;  %3613 = vst.msk [vmem:[#allocation2 + $0x50] sm:$0xff] %vm232_vm3, %v3484_v40  ;;  %v3485_v46 = vadd.f32 %v3007_v41, %v372_v34  ;;  %2673 = vmatmul.mubr.bf16.gmra.mrb[128].mxu0 %v4948_v35  ;;  %3234 = vmatmul.mubr.bf16.gmra.mrb[136].mxu1 %v4488_v48  ;;  %v4969_v40 = vld [vmem:[%s5236_s24 + $0x4ac] ss:$16 sps:$4 sm:$0xff]  }
 0x148   : > { %v3743_v49 = vld [vmem:[#allocation2 + $0x48] sm:$0xff]  ;;  %2680 = vmatprep.mubr.bf16.mxu0 %v4951_v37  ;;  %4669 = vmatprep.mubr.msk.bf16.mxu1 %vm2184_vm0, %v4959_v51  ;;  %v4496_v37 = vcombine.low %v634_v27, %v636_v28 }
 0x149   : > { %v4005_v52 = vmax.f32 %v3877_v45, 0.0  ;;  %v3878_v53 = vadd.f32 %v5713_v54, %v3743_v49  ;;  %3614 = vst.msk [vmem:[#allocation2 + $0x58] sm:$0xff] %vm232_vm3, %v3485_v46  ;;  %v378_v49 = vld [vmem:[#allocation2 + $0x88] sm:$0xff] }
 0x14a   : > { %v2466_v57 = vpop.f32.mrb[24].mxu0  ;;  %v3027_v7 = vpop.f32.mrb[32].mxu1 }
 0x14b   : > { %4133 = vst.msk [vmem:[%s5726_s10 + $0x40] sm:$0xff] %vm232_vm3, %v4005_v52  ;;  %v4006_v58 = vmax.f32 %v3878_v53, 0.0  ;;  %v3012_v59 = vadd.f32 %v3011_v18, %v2466_v57  ;;  %v2468_v60 = vpop.f32.mrb[25].mxu0  ;;  %v3029_v10 = vpop.f32.mrb[33].mxu1  ;;  %v375_v18 = vld [vmem:[#allocation2 + $0x70] sm:$0xff]  ;;  %v638_v53 = vld [vmem:[%s5236_s24 + $0x4a8] sm:$0xff] }
 0x14c   : > { %v2469_v63 = vpop.f32.mrb[26].mxu0  ;;  %v3030_v13 = vpop.f32.mrb[34].mxu1  ;;  %v4966_v52 = vld [vmem:[%s5236_s24 + $0x484] ss:$16 sps:$4 sm:$0xff]  }
 0x14d   : > { %4134 = vst.msk [vmem:[%s5726_s10 + $0x48] sm:$0xff] %vm232_vm3, %v4006_v58  ;;  %v3486_v3 = vadd.f32 %v3012_v59, %v373_v56  ;;  %v3015_v4 = vadd.f32 %v3014_v24, %v2469_v63  ;;  %v2471_v5 = vpop.f32.mrb[27].mxu0  ;;  %v3032_v17 = vpop.f32.mrb[35].mxu1  ;;  %v4958_v24 = vld [vmem:[%s5236_s24 + $0x440] ss:$16 sps:$4 sm:$0xff]  }
 0x14e   : > { %v3744_v6 = vld [vmem:[#allocation2 + $0x50] sm:$0xff]  ;;  %v644_v17 = vld [vmem:[%s5236_s24 + $0x4d8] sm:$0xff] }
 0x14f   : > { %v3879_v8 = vadd.f32 %v5713_v54, %v3744_v6  ;;  %3615 = vst.msk [vmem:[#allocation2 + $0x60] sm:$0xff] %vm232_vm3, %v3486_v3  ;;  %v3487_v9 = vadd.f32 %v3015_v4, %v374_v61  ;;  %2681 = vmatmul.mubr.bf16.gmra.mrb[132].mxu0 %v4953_v62  ;;  %3242 = vmatmul.mubr.bf16.gmra.mrb[140].mxu1 %v4492_v11  ;;  %v4974_v3 = vld [vmem:[%s5236_s24 + $0x4cc] ss:$16 sps:$4 sm:$0xff]  }
 0x150   : > { %v3745_v12 = vld [vmem:[#allocation2 + $0x58] sm:$0xff]  ;;  %2688 = vmatprep.mubr.bf16.mxu0 %v4956_v0  ;;  %4670 = vmatprep.mubr.msk.bf16.mxu1 %vm2184_vm0, %v4964_v14  ;;  %v4500_v0 = vcombine.low %v638_v53, %v640_v55 }
 0x151   : > { %v4007_v15 = vmax.f32 %v3879_v8, 0.0  ;;  %v3880_v16 = vadd.f32 %v5713_v54, %v3745_v12  ;;  %3616 = vst.msk [vmem:[#allocation2 + $0x68] sm:$0xff] %vm232_vm3, %v3487_v9  ;;  %v380_v12 = vld [vmem:[#allocation2 + $0x98] sm:$0xff] }
 0x152   : > { %v2474_v19 = vpop.f32.mrb[28].mxu0  ;;  %v3035_v33 = vpop.f32.mrb[36].mxu1 }
 0x153   : > { %4135 = vst.msk [vmem:[%s5726_s10 + $0x50] sm:$0xff] %vm232_vm3, %v4007_v15  ;;  %v4008_v20 = vmax.f32 %v3880_v16, 0.0  ;;  %v3020_v21 = vadd.f32 %v3019_v44, %v2474_v19  ;;  %v2476_v22 = vpop.f32.mrb[29].mxu0  ;;  %v3037_v36 = vpop.f32.mrb[37].mxu1  ;;  %v377_v44 = vld [vmem:[#allocation2 + $0x80] sm:$0xff]  ;;  %v642_v16 = vld [vmem:[%s5236_s24 + $0x4c8] sm:$0xff] }
 0x154   : > { %v2477_v25 = vpop.f32.mrb[30].mxu0  ;;  %v3038_v39 = vpop.f32.mrb[38].mxu1  ;;  %v4971_v15 = vld [vmem:[%s5236_s24 + $0x4a4] ss:$16 sps:$4 sm:$0xff]  }
 0x155   : > { %4136 = vst.msk [vmem:[%s5726_s10 + $0x58] sm:$0xff] %vm232_vm3, %v4008_v20  ;;  %v3488_v29 = vadd.f32 %v3020_v21, %v375_v18  ;;  %v3023_v30 = vadd.f32 %v3022_v50, %v2477_v25  ;;  %v2479_v31 = vpop.f32.mrb[31].mxu0  ;;  %v3040_v43 = vpop.f32.mrb[39].mxu1  ;;  %v4963_v50 = vld [vmem:[%s5236_s24 + $0x460] ss:$16 sps:$4 sm:$0xff]  }
 0x156   : > { %v3746_v32 = vld [vmem:[#allocation2 + $0x60] sm:$0xff]  ;;  %v648_v43 = vld [vmem:[%s5236_s24 + $0x4f8] sm:$0xff] }
 0x157   : > { %v3881_v34 = vadd.f32 %v5713_v54, %v3746_v32  ;;  %3617 = vst.msk [vmem:[#allocation2 + $0x70] sm:$0xff] %vm232_vm3, %v3488_v29  ;;  %v3489_v35 = vadd.f32 %v3023_v30, %v376_v23  ;;  %2689 = vmatmul.mubr.bf16.gmra.mrb[136].mxu0 %v4958_v24  ;;  %3250 = vmatmul.mubr.bf16.gmra.mrb[144].mxu1 %v4496_v37  ;;  %v4979_v29 = vld [vmem:[%s5236_s24 + $0x4ec] ss:$16 sps:$4 sm:$0xff]  }
 0x158   : > { %v3747_v38 = vld [vmem:[#allocation2 + $0x68] sm:$0xff]  ;;  %2696 = vmatprep.mubr.bf16.mxu0 %v4961_v26  ;;  %4671 = vmatprep.mubr.msk.bf16.mxu1 %vm2184_vm0, %v4969_v40  ;;  %v4504_v26 = vcombine.low %v642_v16, %v644_v17 }
 0x159   : > { %v4009_v41 = vmax.f32 %v3881_v34, 0.0  ;;  %v3882_v42 = vadd.f32 %v5713_v54, %v3747_v38  ;;  %3618 = vst.msk [vmem:[#allocation2 + $0x78] sm:$0xff] %vm232_vm3, %v3489_v35  ;;  %v382_v38 = vld [vmem:[#allocation2 + $0xa8] sm:$0xff] }
 0x15a   : > { %v2482_v45 = vpop.f32.mrb[32].mxu0  ;;  %v3043_v60 = vpop.f32.mrb[40].mxu1 }
 0x15b   : > { %4137 = vst.msk [vmem:[%s5726_s10 + $0x60] sm:$0xff] %vm232_vm3, %v4009_v41  ;;  %v4010_v46 = vmax.f32 %v3882_v42, 0.0  ;;  %v3028_v47 = vadd.f32 %v3027_v7, %v2482_v45  ;;  %v2484_v48 = vpop.f32.mrb[33].mxu0  ;;  %v3045_v63 = vpop.f32.mrb[41].mxu1  ;;  %v379_v7 = vld [vmem:[#allocation2 + $0x90] sm:$0xff]  ;;  %v646_v42 = vld [vmem:[%s5236_s24 + $0x4e8] sm:$0xff] }
 0x15c   : > { %v2485_v51 = vpop.f32.mrb[34].mxu0  ;;  %v3046_v2 = vpop.f32.mrb[42].mxu1  ;;  %v4976_v41 = vld [vmem:[%s5236_s24 + $0x4c4] ss:$16 sps:$4 sm:$0xff]  }
 0x15d   : > { %4138 = vst.msk [vmem:[%s5726_s10 + $0x68] sm:$0xff] %vm232_vm3, %v4010_v46  ;;  %v3490_v56 = vadd.f32 %v3028_v47, %v377_v44  ;;  %v3031_v57 = vadd.f32 %v3030_v13, %v2485_v51  ;;  %v2487_v58 = vpop.f32.mrb[35].mxu0  ;;  %v3048_v6 = vpop.f32.mrb[43].mxu1  ;;  %v4968_v13 = vld [vmem:[%s5236_s24 + $0x480] ss:$16 sps:$4 sm:$0xff]  }
 0x15e   : > { %v3748_v59 = vld [vmem:[#allocation2 + $0x70] sm:$0xff]  ;;  %v652_v6 = vld [vmem:[%s5236_s24 + $0x518] sm:$0xff] }
 0x15f   : > { %v3883_v61 = vadd.f32 %v5713_v54, %v3748_v59  ;;  %3619 = vst.msk [vmem:[#allocation2 + $0x80] sm:$0xff] %vm232_vm3, %v3490_v56  ;;  %v3491_v62 = vadd.f32 %v3031_v57, %v378_v49  ;;  %2697 = vmatmul.mubr.bf16.gmra.mrb[140].mxu0 %v4963_v50  ;;  %3258 = vmatmul.mubr.bf16.gmra.mrb[148].mxu1 %v4500_v0  ;;  %v4984_v56 = vld [vmem:[%s5236_s24 + $0x50c] ss:$16 sps:$4 sm:$0xff]  }
 0x160   : > { %v3749_v1 = vld [vmem:[#allocation2 + $0x78] sm:$0xff]  ;;  %2704 = vmatprep.mubr.bf16.mxu0 %v4966_v52  ;;  %4672 = vmatprep.mubr.msk.bf16.mxu1 %vm2184_vm0, %v4974_v3  ;;  %v4508_v52 = vcombine.low %v646_v42, %v648_v43 }
 0x161   : > { %v4011_v4 = vmax.f32 %v3883_v61, 0.0  ;;  %v3884_v5 = vadd.f32 %v5713_v54, %v3749_v1  ;;  %3620 = vst.msk [vmem:[#allocation2 + $0x88] sm:$0xff] %vm232_vm3, %v3491_v62  ;;  %v384_v1 = vld [vmem:[#allocation2 + $0xb8] sm:$0xff] }
 0x162   : > { %v2490_v8 = vpop.f32.mrb[36].mxu0  ;;  %v3051_v22 = vpop.f32.mrb[44].mxu1 }
 0x163   : > { %4139 = vst.msk [vmem:[%s5726_s10 + $0x70] sm:$0xff] %vm232_vm3, %v4011_v4  ;;  %v4012_v9 = vmax.f32 %v3884_v5, 0.0  ;;  %v3036_v10 = vadd.f32 %v3035_v33, %v2490_v8  ;;  %v2492_v11 = vpop.f32.mrb[37].mxu0  ;;  %v3053_v25 = vpop.f32.mrb[45].mxu1  ;;  %v381_v33 = vld [vmem:[#allocation2 + $0xa0] sm:$0xff]  ;;  %v650_v5 = vld [vmem:[%s5236_s24 + $0x508] sm:$0xff] }
 0x164   : > { %v2493_v14 = vpop.f32.mrb[38].mxu0  ;;  %v3054_v28 = vpop.f32.mrb[46].mxu1  ;;  %v4981_v4 = vld [vmem:[%s5236_s24 + $0x4e4] ss:$16 sps:$4 sm:$0xff]  }
 0x165   : > { %4140 = vst.msk [vmem:[%s5726_s10 + $0x78] sm:$0xff] %vm232_vm3, %v4012_v9  ;;  %v3492_v18 = vadd.f32 %v3036_v10, %v379_v7  ;;  %v3039_v19 = vadd.f32 %v3038_v39, %v2493_v14  ;;  %v2495_v20 = vpop.f32.mrb[39].mxu0  ;;  %v3056_v32 = vpop.f32.mrb[47].mxu1  ;;  %v4973_v39 = vld [vmem:[%s5236_s24 + $0x4a0] ss:$16 sps:$4 sm:$0xff]  }
 0x166   : > { %v3750_v21 = vld [vmem:[#allocation2 + $0x80] sm:$0xff]  ;;  %v656_v32 = vld [vmem:[%s5236_s24 + $0x538] sm:$0xff] }
 0x167   : > { %v3885_v23 = vadd.f32 %v5713_v54, %v3750_v21  ;;  %3621 = vst.msk [vmem:[#allocation2 + $0x90] sm:$0xff] %vm232_vm3, %v3492_v18  ;;  %v3493_v24 = vadd.f32 %v3039_v19, %v380_v12  ;;  %2705 = vmatmul.mubr.bf16.gmra.mrb[144].mxu0 %v4968_v13  ;;  %3266 = vmatmul.mubr.bf16.gmra.mrb[152].mxu1 %v4504_v26  ;;  %v4989_v18 = vld [vmem:[%s5236_s24 + $0x52c] ss:$16 sps:$4 sm:$0xff]  }
 0x168   : > { %v3751_v27 = vld [vmem:[#allocation2 + $0x88] sm:$0xff]  ;;  %2712 = vmatprep.mubr.bf16.mxu0 %v4971_v15  ;;  %4673 = vmatprep.mubr.msk.bf16.mxu1 %vm2184_vm0, %v4979_v29  ;;  %v4512_v15 = vcombine.low %v650_v5, %v652_v6 }
 0x169   : > { %v4013_v30 = vmax.f32 %v3885_v23, 0.0  ;;  %v3886_v31 = vadd.f32 %v5713_v54, %v3751_v27  ;;  %3622 = vst.msk [vmem:[#allocation2 + $0x98] sm:$0xff] %vm232_vm3, %v3493_v24  ;;  %v386_v27 = vld [vmem:[#allocation2 + $0xc8] sm:$0xff] }
 0x16a   : > { %v2498_v34 = vpop.f32.mrb[40].mxu0  ;;  %v3059_v48 = vpop.f32.mrb[48].mxu1 }
 0x16b   : > { %4141 = vst.msk [vmem:[%s5726_s10 + $0x80] sm:$0xff] %vm232_vm3, %v4013_v30  ;;  %v4014_v35 = vmax.f32 %v3886_v31, 0.0  ;;  %v3044_v36 = vadd.f32 %v3043_v60, %v2498_v34  ;;  %v2500_v37 = vpop.f32.mrb[41].mxu0  ;;  %v3061_v51 = vpop.f32.mrb[49].mxu1  ;;  %v383_v60 = vld [vmem:[#allocation2 + $0xb0] sm:$0xff]  ;;  %v654_v31 = vld [vmem:[%s5236_s24 + $0x528] sm:$0xff] }
 0x16c   : > { %v2501_v40 = vpop.f32.mrb[42].mxu0  ;;  %v3062_v55 = vpop.f32.mrb[50].mxu1  ;;  %v4986_v30 = vld [vmem:[%s5236_s24 + $0x504] ss:$16 sps:$4 sm:$0xff]  }
 0x16d   : > { %4142 = vst.msk [vmem:[%s5726_s10 + $0x88] sm:$0xff] %vm232_vm3, %v4014_v35  ;;  %v3494_v44 = vadd.f32 %v3044_v36, %v381_v33  ;;  %v3047_v45 = vadd.f32 %v3046_v2, %v2501_v40  ;;  %v2503_v46 = vpop.f32.mrb[43].mxu0  ;;  %v3064_v59 = vpop.f32.mrb[51].mxu1  ;;  %v4978_v2 = vld [vmem:[%s5236_s24 + $0x4c0] ss:$16 sps:$4 sm:$0xff]  }
 0x16e   : > { %v3752_v47 = vld [vmem:[#allocation2 + $0x90] sm:$0xff]  ;;  %v660_v59 = vld [vmem:[%s5236_s24 + $0x558] sm:$0xff] }
 0x16f   : > { %v3887_v49 = vadd.f32 %v5713_v54, %v3752_v47  ;;  %3623 = vst.msk [vmem:[#allocation2 + $0xa0] sm:$0xff] %vm232_vm3, %v3494_v44  ;;  %v3495_v50 = vadd.f32 %v3047_v45, %v382_v38  ;;  %2713 = vmatmul.mubr.bf16.gmra.mrb[148].mxu0 %v4973_v39  ;;  %3274 = vmatmul.mubr.bf16.gmra.mrb[156].mxu1 %v4508_v52  ;;  %v4994_v44 = vld [vmem:[%s5236_s24 + $0x54c] ss:$16 sps:$4 sm:$0xff]  }
 0x170   : > { %v3753_v53 = vld [vmem:[#allocation2 + $0x98] sm:$0xff]  ;;  %2720 = vmatprep.mubr.bf16.mxu0 %v4976_v41  ;;  %4674 = vmatprep.mubr.msk.bf16.mxu1 %vm2184_vm0, %v4984_v56  ;;  %v4516_v41 = vcombine.low %v654_v31, %v656_v32 }
 0x171   : > { %v4015_v57 = vmax.f32 %v3887_v49, 0.0  ;;  %v3888_v58 = vadd.f32 %v5713_v54, %v3753_v53  ;;  %3624 = vst.msk [vmem:[#allocation2 + $0xa8] sm:$0xff] %vm232_vm3, %v3495_v50  ;;  %v388_v53 = vld [vmem:[#allocation2 + $0xd8] sm:$0xff] }
 0x172   : > { %v2506_v61 = vpop.f32.mrb[44].mxu0  ;;  %v3067_v11 = vpop.f32.mrb[52].mxu1 }
 0x173   : > { %4143 = vst.msk [vmem:[%s5726_s10 + $0x90] sm:$0xff] %vm232_vm3, %v4015_v57  ;;  %v4016_v62 = vmax.f32 %v3888_v58, 0.0  ;;  %v3052_v63 = vadd.f32 %v3051_v22, %v2506_v61  ;;  %v2508_v0 = vpop.f32.mrb[45].mxu0  ;;  %v3069_v14 = vpop.f32.mrb[53].mxu1  ;;  %v385_v22 = vld [vmem:[#allocation2 + $0xc0] sm:$0xff]  ;;  %v658_v58 = vld [vmem:[%s5236_s24 + $0x548] sm:$0xff] }
 0x174   : > { %v2509_v3 = vpop.f32.mrb[46].mxu0  ;;  %v3070_v17 = vpop.f32.mrb[54].mxu1  ;;  %v4991_v57 = vld [vmem:[%s5236_s24 + $0x524] ss:$16 sps:$4 sm:$0xff]  }
 0x175   : > { %4144 = vst.msk [vmem:[%s5726_s10 + $0x98] sm:$0xff] %vm232_vm3, %v4016_v62  ;;  %v3496_v7 = vadd.f32 %v3052_v63, %v383_v60  ;;  %v3055_v8 = vadd.f32 %v3054_v28, %v2509_v3  ;;  %v2511_v9 = vpop.f32.mrb[47].mxu0  ;;  %v3072_v21 = vpop.f32.mrb[55].mxu1  ;;  %v4983_v28 = vld [vmem:[%s5236_s24 + $0x4e0] ss:$16 sps:$4 sm:$0xff]  }
 0x176   : > { %v3754_v10 = vld [vmem:[#allocation2 + $0xa0] sm:$0xff]  ;;  %v664_v21 = vld [vmem:[%s5236_s24 + $0x578] sm:$0xff] }
 0x177   : > { %v3889_v12 = vadd.f32 %v5713_v54, %v3754_v10  ;;  %3625 = vst.msk [vmem:[#allocation2 + $0xb0] sm:$0xff] %vm232_vm3, %v3496_v7  ;;  %v3497_v13 = vadd.f32 %v3055_v8, %v384_v1  ;;  %2721 = vmatmul.mubr.bf16.gmra.mrb[152].mxu0 %v4978_v2  ;;  %3282 = vmatmul.mubr.bf16.gmra.mrb[160].mxu1 %v4512_v15  ;;  %v4999_v7 = vld [vmem:[%s5236_s24 + $0x56c] ss:$16 sps:$4 sm:$0xff]  }
 0x178   : > { %v3755_v16 = vld [vmem:[#allocation2 + $0xa8] sm:$0xff]  ;;  %2728 = vmatprep.mubr.bf16.mxu0 %v4981_v4  ;;  %4675 = vmatprep.mubr.msk.bf16.mxu1 %vm2184_vm0, %v4989_v18  ;;  %v4520_v4 = vcombine.low %v658_v58, %v660_v59 }
 0x179   : > { %v4017_v19 = vmax.f32 %v3889_v12, 0.0  ;;  %v3890_v20 = vadd.f32 %v5713_v54, %v3755_v16  ;;  %3626 = vst.msk [vmem:[#allocation2 + $0xb8] sm:$0xff] %vm232_vm3, %v3497_v13  ;;  %v390_v16 = vld [vmem:[#allocation2 + $0xe8] sm:$0xff] }
 0x17a   : > { %v2514_v23 = vpop.f32.mrb[48].mxu0  ;;  %v3075_v37 = vpop.f32.mrb[56].mxu1 }
 0x17b   : > { %4145 = vst.msk [vmem:[%s5726_s10 + $0xa0] sm:$0xff] %vm232_vm3, %v4017_v19  ;;  %v4018_v24 = vmax.f32 %v3890_v20, 0.0  ;;  %v3060_v25 = vadd.f32 %v3059_v48, %v2514_v23  ;;  %v2516_v26 = vpop.f32.mrb[49].mxu0  ;;  %v3077_v40 = vpop.f32.mrb[57].mxu1  ;;  %v387_v48 = vld [vmem:[#allocation2 + $0xd0] sm:$0xff]  ;;  %v662_v20 = vld [vmem:[%s5236_s24 + $0x568] sm:$0xff] }
 0x17c   : > { %v2517_v29 = vpop.f32.mrb[50].mxu0  ;;  %v3078_v43 = vpop.f32.mrb[58].mxu1  ;;  %v4996_v19 = vld [vmem:[%s5236_s24 + $0x544] ss:$16 sps:$4 sm:$0xff]  }
 0x17d   : > { %4146 = vst.msk [vmem:[%s5726_s10 + $0xa8] sm:$0xff] %vm232_vm3, %v4018_v24  ;;  %v3498_v33 = vadd.f32 %v3060_v25, %v385_v22  ;;  %v3063_v34 = vadd.f32 %v3062_v55, %v2517_v29  ;;  %v2519_v35 = vpop.f32.mrb[51].mxu0  ;;  %v3080_v47 = vpop.f32.mrb[59].mxu1  ;;  %v4988_v55 = vld [vmem:[%s5236_s24 + $0x500] ss:$16 sps:$4 sm:$0xff]  }
 0x17e   : > { %v3756_v36 = vld [vmem:[#allocation2 + $0xb0] sm:$0xff]  ;;  %v668_v47 = vld [vmem:[%s5236_s24 + $0x598] sm:$0xff] }
 0x17f   : > { %v3891_v38 = vadd.f32 %v5713_v54, %v3756_v36  ;;  %3627 = vst.msk [vmem:[#allocation2 + $0xc0] sm:$0xff] %vm232_vm3, %v3498_v33  ;;  %v3499_v39 = vadd.f32 %v3063_v34, %v386_v27  ;;  %2729 = vmatmul.mubr.bf16.gmra.mrb[156].mxu0 %v4983_v28  ;;  %3290 = vmatmul.mubr.bf16.gmra.mrb[164].mxu1 %v4516_v41  ;;  %v5004_v33 = vld [vmem:[%s5236_s24 + $0x58c] ss:$16 sps:$4 sm:$0xff]  }
 0x180   : > { %v3757_v42 = vld [vmem:[#allocation2 + $0xb8] sm:$0xff]  ;;  %2736 = vmatprep.mubr.bf16.mxu0 %v4986_v30  ;;  %4676 = vmatprep.mubr.msk.bf16.mxu1 %vm2184_vm0, %v4994_v44  ;;  %v4524_v30 = vcombine.low %v662_v20, %v664_v21 }
 0x181   : > { %v4019_v45 = vmax.f32 %v3891_v38, 0.0  ;;  %v3892_v46 = vadd.f32 %v5713_v54, %v3757_v42  ;;  %3628 = vst.msk [vmem:[#allocation2 + $0xc8] sm:$0xff] %vm232_vm3, %v3499_v39  ;;  %v392_v42 = vld [vmem:[#allocation2 + $0xf8] sm:$0xff] }
 0x182   : > { %v2522_v49 = vpop.f32.mrb[52].mxu0  ;;  %v3083_v0 = vpop.f32.mrb[60].mxu1 }
 0x183   : > { %4147 = vst.msk [vmem:[%s5726_s10 + $0xb0] sm:$0xff] %vm232_vm3, %v4019_v45  ;;  %v4020_v50 = vmax.f32 %v3892_v46, 0.0  ;;  %v3068_v51 = vadd.f32 %v3067_v11, %v2522_v49  ;;  %v2524_v52 = vpop.f32.mrb[53].mxu0  ;;  %v3085_v3 = vpop.f32.mrb[61].mxu1  ;;  %v389_v11 = vld [vmem:[#allocation2 + $0xe0] sm:$0xff]  ;;  %v666_v46 = vld [vmem:[%s5236_s24 + $0x588] sm:$0xff] }
 0x184   : > { %v2525_v56 = vpop.f32.mrb[54].mxu0  ;;  %v3086_v6 = vpop.f32.mrb[62].mxu1  ;;  %v5001_v45 = vld [vmem:[%s5236_s24 + $0x564] ss:$16 sps:$4 sm:$0xff]  }
 0x185   : > { %4148 = vst.msk [vmem:[%s5726_s10 + $0xb8] sm:$0xff] %vm232_vm3, %v4020_v50  ;;  %v3500_v60 = vadd.f32 %v3068_v51, %v387_v48  ;;  %v3071_v61 = vadd.f32 %v3070_v17, %v2525_v56  ;;  %v2527_v62 = vpop.f32.mrb[55].mxu0  ;;  %v3088_v10 = vpop.f32.mrb[63].mxu1  ;;  %v4993_v17 = vld [vmem:[%s5236_s24 + $0x520] ss:$16 sps:$4 sm:$0xff]  }
 0x186   : > { %v3758_v63 = vld [vmem:[#allocation2 + $0xc0] sm:$0xff]  ;;  %v672_v10 = vld [vmem:[%s5236_s24 + $0x5b8] sm:$0xff] }
 0x187   : > { %v3893_v1 = vadd.f32 %v5713_v54, %v3758_v63  ;;  %3629 = vst.msk [vmem:[#allocation2 + $0xd0] sm:$0xff] %vm232_vm3, %v3500_v60  ;;  %v3501_v2 = vadd.f32 %v3071_v61, %v388_v53  ;;  %2737 = vmatmul.mubr.bf16.gmra.mrb[160].mxu0 %v4988_v55  ;;  %3298 = vmatmul.mubr.bf16.gmra.mrb[168].mxu1 %v4520_v4  ;;  %v5009_v60 = vld [vmem:[%s5236_s24 + $0x5ac] ss:$16 sps:$4 sm:$0xff]  }
 0x188   : > { %v3759_v5 = vld [vmem:[#allocation2 + $0xc8] sm:$0xff]  ;;  %2744 = vmatprep.mubr.bf16.mxu0 %v4991_v57  ;;  %4677 = vmatprep.mubr.msk.bf16.mxu1 %vm2184_vm0, %v4999_v7  ;;  %v4528_v57 = vcombine.low %v666_v46, %v668_v47 }
 0x189   : > { %v4021_v8 = vmax.f32 %v3893_v1, 0.0  ;;  %v3894_v9 = vadd.f32 %v5713_v54, %v3759_v5  ;;  %3630 = vst.msk [vmem:[#allocation2 + $0xd8] sm:$0xff] %vm232_vm3, %v3501_v2  ;;  %v394_v5 = vld [vmem:[#allocation2 + $0x108] sm:$0xff] }
 0x18a   : > { %v2530_v12 = vpop.f32.mrb[56].mxu0  ;;  %v3091_v26 = vpop.f32.mrb[64].mxu1 }
 0x18b   : > { %4149 = vst.msk [vmem:[%s5726_s10 + $0xc0] sm:$0xff] %vm232_vm3, %v4021_v8  ;;  %v4022_v13 = vmax.f32 %v3894_v9, 0.0  ;;  %v3076_v14 = vadd.f32 %v3075_v37, %v2530_v12  ;;  %v2532_v15 = vpop.f32.mrb[57].mxu0  ;;  %v3093_v29 = vpop.f32.mrb[65].mxu1  ;;  %v391_v37 = vld [vmem:[#allocation2 + $0xf0] sm:$0xff]  ;;  %v670_v9 = vld [vmem:[%s5236_s24 + $0x5a8] sm:$0xff] }
 0x18c   : > { %v2533_v18 = vpop.f32.mrb[58].mxu0  ;;  %v3094_v32 = vpop.f32.mrb[66].mxu1  ;;  %v5006_v8 = vld [vmem:[%s5236_s24 + $0x584] ss:$16 sps:$4 sm:$0xff]   ;;  %v5939_v15 = vld [vmem:[%s6463_s2] ss:$0 sm:$0xff] }
 0x18d   : > { %4150 = vst.msk [vmem:[%s5726_s10 + $0xc8] sm:$0xff] %vm232_vm3, %v4022_v13  ;;  %v3502_v22 = vadd.f32 %v3076_v14, %v389_v11  ;;  %v3079_v23 = vadd.f32 %v3078_v43, %v2533_v18  ;;  %v2535_v24 = vpop.f32.mrb[59].mxu0  ;;  %v3096_v36 = vpop.f32.mrb[67].mxu1  ;;  %v4998_v43 = vld [vmem:[%s5236_s24 + $0x540] ss:$16 sps:$4 sm:$0xff]  }
 0x18e   : > { %v3760_v25 = vld [vmem:[#allocation2 + $0xd0] sm:$0xff]  ;;  %v676_v36 = vld [vmem:[%s5236_s24 + $0x5d8] sm:$0xff] }
 0x18f   : > { %v3895_v27 = vadd.f32 %v5713_v54, %v3760_v25  ;;  %3631 = vst.msk [vmem:[#allocation2 + $0xe0] sm:$0xff] %vm232_vm3, %v3502_v22  ;;  %v3503_v28 = vadd.f32 %v3079_v23, %v390_v16  ;;  %2745 = vmatmul.mubr.bf16.gmra.mrb[164].mxu0 %v4993_v17  ;;  %3306 = vmatmul.mubr.bf16.gmra.mrb[172].mxu1 %v4524_v30  ;;  %v5014_v22 = vld [vmem:[%s5236_s24 + $0x5cc] ss:$16 sps:$4 sm:$0xff]  }
 0x190   : > { %v3761_v31 = vld [vmem:[#allocation2 + $0xd8] sm:$0xff]  ;;  %2752 = vmatprep.mubr.bf16.mxu0 %v4996_v19  ;;  %4678 = vmatprep.mubr.msk.bf16.mxu1 %vm2184_vm0, %v5004_v33  ;;  %v4532_v19 = vcombine.low %v670_v9, %v672_v10 }
 0x191   : > { %v4023_v34 = vmax.f32 %v3895_v27, 0.0  ;;  %v3896_v35 = vadd.f32 %v5713_v54, %v3761_v31  ;;  %3632 = vst.msk [vmem:[#allocation2 + $0xe8] sm:$0xff] %vm232_vm3, %v3503_v28  ;;  %v396_v31 = vld [vmem:[#allocation2 + $0x118] sm:$0xff] }
 0x192   : > { %v2538_v38 = vpop.f32.mrb[60].mxu0  ;;  %v3099_v52 = vpop.f32.mrb[68].mxu1 }
 0x193   : > { %4151 = vst.msk [vmem:[%s5726_s10 + $0xd0] sm:$0xff] %vm232_vm3, %v4023_v34  ;;  %v4024_v39 = vmax.f32 %v3896_v35, 0.0  ;;  %v3084_v40 = vadd.f32 %v3083_v0, %v2538_v38  ;;  %v2540_v41 = vpop.f32.mrb[61].mxu0  ;;  %v3101_v56 = vpop.f32.mrb[69].mxu1  ;;  %v393_v0 = vld [vmem:[#allocation2 + $0x100] sm:$0xff]  ;;  %v674_v35 = vld [vmem:[%s5236_s24 + $0x5c8] sm:$0xff] }
 0x194   : > { %v2541_v44 = vpop.f32.mrb[62].mxu0  ;;  %v3102_v59 = vpop.f32.mrb[70].mxu1  ;;  %v5011_v34 = vld [vmem:[%s5236_s24 + $0x5a4] ss:$16 sps:$4 sm:$0xff]  }
 0x195   : > { %4152 = vst.msk [vmem:[%s5726_s10 + $0xd8] sm:$0xff] %vm232_vm3, %v4024_v39  ;;  %v3504_v48 = vadd.f32 %v3084_v40, %v391_v37  ;;  %v3087_v49 = vadd.f32 %v3086_v6, %v2541_v44  ;;  %v2543_v50 = vpop.f32.mrb[63].mxu0  ;;  %v3104_v63 = vpop.f32.mrb[71].mxu1  ;;  %v5003_v6 = vld [vmem:[%s5236_s24 + $0x560] ss:$16 sps:$4 sm:$0xff]  }
 0x196   : > { %v3762_v51 = vld [vmem:[#allocation2 + $0xe0] sm:$0xff]  ;;  %v680_v63 = vld [vmem:[%s5236_s24 + $0x5f8] sm:$0xff] }
 0x197   : > { %v3897_v53 = vadd.f32 %v5713_v54, %v3762_v51  ;;  %3633 = vst.msk [vmem:[#allocation2 + $0xf0] sm:$0xff] %vm232_vm3, %v3504_v48  ;;  %v3505_v55 = vadd.f32 %v3087_v49, %v392_v42  ;;  %2753 = vmatmul.mubr.bf16.gmra.mrb[168].mxu0 %v4998_v43  ;;  %3314 = vmatmul.mubr.bf16.gmra.mrb[176].mxu1 %v4528_v57  ;;  %v5019_v48 = vld [vmem:[%s5236_s24 + $0x5ec] ss:$16 sps:$4 sm:$0xff]  }
 0x198   : > { %v3763_v58 = vld [vmem:[#allocation2 + $0xe8] sm:$0xff]  ;;  %2760 = vmatprep.mubr.bf16.mxu0 %v5001_v45  ;;  %4679 = vmatprep.mubr.msk.bf16.mxu1 %vm2184_vm0, %v5009_v60  ;;  %v4536_v45 = vcombine.low %v674_v35, %v676_v36 }
 0x199   : > { %v4025_v61 = vmax.f32 %v3897_v53, 0.0  ;;  %v3898_v62 = vadd.f32 %v5713_v54, %v3763_v58  ;;  %3634 = vst.msk [vmem:[#allocation2 + $0xf8] sm:$0xff] %vm232_vm3, %v3505_v55  ;;  %v398_v58 = vld [vmem:[#allocation2 + $0x128] sm:$0xff] }
 0x19a   : > { %v2546_v1 = vpop.f32.mrb[64].mxu0  ;;  %v3107_v14 = vpop.f32.mrb[72].mxu1 }
 0x19b   : > { %4153 = vst.msk [vmem:[%s5726_s10 + $0xe0] sm:$0xff] %vm232_vm3, %v4025_v61  ;;  %v4026_v2 = vmax.f32 %v3898_v62, 0.0  ;;  %v3092_v3 = vadd.f32 %v3091_v26, %v2546_v1  ;;  %v2548_v4 = vpop.f32.mrb[65].mxu0  ;;  %v3109_v18 = vpop.f32.mrb[73].mxu1  ;;  %v395_v26 = vld [vmem:[#allocation2 + $0x110] sm:$0xff]  ;;  %v678_v62 = vld [vmem:[%s5236_s24 + $0x5e8] sm:$0xff] }
 0x19c   : > { %v2549_v7 = vpop.f32.mrb[66].mxu0  ;;  %v3110_v21 = vpop.f32.mrb[74].mxu1  ;;  %v5016_v61 = vld [vmem:[%s5236_s24 + $0x5c4] ss:$16 sps:$4 sm:$0xff]  }
 0x19d   : > { %4154 = vst.msk [vmem:[%s5726_s10 + $0xe8] sm:$0xff] %vm232_vm3, %v4026_v2  ;;  %v3506_v54 = vadd.f32 %v3092_v3, %v393_v0  ;;  %v3095_v11 = vadd.f32 %v3094_v32, %v2549_v7  ;;  %v2551_v12 = vpop.f32.mrb[67].mxu0  ;;  %v3112_v25 = vpop.f32.mrb[75].mxu1  ;;  %v5008_v32 = vld [vmem:[%s5236_s24 + $0x580] ss:$16 sps:$4 sm:$0xff]  }
 0x19e   : > { %v3764_v13 = vld [vmem:[#allocation2 + $0xf0] sm:$0xff]  ;;  %v684_v25 = vld [vmem:[%s5236_s24 + $0x618] sm:$0xff] }
 0x19f   : > { %v3899_v16 = vadd.f32 %v5939_v15, %v3764_v13  ;;  %3635 = vst.msk [vmem:[#allocation2 + $0x100] sm:$0xff] %vm232_vm3, %v3506_v54  ;;  %v3507_v17 = vadd.f32 %v3095_v11, %v394_v5  ;;  %2761 = vmatmul.mubr.bf16.gmra.mrb[172].mxu0 %v5003_v6  ;;  %3322 = vmatmul.mubr.bf16.gmra.mrb[180].mxu1 %v4532_v19  ;;  %v5024_v54 = vld [vmem:[%s5236_s24 + $0x60c] ss:$16 sps:$4 sm:$0xff]  }
 0x1a0   : > { %v3765_v20 = vld [vmem:[#allocation2 + $0xf8] sm:$0xff]  ;;  %2768 = vmatprep.mubr.bf16.mxu0 %v5006_v8  ;;  %4680 = vmatprep.mubr.msk.bf16.mxu1 %vm2184_vm0, %v5014_v22  ;;  %v4540_v8 = vcombine.low %v678_v62, %v680_v63 }
 0x1a1   : > { %v4027_v23 = vmax.f32 %v3899_v16, 0.0  ;;  %v3900_v24 = vadd.f32 %v5939_v15, %v3765_v20  ;;  %3636 = vst.msk [vmem:[#allocation2 + $0x108] sm:$0xff] %vm232_vm3, %v3507_v17  ;;  %v400_v20 = vld [vmem:[#allocation2 + $0x138] sm:$0xff] }
 0x1a2   : > { %v2554_v27 = vpop.f32.mrb[68].mxu0  ;;  %v3115_v41 = vpop.f32.mrb[76].mxu1 }
 0x1a3   : > { %4155 = vst.msk [vmem:[%s5726_s10 + $0xf0] sm:$0xff] %vm232_vm3, %v4027_v23  ;;  %v4028_v28 = vmax.f32 %v3900_v24, 0.0  ;;  %v3100_v29 = vadd.f32 %v3099_v52, %v2554_v27  ;;  %v2556_v30 = vpop.f32.mrb[69].mxu0  ;;  %v3117_v44 = vpop.f32.mrb[77].mxu1  ;;  %v397_v52 = vld [vmem:[#allocation2 + $0x120] sm:$0xff]  ;;  %v682_v24 = vld [vmem:[%s5236_s24 + $0x608] sm:$0xff] }
 0x1a4   : > { %v2557_v33 = vpop.f32.mrb[70].mxu0  ;;  %v3118_v47 = vpop.f32.mrb[78].mxu1  ;;  %v5021_v23 = vld [vmem:[%s5236_s24 + $0x5e4] ss:$16 sps:$4 sm:$0xff]  }
 0x1a5   : > { %4156 = vst.msk [vmem:[%s5726_s10 + $0xf8] sm:$0xff] %vm232_vm3, %v4028_v28  ;;  %v3508_v37 = vadd.f32 %v3100_v29, %v395_v26  ;;  %v3103_v38 = vadd.f32 %v3102_v59, %v2557_v33  ;;  %v2559_v39 = vpop.f32.mrb[71].mxu0  ;;  %v3120_v51 = vpop.f32.mrb[79].mxu1  ;;  %v5013_v59 = vld [vmem:[%s5236_s24 + $0x5a0] ss:$16 sps:$4 sm:$0xff]  }
 0x1a6   : > { %v3766_v40 = vld [vmem:[#allocation2 + $0x100] sm:$0xff]  ;;  %v688_v51 = vld [vmem:[%s5236_s24 + $0x638] sm:$0xff] }
 0x1a7   : > { %v3901_v42 = vadd.f32 %v5939_v15, %v3766_v40  ;;  %3637 = vst.msk [vmem:[#allocation2 + $0x110] sm:$0xff] %vm232_vm3, %v3508_v37  ;;  %v3509_v43 = vadd.f32 %v3103_v38, %v396_v31  ;;  %2769 = vmatmul.mubr.bf16.gmra.mrb[176].mxu0 %v5008_v32  ;;  %3330 = vmatmul.mubr.bf16.gmra.mrb[184].mxu1 %v4536_v45  ;;  %v5029_v37 = vld [vmem:[%s5236_s24 + $0x62c] ss:$16 sps:$4 sm:$0xff]  }
 0x1a8   : > { %v3767_v46 = vld [vmem:[#allocation2 + $0x108] sm:$0xff]  ;;  %2776 = vmatprep.mubr.bf16.mxu0 %v5011_v34  ;;  %4681 = vmatprep.mubr.msk.bf16.mxu1 %vm2184_vm0, %v5019_v48  ;;  %v4544_v34 = vcombine.low %v682_v24, %v684_v25 }
 0x1a9   : > { %v4029_v49 = vmax.f32 %v3901_v42, 0.0  ;;  %v3902_v50 = vadd.f32 %v5939_v15, %v3767_v46  ;;  %3638 = vst.msk [vmem:[#allocation2 + $0x118] sm:$0xff] %vm232_vm3, %v3509_v43  ;;  %v402_v46 = vld [vmem:[#allocation2 + $0x148] sm:$0xff] }
 0x1aa   : > { %v2562_v53 = vpop.f32.mrb[72].mxu0  ;;  %v3123_v4 = vpop.f32.mrb[80].mxu1 }
 0x1ab   : > { %4157 = vst.msk [vmem:[%s5726_s10 + $0x100] sm:$0xff] %vm232_vm3, %v4029_v49  ;;  %v4030_v55 = vmax.f32 %v3902_v50, 0.0  ;;  %v3108_v56 = vadd.f32 %v3107_v14, %v2562_v53  ;;  %v2564_v57 = vpop.f32.mrb[73].mxu0  ;;  %v3125_v7 = vpop.f32.mrb[81].mxu1  ;;  %v399_v14 = vld [vmem:[#allocation2 + $0x130] sm:$0xff]  ;;  %v686_v50 = vld [vmem:[%s5236_s24 + $0x628] sm:$0xff] }
 0x1ac   : > { %v2565_v60 = vpop.f32.mrb[74].mxu0  ;;  %v3126_v10 = vpop.f32.mrb[82].mxu1  ;;  %v5026_v49 = vld [vmem:[%s5236_s24 + $0x604] ss:$16 sps:$4 sm:$0xff]  }
 0x1ad   : > { %4158 = vst.msk [vmem:[%s5726_s10 + $0x108] sm:$0xff] %vm232_vm3, %v4030_v55  ;;  %v3510_v0 = vadd.f32 %v3108_v56, %v397_v52  ;;  %v3111_v1 = vadd.f32 %v3110_v21, %v2565_v60  ;;  %v2567_v2 = vpop.f32.mrb[75].mxu0  ;;  %v3128_v13 = vpop.f32.mrb[83].mxu1  ;;  %v5018_v21 = vld [vmem:[%s5236_s24 + $0x5c0] ss:$16 sps:$4 sm:$0xff]  }
 0x1ae   : > { %v3768_v3 = vld [vmem:[#allocation2 + $0x110] sm:$0xff]  ;;  %v692_v13 = vld [vmem:[%s5236_s24 + $0x658] sm:$0xff] }
 0x1af   : > { %v3903_v5 = vadd.f32 %v5939_v15, %v3768_v3  ;;  %3639 = vst.msk [vmem:[#allocation2 + $0x120] sm:$0xff] %vm232_vm3, %v3510_v0  ;;  %v3511_v6 = vadd.f32 %v3111_v1, %v398_v58  ;;  %2777 = vmatmul.mubr.bf16.gmra.mrb[180].mxu0 %v5013_v59  ;;  %3338 = vmatmul.mubr.bf16.gmra.mrb[188].mxu1 %v4540_v8  ;;  %v5034_v0 = vld [vmem:[%s5236_s24 + $0x64c] ss:$16 sps:$4 sm:$0xff]  }
 0x1b0   : > { %v3769_v9 = vld [vmem:[#allocation2 + $0x118] sm:$0xff]  ;;  %2784 = vmatprep.mubr.bf16.mxu0 %v5016_v61  ;;  %4682 = vmatprep.mubr.msk.bf16.mxu1 %vm2184_vm0, %v5024_v54  ;;  %v4548_v61 = vcombine.low %v686_v50, %v688_v51 }
 0x1b1   : > { %v4031_v11 = vmax.f32 %v3903_v5, 0.0  ;;  %v3904_v12 = vadd.f32 %v5939_v15, %v3769_v9  ;;  %3640 = vst.msk [vmem:[#allocation2 + $0x128] sm:$0xff] %vm232_vm3, %v3511_v6  ;;  %v404_v9 = vld [vmem:[#allocation2 + $0x158] sm:$0xff] }
 0x1b2   : > { %v2570_v16 = vpop.f32.mrb[76].mxu0  ;;  %v3131_v30 = vpop.f32.mrb[84].mxu1 }
 0x1b3   : > { %4159 = vst.msk [vmem:[%s5726_s10 + $0x110] sm:$0xff] %vm232_vm3, %v4031_v11  ;;  %v4032_v17 = vmax.f32 %v3904_v12, 0.0  ;;  %v3116_v18 = vadd.f32 %v3115_v41, %v2570_v16  ;;  %v2572_v19 = vpop.f32.mrb[77].mxu0  ;;  %v3133_v33 = vpop.f32.mrb[85].mxu1  ;;  %v401_v41 = vld [vmem:[#allocation2 + $0x140] sm:$0xff]  ;;  %v690_v12 = vld [vmem:[%s5236_s24 + $0x648] sm:$0xff] }
 0x1b4   : > { %v2573_v22 = vpop.f32.mrb[78].mxu0  ;;  %v3134_v36 = vpop.f32.mrb[86].mxu1  ;;  %v5031_v11 = vld [vmem:[%s5236_s24 + $0x624] ss:$16 sps:$4 sm:$0xff]  }
 0x1b5   : > { %4160 = vst.msk [vmem:[%s5726_s10 + $0x118] sm:$0xff] %vm232_vm3, %v4032_v17  ;;  %v3512_v26 = vadd.f32 %v3116_v18, %v399_v14  ;;  %v3119_v27 = vadd.f32 %v3118_v47, %v2573_v22  ;;  %v2575_v28 = vpop.f32.mrb[79].mxu0  ;;  %v3136_v40 = vpop.f32.mrb[87].mxu1  ;;  %v5023_v47 = vld [vmem:[%s5236_s24 + $0x5e0] ss:$16 sps:$4 sm:$0xff]  }
 0x1b6   : > { %v3770_v29 = vld [vmem:[#allocation2 + $0x120] sm:$0xff]  ;;  %v696_v40 = vld [vmem:[%s5236_s24 + $0x678] sm:$0xff] }
 0x1b7   : > { %v3905_v31 = vadd.f32 %v5939_v15, %v3770_v29  ;;  %3641 = vst.msk [vmem:[#allocation2 + $0x130] sm:$0xff] %vm232_vm3, %v3512_v26  ;;  %v3513_v32 = vadd.f32 %v3119_v27, %v400_v20  ;;  %2785 = vmatmul.mubr.bf16.gmra.mrb[184].mxu0 %v5018_v21  ;;  %3346 = vmatmul.mubr.bf16.gmra.mrb[192].mxu1 %v4544_v34  ;;  %v5039_v26 = vld [vmem:[%s5236_s24 + $0x66c] ss:$16 sps:$4 sm:$0xff]  }
 0x1b8   : > { %v3771_v35 = vld [vmem:[#allocation2 + $0x128] sm:$0xff]  ;;  %2792 = vmatprep.mubr.bf16.mxu0 %v5021_v23  ;;  %4683 = vmatprep.mubr.msk.bf16.mxu1 %vm2184_vm0, %v5029_v37  ;;  %v4552_v23 = vcombine.low %v690_v12, %v692_v13 }
 0x1b9   : > { %v4033_v38 = vmax.f32 %v3905_v31, 0.0  ;;  %v3906_v39 = vadd.f32 %v5939_v15, %v3771_v35  ;;  %3642 = vst.msk [vmem:[#allocation2 + $0x138] sm:$0xff] %vm232_vm3, %v3513_v32  ;;  %v406_v35 = vld [vmem:[#allocation2 + $0x168] sm:$0xff] }
 0x1ba   : > { %v2578_v42 = vpop.f32.mrb[80].mxu0  ;;  %v3139_v57 = vpop.f32.mrb[88].mxu1 }
 0x1bb   : > { %4161 = vst.msk [vmem:[%s5726_s10 + $0x120] sm:$0xff] %vm232_vm3, %v4033_v38  ;;  %v4034_v43 = vmax.f32 %v3906_v39, 0.0  ;;  %v3124_v44 = vadd.f32 %v3123_v4, %v2578_v42  ;;  %v2580_v45 = vpop.f32.mrb[81].mxu0  ;;  %v3141_v60 = vpop.f32.mrb[89].mxu1  ;;  %v403_v4 = vld [vmem:[#allocation2 + $0x150] sm:$0xff]  ;;  %v694_v39 = vld [vmem:[%s5236_s24 + $0x668] sm:$0xff] }
 0x1bc   : > { %v2581_v48 = vpop.f32.mrb[82].mxu0  ;;  %v3142_v63 = vpop.f32.mrb[90].mxu1  ;;  %v5036_v38 = vld [vmem:[%s5236_s24 + $0x644] ss:$16 sps:$4 sm:$0xff]  }
 0x1bd   : > { %4162 = vst.msk [vmem:[%s5726_s10 + $0x128] sm:$0xff] %vm232_vm3, %v4034_v43  ;;  %v3514_v52 = vadd.f32 %v3124_v44, %v401_v41  ;;  %v3127_v53 = vadd.f32 %v3126_v10, %v2581_v48  ;;  %v2583_v55 = vpop.f32.mrb[83].mxu0  ;;  %v3144_v3 = vpop.f32.mrb[91].mxu1  ;;  %v5028_v10 = vld [vmem:[%s5236_s24 + $0x600] ss:$16 sps:$4 sm:$0xff]  }
 0x1be   : > { %v3772_v56 = vld [vmem:[#allocation2 + $0x130] sm:$0xff]  ;;  %v700_v3 = vld [vmem:[%s5236_s24 + $0x698] sm:$0xff] }
 0x1bf   : > { %v3907_v58 = vadd.f32 %v5939_v15, %v3772_v56  ;;  %3643 = vst.msk [vmem:[#allocation2 + $0x140] sm:$0xff] %vm232_vm3, %v3514_v52  ;;  %v3515_v59 = vadd.f32 %v3127_v53, %v402_v46  ;;  %2793 = vmatmul.mubr.bf16.gmra.mrb[188].mxu0 %v5023_v47  ;;  %3354 = vmatmul.mubr.bf16.gmra.mrb[196].mxu1 %v4548_v61  ;;  %v5044_v52 = vld [vmem:[%s5236_s24 + $0x68c] ss:$16 sps:$4 sm:$0xff]  }
 0x1c0   : > { %v3773_v62 = vld [vmem:[#allocation2 + $0x138] sm:$0xff]  ;;  %2800 = vmatprep.mubr.bf16.mxu0 %v5026_v49  ;;  %4684 = vmatprep.mubr.msk.bf16.mxu1 %vm2184_vm0, %v5034_v0  ;;  %v4556_v49 = vcombine.low %v694_v39, %v696_v40 }
 0x1c1   : > { %v4035_v1 = vmax.f32 %v3907_v58, 0.0  ;;  %v3908_v2 = vadd.f32 %v5939_v15, %v3773_v62  ;;  %3644 = vst.msk [vmem:[#allocation2 + $0x148] sm:$0xff] %vm232_vm3, %v3515_v59  ;;  %v408_v62 = vld [vmem:[#allocation2 + $0x178] sm:$0xff] }
 0x1c2   : > { %v2586_v5 = vpop.f32.mrb[84].mxu0  ;;  %v3147_v19 = vpop.f32.mrb[92].mxu1 }
 0x1c3   : > { %4163 = vst.msk [vmem:[%s5726_s10 + $0x130] sm:$0xff] %vm232_vm3, %v4035_v1  ;;  %v4036_v6 = vmax.f32 %v3908_v2, 0.0  ;;  %v3132_v7 = vadd.f32 %v3131_v30, %v2586_v5  ;;  %v2588_v8 = vpop.f32.mrb[85].mxu0  ;;  %v3149_v22 = vpop.f32.mrb[93].mxu1  ;;  %v405_v30 = vld [vmem:[#allocation2 + $0x160] sm:$0xff]  ;;  %v698_v2 = vld [vmem:[%s5236_s24 + $0x688] sm:$0xff] }
 0x1c4   : > { %v2589_v54 = vpop.f32.mrb[86].mxu0  ;;  %v3150_v25 = vpop.f32.mrb[94].mxu1  ;;  %v5041_v1 = vld [vmem:[%s5236_s24 + $0x664] ss:$16 sps:$4 sm:$0xff]  }
 0x1c5   : > { %4164 = vst.msk [vmem:[%s5726_s10 + $0x138] sm:$0xff] %vm232_vm3, %v4036_v6  ;;  %v3516_v14 = vadd.f32 %v3132_v7, %v403_v4  ;;  %v3135_v16 = vadd.f32 %v3134_v36, %v2589_v54  ;;  %v2591_v17 = vpop.f32.mrb[87].mxu0  ;;  %v3152_v29 = vpop.f32.mrb[95].mxu1  ;;  %v5033_v36 = vld [vmem:[%s5236_s24 + $0x620] ss:$16 sps:$4 sm:$0xff]  }
 0x1c6   : > { %v3774_v18 = vld [vmem:[#allocation2 + $0x140] sm:$0xff]  ;;  %v704_v29 = vld [vmem:[%s5236_s24 + $0x6b8] sm:$0xff] }
 0x1c7   : > { %v3909_v20 = vadd.f32 %v5939_v15, %v3774_v18  ;;  %3645 = vst.msk [vmem:[#allocation2 + $0x150] sm:$0xff] %vm232_vm3, %v3516_v14  ;;  %v3517_v21 = vadd.f32 %v3135_v16, %v404_v9  ;;  %2801 = vmatmul.mubr.bf16.gmra.mrb[192].mxu0 %v5028_v10  ;;  %3362 = vmatmul.mubr.bf16.gmra.mrb[200].mxu1 %v4552_v23  ;;  %v5049_v14 = vld [vmem:[%s5236_s24 + $0x6ac] ss:$16 sps:$4 sm:$0xff]  }
 0x1c8   : > { %v3775_v24 = vld [vmem:[#allocation2 + $0x148] sm:$0xff]  ;;  %2808 = vmatprep.mubr.bf16.mxu0 %v5031_v11  ;;  %4685 = vmatprep.mubr.msk.bf16.mxu1 %vm2184_vm0, %v5039_v26  ;;  %v4560_v11 = vcombine.low %v698_v2, %v700_v3 }
 0x1c9   : > { %v4037_v27 = vmax.f32 %v3909_v20, 0.0  ;;  %v3910_v28 = vadd.f32 %v5939_v15, %v3775_v24  ;;  %3646 = vst.msk [vmem:[#allocation2 + $0x158] sm:$0xff] %vm232_vm3, %v3517_v21  ;;  %v410_v24 = vld [vmem:[#allocation2 + $0x188] sm:$0xff] }
 0x1ca   : > { %v2594_v31 = vpop.f32.mrb[88].mxu0  ;;  %v3155_v45 = vpop.f32.mrb[96].mxu1 }
 0x1cb   : > { %4165 = vst.msk [vmem:[%s5726_s10 + $0x140] sm:$0xff] %vm232_vm3, %v4037_v27  ;;  %v4038_v32 = vmax.f32 %v3910_v28, 0.0  ;;  %v3140_v33 = vadd.f32 %v3139_v57, %v2594_v31  ;;  %v2596_v34 = vpop.f32.mrb[89].mxu0  ;;  %v3157_v48 = vpop.f32.mrb[97].mxu1  ;;  %v407_v57 = vld [vmem:[#allocation2 + $0x170] sm:$0xff]  ;;  %v702_v28 = vld [vmem:[%s5236_s24 + $0x6a8] sm:$0xff] }
 0x1cc   : > { %v2597_v37 = vpop.f32.mrb[90].mxu0  ;;  %v3158_v51 = vpop.f32.mrb[98].mxu1  ;;  %v5046_v27 = vld [vmem:[%s5236_s24 + $0x684] ss:$16 sps:$4 sm:$0xff]  }
 0x1cd   : > { %4166 = vst.msk [vmem:[%s5726_s10 + $0x148] sm:$0xff] %vm232_vm3, %v4038_v32  ;;  %v3518_v41 = vadd.f32 %v3140_v33, %v405_v30  ;;  %v3143_v42 = vadd.f32 %v3142_v63, %v2597_v37  ;;  %v2599_v43 = vpop.f32.mrb[91].mxu0  ;;  %v3160_v56 = vpop.f32.mrb[99].mxu1  ;;  %v5038_v63 = vld [vmem:[%s5236_s24 + $0x640] ss:$16 sps:$4 sm:$0xff]  }
 0x1ce   : > { %v3776_v44 = vld [vmem:[#allocation2 + $0x150] sm:$0xff]  ;;  %v708_v56 = vld [vmem:[%s5236_s24 + $0x6d8] sm:$0xff] }
 0x1cf   : > { %v3911_v46 = vadd.f32 %v5939_v15, %v3776_v44  ;;  %3647 = vst.msk [vmem:[#allocation2 + $0x160] sm:$0xff] %vm232_vm3, %v3518_v41  ;;  %v3519_v47 = vadd.f32 %v3143_v42, %v406_v35  ;;  %2809 = vmatmul.mubr.bf16.gmra.mrb[196].mxu0 %v5033_v36  ;;  %3370 = vmatmul.mubr.bf16.gmra.mrb[204].mxu1 %v4556_v49  ;;  %v5054_v41 = vld [vmem:[%s5236_s24 + $0x6cc] ss:$16 sps:$4 sm:$0xff]  }
 0x1d0   : > { %v3777_v50 = vld [vmem:[#allocation2 + $0x158] sm:$0xff]  ;;  %2816 = vmatprep.mubr.bf16.mxu0 %v5036_v38  ;;  %4686 = vmatprep.mubr.msk.bf16.mxu1 %vm2184_vm0, %v5044_v52  ;;  %v4564_v38 = vcombine.low %v702_v28, %v704_v29 }
 0x1d1   : > { %v4039_v53 = vmax.f32 %v3911_v46, 0.0  ;;  %v3912_v55 = vadd.f32 %v5939_v15, %v3777_v50  ;;  %3648 = vst.msk [vmem:[#allocation2 + $0x168] sm:$0xff] %vm232_vm3, %v3519_v47  ;;  %v412_v50 = vld [vmem:[#allocation2 + $0x198] sm:$0xff] }
 0x1d2   : > { %v2602_v58 = vpop.f32.mrb[92].mxu0  ;;  %v3163_v8 = vpop.f32.mrb[100].mxu1 }
 0x1d3   : > { %4167 = vst.msk [vmem:[%s5726_s10 + $0x150] sm:$0xff] %vm232_vm3, %v4039_v53  ;;  %v4040_v59 = vmax.f32 %v3912_v55, 0.0  ;;  %v3148_v60 = vadd.f32 %v3147_v19, %v2602_v58  ;;  %v2604_v61 = vpop.f32.mrb[93].mxu0  ;;  %v3165_v54 = vpop.f32.mrb[101].mxu1  ;;  %v409_v19 = vld [vmem:[#allocation2 + $0x180] sm:$0xff]  ;;  %v706_v55 = vld [vmem:[%s5236_s24 + $0x6c8] sm:$0xff] }
 0x1d4   : > { %v2605_v0 = vpop.f32.mrb[94].mxu0  ;;  %v3166_v13 = vpop.f32.mrb[102].mxu1  ;;  %v5051_v53 = vld [vmem:[%s5236_s24 + $0x6a4] ss:$16 sps:$4 sm:$0xff]  }
 0x1d5   : > { %4168 = vst.msk [vmem:[%s5726_s10 + $0x158] sm:$0xff] %vm232_vm3, %v4040_v59  ;;  %v3520_v4 = vadd.f32 %v3148_v60, %v407_v57  ;;  %v3151_v5 = vadd.f32 %v3150_v25, %v2605_v0  ;;  %v2607_v6 = vpop.f32.mrb[95].mxu0  ;;  %v3168_v18 = vpop.f32.mrb[103].mxu1  ;;  %v5043_v25 = vld [vmem:[%s5236_s24 + $0x660] ss:$16 sps:$4 sm:$0xff]  }
 0x1d6   : > { %v3778_v7 = vld [vmem:[#allocation2 + $0x160] sm:$0xff]  ;;  %v712_v18 = vld [vmem:[%s5236_s24 + $0x6f8] sm:$0xff] }
 0x1d7   : > { %v3913_v9 = vadd.f32 %v5939_v15, %v3778_v7  ;;  %3649 = vst.msk [vmem:[#allocation2 + $0x170] sm:$0xff] %vm232_vm3, %v3520_v4  ;;  %v3521_v10 = vadd.f32 %v3151_v5, %v408_v62  ;;  %2817 = vmatmul.mubr.bf16.gmra.mrb[200].mxu0 %v5038_v63  ;;  %3378 = vmatmul.mubr.bf16.gmra.mrb[208].mxu1 %v4560_v11  ;;  %v5059_v4 = vld [vmem:[%s5236_s24 + $0x6ec] ss:$16 sps:$4 sm:$0xff]  }
 0x1d8   : > { %v3779_v12 = vld [vmem:[#allocation2 + $0x168] sm:$0xff]  ;;  %2824 = vmatprep.mubr.bf16.mxu0 %v5041_v1  ;;  %4687 = vmatprep.mubr.msk.bf16.mxu1 %vm2184_vm0, %v5049_v14  ;;  %v4568_v1 = vcombine.low %v706_v55, %v708_v56 }
 0x1d9   : > { %v4041_v16 = vmax.f32 %v3913_v9, 0.0  ;;  %v3914_v17 = vadd.f32 %v5939_v15, %v3779_v12  ;;  %3650 = vst.msk [vmem:[#allocation2 + $0x178] sm:$0xff] %vm232_vm3, %v3521_v10  ;;  %v414_v12 = vld [vmem:[#allocation2 + $0x1a8] sm:$0xff] }
 0x1da   : > { %v2610_v20 = vpop.f32.mrb[96].mxu0  ;;  %v3171_v34 = vpop.f32.mrb[104].mxu1 }
 0x1db   : > { %4169 = vst.msk [vmem:[%s5726_s10 + $0x160] sm:$0xff] %vm232_vm3, %v4041_v16  ;;  %v4042_v21 = vmax.f32 %v3914_v17, 0.0  ;;  %v3156_v22 = vadd.f32 %v3155_v45, %v2610_v20  ;;  %v2612_v23 = vpop.f32.mrb[97].mxu0  ;;  %v3173_v37 = vpop.f32.mrb[105].mxu1  ;;  %v411_v45 = vld [vmem:[#allocation2 + $0x190] sm:$0xff]  ;;  %v710_v17 = vld [vmem:[%s5236_s24 + $0x6e8] sm:$0xff] }
 0x1dc   : > { %v2613_v26 = vpop.f32.mrb[98].mxu0  ;;  %v3174_v40 = vpop.f32.mrb[106].mxu1  ;;  %v5056_v16 = vld [vmem:[%s5236_s24 + $0x6c4] ss:$16 sps:$4 sm:$0xff]  }
 0x1dd   : > { %4170 = vst.msk [vmem:[%s5726_s10 + $0x168] sm:$0xff] %vm232_vm3, %v4042_v21  ;;  %v3522_v30 = vadd.f32 %v3156_v22, %v409_v19  ;;  %v3159_v31 = vadd.f32 %v3158_v51, %v2613_v26  ;;  %v2615_v32 = vpop.f32.mrb[99].mxu0  ;;  %v3176_v44 = vpop.f32.mrb[107].mxu1  ;;  %v5048_v51 = vld [vmem:[%s5236_s24 + $0x680] ss:$16 sps:$4 sm:$0xff]  }
 0x1de   : > { %v3780_v33 = vld [vmem:[#allocation2 + $0x170] sm:$0xff]  ;;  %v716_v44 = vld [vmem:[%s5236_s24 + $0x718] sm:$0xff] }
 0x1df   : > { %v3915_v35 = vadd.f32 %v5939_v15, %v3780_v33  ;;  %3651 = vst.msk [vmem:[#allocation2 + $0x180] sm:$0xff] %vm232_vm3, %v3522_v30  ;;  %v3523_v36 = vadd.f32 %v3159_v31, %v410_v24  ;;  %2825 = vmatmul.mubr.bf16.gmra.mrb[204].mxu0 %v5043_v25  ;;  %3386 = vmatmul.mubr.bf16.gmra.mrb[212].mxu1 %v4564_v38  ;;  %v5064_v30 = vld [vmem:[%s5236_s24 + $0x70c] ss:$16 sps:$4 sm:$0xff]  }
 0x1e0   : > { %v3781_v39 = vld [vmem:[#allocation2 + $0x178] sm:$0xff]  ;;  %2832 = vmatprep.mubr.bf16.mxu0 %v5046_v27  ;;  %4688 = vmatprep.mubr.msk.bf16.mxu1 %vm2184_vm0, %v5054_v41  ;;  %v4572_v27 = vcombine.low %v710_v17, %v712_v18 }
 0x1e1   : > { %v4043_v42 = vmax.f32 %v3915_v35, 0.0  ;;  %v3916_v43 = vadd.f32 %v5939_v15, %v3781_v39  ;;  %3652 = vst.msk [vmem:[#allocation2 + $0x188] sm:$0xff] %vm232_vm3, %v3523_v36  ;;  %v416_v39 = vld [vmem:[#allocation2 + $0x1b8] sm:$0xff] }
 0x1e2   : > { %v2618_v46 = vpop.f32.mrb[100].mxu0  ;;  %v3179_v61 = vpop.f32.mrb[108].mxu1 }
 0x1e3   : > { %4171 = vst.msk [vmem:[%s5726_s10 + $0x170] sm:$0xff] %vm232_vm3, %v4043_v42  ;;  %v4044_v47 = vmax.f32 %v3916_v43, 0.0  ;;  %v3164_v48 = vadd.f32 %v3163_v8, %v2618_v46  ;;  %v2620_v49 = vpop.f32.mrb[101].mxu0  ;;  %v3181_v0 = vpop.f32.mrb[109].mxu1  ;;  %v413_v8 = vld [vmem:[#allocation2 + $0x1a0] sm:$0xff]  ;;  %v714_v43 = vld [vmem:[%s5236_s24 + $0x708] sm:$0xff] }
 0x1e4   : > { %v2621_v52 = vpop.f32.mrb[102].mxu0  ;;  %v3182_v3 = vpop.f32.mrb[110].mxu1  ;;  %v5061_v42 = vld [vmem:[%s5236_s24 + $0x6e4] ss:$16 sps:$4 sm:$0xff]  }
 0x1e5   : > { %4172 = vst.msk [vmem:[%s5726_s10 + $0x178] sm:$0xff] %vm232_vm3, %v4044_v47  ;;  %v3524_v57 = vadd.f32 %v3164_v48, %v411_v45  ;;  %v3167_v58 = vadd.f32 %v3166_v13, %v2621_v52  ;;  %v2623_v59 = vpop.f32.mrb[103].mxu0  ;;  %v3184_v7 = vpop.f32.mrb[111].mxu1  ;;  %v5053_v13 = vld [vmem:[%s5236_s24 + $0x6a0] ss:$16 sps:$4 sm:$0xff]  }
 0x1e6   : > { %v3782_v60 = vld [vmem:[#allocation2 + $0x180] sm:$0xff]  ;;  %v720_v7 = vld [vmem:[%s5236_s24 + $0x738] sm:$0xff] }
 0x1e7   : > { %v3917_v62 = vadd.f32 %v5939_v15, %v3782_v60  ;;  %3653 = vst.msk [vmem:[#allocation2 + $0x190] sm:$0xff] %vm232_vm3, %v3524_v57  ;;  %v3525_v63 = vadd.f32 %v3167_v58, %v412_v50  ;;  %2833 = vmatmul.mubr.bf16.gmra.mrb[208].mxu0 %v5048_v51  ;;  %3394 = vmatmul.mubr.bf16.gmra.mrb[216].mxu1 %v4568_v1  ;;  %v5069_v57 = vld [vmem:[%s5236_s24 + $0x72c] ss:$16 sps:$4 sm:$0xff]  }
 0x1e8   : > { %v3783_v2 = vld [vmem:[#allocation2 + $0x188] sm:$0xff]  ;;  %2840 = vmatprep.mubr.bf16.mxu0 %v5051_v53  ;;  %4689 = vmatprep.mubr.msk.bf16.mxu1 %vm2184_vm0, %v5059_v4  ;;  %v4576_v53 = vcombine.low %v714_v43, %v716_v44 }
 0x1e9   : > { %v4045_v5 = vmax.f32 %v3917_v62, 0.0  ;;  %v3918_v6 = vadd.f32 %v5939_v15, %v3783_v2  ;;  %3654 = vst.msk [vmem:[#allocation2 + $0x198] sm:$0xff] %vm232_vm3, %v3525_v63  ;;  %v418_v2 = vld [vmem:[#allocation2 + $0x1c8] sm:$0xff] }
 0x1ea   : > { %v2626_v9 = vpop.f32.mrb[104].mxu0  ;;  %v3187_v23 = vpop.f32.mrb[112].mxu1 }
 0x1eb   : > { %4173 = vst.msk [vmem:[%s5726_s10 + $0x180] sm:$0xff] %vm232_vm3, %v4045_v5  ;;  %v4046_v10 = vmax.f32 %v3918_v6, 0.0  ;;  %v3172_v54 = vadd.f32 %v3171_v34, %v2626_v9  ;;  %v2628_v11 = vpop.f32.mrb[105].mxu0  ;;  %v3189_v26 = vpop.f32.mrb[113].mxu1  ;;  %v415_v34 = vld [vmem:[#allocation2 + $0x1b0] sm:$0xff]  ;;  %v718_v6 = vld [vmem:[%s5236_s24 + $0x728] sm:$0xff] }
 0x1ec   : > { %v2629_v14 = vpop.f32.mrb[106].mxu0  ;;  %v3190_v29 = vpop.f32.mrb[114].mxu1  ;;  %v5066_v5 = vld [vmem:[%s5236_s24 + $0x704] ss:$16 sps:$4 sm:$0xff]  }
 0x1ed   : > { %4174 = vst.msk [vmem:[%s5726_s10 + $0x188] sm:$0xff] %vm232_vm3, %v4046_v10  ;;  %v3526_v19 = vadd.f32 %v3172_v54, %v413_v8  ;;  %v3175_v20 = vadd.f32 %v3174_v40, %v2629_v14  ;;  %v2631_v21 = vpop.f32.mrb[107].mxu0  ;;  %v3192_v33 = vpop.f32.mrb[115].mxu1  ;;  %v5058_v40 = vld [vmem:[%s5236_s24 + $0x6c0] ss:$16 sps:$4 sm:$0xff]  }
 0x1ee   : > { %v3784_v22 = vld [vmem:[#allocation2 + $0x190] sm:$0xff]  ;;  %v724_v33 = vld [vmem:[%s5236_s24 + $0x758] sm:$0xff] }
 0x1ef   : > { %v3919_v24 = vadd.f32 %v5939_v15, %v3784_v22  ;;  %3655 = vst.msk [vmem:[#allocation2 + $0x1a0] sm:$0xff] %vm232_vm3, %v3526_v19  ;;  %v3527_v25 = vadd.f32 %v3175_v20, %v414_v12  ;;  %2841 = vmatmul.mubr.bf16.gmra.mrb[212].mxu0 %v5053_v13  ;;  %3402 = vmatmul.mubr.bf16.gmra.mrb[220].mxu1 %v4572_v27  ;;  %v5074_v19 = vld [vmem:[%s5236_s24 + $0x74c] ss:$16 sps:$4 sm:$0xff]  }
 0x1f0   : > { %v3785_v28 = vld [vmem:[#allocation2 + $0x198] sm:$0xff]  ;;  %2848 = vmatprep.mubr.bf16.mxu0 %v5056_v16  ;;  %4690 = vmatprep.mubr.msk.bf16.mxu1 %vm2184_vm0, %v5064_v30  ;;  %v4580_v16 = vcombine.low %v718_v6, %v720_v7 }
 0x1f1   : > { %v4047_v31 = vmax.f32 %v3919_v24, 0.0  ;;  %v3920_v32 = vadd.f32 %v5939_v15, %v3785_v28  ;;  %3656 = vst.msk [vmem:[#allocation2 + $0x1a8] sm:$0xff] %vm232_vm3, %v3527_v25  ;;  %v420_v28 = vld [vmem:[#allocation2 + $0x1d8] sm:$0xff] }
 0x1f2   : > { %v2634_v35 = vpop.f32.mrb[108].mxu0  ;;  %v3195_v49 = vpop.f32.mrb[116].mxu1 }
 0x1f3   : > { %4175 = vst.msk [vmem:[%s5726_s10 + $0x190] sm:$0xff] %vm232_vm3, %v4047_v31  ;;  %v4048_v36 = vmax.f32 %v3920_v32, 0.0  ;;  %v3180_v37 = vadd.f32 %v3179_v61, %v2634_v35  ;;  %v2636_v38 = vpop.f32.mrb[109].mxu0  ;;  %v3197_v52 = vpop.f32.mrb[117].mxu1  ;;  %v417_v61 = vld [vmem:[#allocation2 + $0x1c0] sm:$0xff]  ;;  %v722_v32 = vld [vmem:[%s5236_s24 + $0x748] sm:$0xff] }
 0x1f4   : > { %v2637_v41 = vpop.f32.mrb[110].mxu0  ;;  %v3198_v56 = vpop.f32.mrb[118].mxu1  ;;  %v5071_v31 = vld [vmem:[%s5236_s24 + $0x724] ss:$16 sps:$4 sm:$0xff]  }
 0x1f5   : > { %4176 = vst.msk [vmem:[%s5726_s10 + $0x198] sm:$0xff] %vm232_vm3, %v4048_v36  ;;  %v3528_v45 = vadd.f32 %v3180_v37, %v415_v34  ;;  %v3183_v46 = vadd.f32 %v3182_v3, %v2637_v41  ;;  %v2639_v47 = vpop.f32.mrb[111].mxu0  ;;  %v3200_v60 = vpop.f32.mrb[119].mxu1  ;;  %v5063_v3 = vld [vmem:[%s5236_s24 + $0x6e0] ss:$16 sps:$4 sm:$0xff]  }
 0x1f6   : > { %v3786_v48 = vld [vmem:[#allocation2 + $0x1a0] sm:$0xff]  ;;  %v728_v60 = vld [vmem:[%s5236_s24 + $0x778] sm:$0xff] }
 0x1f7   : > { %v3921_v50 = vadd.f32 %v5939_v15, %v3786_v48  ;;  %3657 = vst.msk [vmem:[#allocation2 + $0x1b0] sm:$0xff] %vm232_vm3, %v3528_v45  ;;  %v3529_v51 = vadd.f32 %v3183_v46, %v416_v39  ;;  %2849 = vmatmul.mubr.bf16.gmra.mrb[216].mxu0 %v5058_v40  ;;  %3410 = vmatmul.mubr.bf16.gmra.mrb[224].mxu1 %v4576_v53  ;;  %v5079_v45 = vld [vmem:[%s5236_s24 + $0x76c] ss:$16 sps:$4 sm:$0xff]  }
 0x1f8   : > { %v3787_v55 = vld [vmem:[#allocation2 + $0x1a8] sm:$0xff]  ;;  %2856 = vmatprep.mubr.bf16.mxu0 %v5061_v42  ;;  %4691 = vmatprep.mubr.msk.bf16.mxu1 %vm2184_vm0, %v5069_v57  ;;  %v4584_v42 = vcombine.low %v722_v32, %v724_v33 }
 0x1f9   : > { %v4049_v58 = vmax.f32 %v3921_v50, 0.0  ;;  %v3922_v59 = vadd.f32 %v5939_v15, %v3787_v55  ;;  %3658 = vst.msk [vmem:[#allocation2 + $0x1b8] sm:$0xff] %vm232_vm3, %v3529_v51  ;;  %v422_v55 = vld [vmem:[#allocation2 + $0x1e8] sm:$0xff] }
 0x1fa   : > { %v2642_v62 = vpop.f32.mrb[112].mxu0  ;;  %v3203_v11 = vpop.f32.mrb[120].mxu1 }
 0x1fb   : > { %4177 = vst.msk [vmem:[%s5726_s10 + $0x1a0] sm:$0xff] %vm232_vm3, %v4049_v58  ;;  %v4050_v63 = vmax.f32 %v3922_v59, 0.0  ;;  %v3188_v0 = vadd.f32 %v3187_v23, %v2642_v62  ;;  %v2644_v1 = vpop.f32.mrb[113].mxu0  ;;  %v3205_v14 = vpop.f32.mrb[121].mxu1  ;;  %v419_v23 = vld [vmem:[#allocation2 + $0x1d0] sm:$0xff]  ;;  %v726_v59 = vld [vmem:[%s5236_s24 + $0x768] sm:$0xff] }
 0x1fc   : > { %v2645_v4 = vpop.f32.mrb[114].mxu0  ;;  %v3206_v18 = vpop.f32.mrb[122].mxu1  ;;  %v5076_v58 = vld [vmem:[%s5236_s24 + $0x744] ss:$16 sps:$4 sm:$0xff]  }
 0x1fd   : > { %4178 = vst.msk [vmem:[%s5726_s10 + $0x1a8] sm:$0xff] %vm232_vm3, %v4050_v63  ;;  %v3530_v8 = vadd.f32 %v3188_v0, %v417_v61  ;;  %v3191_v9 = vadd.f32 %v3190_v29, %v2645_v4  ;;  %v2647_v10 = vpop.f32.mrb[115].mxu0  ;;  %v3208_v22 = vpop.f32.mrb[123].mxu1  ;;  %v5068_v29 = vld [vmem:[%s5236_s24 + $0x700] ss:$16 sps:$4 sm:$0xff]  }
 0x1fe   : > { %v3788_v54 = vld [vmem:[#allocation2 + $0x1b0] sm:$0xff]  ;;  %v732_v22 = vld [vmem:[%s5236_s24 + $0x798] sm:$0xff] }
 0x1ff   : > { %v3923_v12 = vadd.f32 %v5939_v15, %v3788_v54  ;;  %3659 = vst.msk [vmem:[#allocation2 + $0x1c0] sm:$0xff] %vm232_vm3, %v3530_v8  ;;  %v3531_v13 = vadd.f32 %v3191_v9, %v418_v2  ;;  %2857 = vmatmul.mubr.bf16.gmra.mrb[220].mxu0 %v5063_v3  ;;  %3418 = vmatmul.mubr.bf16.gmra.mrb[228].mxu1 %v4580_v16  ;;  %v5084_v8 = vld [vmem:[%s5236_s24 + $0x78c] ss:$16 sps:$4 sm:$0xff]  }
 0x200   : > { %v3789_v17 = vld [vmem:[#allocation2 + $0x1b8] sm:$0xff]  ;;  %2864 = vmatprep.mubr.bf16.mxu0 %v5066_v5  ;;  %4692 = vmatprep.mubr.msk.bf16.mxu1 %vm2184_vm0, %v5074_v19  ;;  %v4588_v5 = vcombine.low %v726_v59, %v728_v60 }
 0x201   : > { %v4051_v20 = vmax.f32 %v3923_v12, 0.0  ;;  %v3924_v21 = vadd.f32 %v5939_v15, %v3789_v17  ;;  %3660 = vst.msk [vmem:[#allocation2 + $0x1c8] sm:$0xff] %vm232_vm3, %v3531_v13  ;;  %v424_v17 = vld [vmem:[#allocation2 + $0x1f8] sm:$0xff] }
 0x202   : > { %v2650_v24 = vpop.f32.mrb[116].mxu0  ;;  %v3211_v38 = vpop.f32.mrb[124].mxu1 }
 0x203   : > { %4179 = vst.msk [vmem:[%s5726_s10 + $0x1b0] sm:$0xff] %vm232_vm3, %v4051_v20  ;;  %v4052_v25 = vmax.f32 %v3924_v21, 0.0  ;;  %v3196_v26 = vadd.f32 %v3195_v49, %v2650_v24  ;;  %v2652_v27 = vpop.f32.mrb[117].mxu0  ;;  %v3213_v41 = vpop.f32.mrb[125].mxu1  ;;  %v421_v49 = vld [vmem:[#allocation2 + $0x1e0] sm:$0xff]  ;;  %v730_v21 = vld [vmem:[%s5236_s24 + $0x788] sm:$0xff] }
 0x204   : > { %v2653_v30 = vpop.f32.mrb[118].mxu0  ;;  %v3214_v44 = vpop.f32.mrb[126].mxu1  ;;  %v5081_v20 = vld [vmem:[%s5236_s24 + $0x764] ss:$16 sps:$4 sm:$0xff]  }
 0x205   : > { %4180 = vst.msk [vmem:[%s5726_s10 + $0x1b8] sm:$0xff] %vm232_vm3, %v4052_v25  ;;  %v3532_v34 = vadd.f32 %v3196_v26, %v419_v23  ;;  %v3199_v35 = vadd.f32 %v3198_v56, %v2653_v30  ;;  %v2655_v36 = vpop.f32.mrb[119].mxu0  ;;  %v3216_v48 = vpop.f32.mrb[127].mxu1  ;;  %v5073_v56 = vld [vmem:[%s5236_s24 + $0x720] ss:$16 sps:$4 sm:$0xff]  }
 0x206   : > { %v3790_v37 = vld [vmem:[#allocation2 + $0x1c0] sm:$0xff]  ;;  %v736_v48 = vld [vmem:[%s5236_s24 + $0x7b8] sm:$0xff] }
 0x207   : > { %v3925_v39 = vadd.f32 %v5939_v15, %v3790_v37  ;;  %3661 = vst.msk [vmem:[#allocation2 + $0x1d0] sm:$0xff] %vm232_vm3, %v3532_v34  ;;  %v3533_v40 = vadd.f32 %v3199_v35, %v420_v28  ;;  %2865 = vmatmul.mubr.bf16.gmra.mrb[224].mxu0 %v5068_v29  ;;  %3426 = vmatmul.mubr.bf16.gmra.mrb[232].mxu1 %v4584_v42  ;;  %v5089_v34 = vld [vmem:[%s5236_s24 + $0x7ac] ss:$16 sps:$4 sm:$0xff]   ;;  %v6157_v36 = vld [vmem:[%s6463_s2] ss:$0 sm:$0xff] }
 0x208   : > { %v3791_v43 = vld [vmem:[#allocation2 + $0x1c8] sm:$0xff]  ;;  %2872 = vmatprep.mubr.bf16.mxu0 %v5071_v31  ;;  %4693 = vmatprep.mubr.msk.bf16.mxu1 %vm2184_vm0, %v5079_v45  ;;  %v4592_v31 = vcombine.low %v730_v21, %v732_v22 }
 0x209   : > { %v4053_v46 = vmax.f32 %v3925_v39, 0.0  ;;  %v3926_v47 = vadd.f32 %v5939_v15, %v3791_v43  ;;  %3662 = vst.msk [vmem:[#allocation2 + $0x1d8] sm:$0xff] %vm232_vm3, %v3533_v40  ;;  %v426_v43 = vld [vmem:[#allocation2 + $0x208] sm:$0xff] }
 0x20a   : > { %v2658_v50 = vpop.f32.mrb[120].mxu0  ;;  %v3219_v1 = vpop.f32.mrb[128].mxu1 }
 0x20b   : > { %4181 = vst.msk [vmem:[%s5726_s10 + $0x1c0] sm:$0xff] %vm232_vm3, %v4053_v46  ;;  %v4054_v51 = vmax.f32 %v3926_v47, 0.0  ;;  %v3204_v52 = vadd.f32 %v3203_v11, %v2658_v50  ;;  %v2660_v53 = vpop.f32.mrb[121].mxu0  ;;  %v3221_v4 = vpop.f32.mrb[129].mxu1  ;;  %v423_v11 = vld [vmem:[#allocation2 + $0x1f0] sm:$0xff]  ;;  %v734_v47 = vld [vmem:[%s5236_s24 + $0x7a8] sm:$0xff] }
 0x20c   : > { %v2661_v57 = vpop.f32.mrb[122].mxu0  ;;  %v3222_v7 = vpop.f32.mrb[130].mxu1  ;;  %v5086_v46 = vld [vmem:[%s5236_s24 + $0x784] ss:$16 sps:$4 sm:$0xff]  }
 0x20d   : > { %4182 = vst.msk [vmem:[%s5726_s10 + $0x1c8] sm:$0xff] %vm232_vm3, %v4054_v51  ;;  %v3534_v61 = vadd.f32 %v3204_v52, %v421_v49  ;;  %v3207_v62 = vadd.f32 %v3206_v18, %v2661_v57  ;;  %v2663_v63 = vpop.f32.mrb[123].mxu0  ;;  %v3224_v54 = vpop.f32.mrb[131].mxu1  ;;  %v5078_v18 = vld [vmem:[%s5236_s24 + $0x740] ss:$16 sps:$4 sm:$0xff]  }
 0x20e   : > { %v3792_v0 = vld [vmem:[#allocation2 + $0x1d0] sm:$0xff]  ;;  %v740_v54 = vld [vmem:[%s5236_s24 + $0x7d8] sm:$0xff] }
 0x20f   : > { %v3927_v2 = vadd.f32 %v5939_v15, %v3792_v0  ;;  %3663 = vst.msk [vmem:[#allocation2 + $0x1e0] sm:$0xff] %vm232_vm3, %v3534_v61  ;;  %v3535_v3 = vadd.f32 %v3207_v62, %v422_v55  ;;  %2873 = vmatmul.mubr.bf16.gmra.mrb[228].mxu0 %v5073_v56  ;;  %3434 = vmatmul.mubr.bf16.gmra.mrb[236].mxu1 %v4588_v5  ;;  %v5094_v61 = vld [vmem:[%s5236_s24 + $0x7cc] ss:$16 sps:$4 sm:$0xff]  }
 0x210   : > { %v3793_v6 = vld [vmem:[#allocation2 + $0x1d8] sm:$0xff]  ;;  %2880 = vmatprep.mubr.bf16.mxu0 %v5076_v58  ;;  %4694 = vmatprep.mubr.msk.bf16.mxu1 %vm2184_vm0, %v5084_v8  ;;  %v4596_v58 = vcombine.low %v734_v47, %v736_v48 }
 0x211   : > { %v4055_v9 = vmax.f32 %v3927_v2, 0.0  ;;  %v3928_v10 = vadd.f32 %v5939_v15, %v3793_v6  ;;  %3664 = vst.msk [vmem:[#allocation2 + $0x1e8] sm:$0xff] %vm232_vm3, %v3535_v3  ;;  %v428_v6 = vld [vmem:[#allocation2 + $0x218] sm:$0xff] }
 0x212   : > { %v2666_v12 = vpop.f32.mrb[124].mxu0  ;;  %v3227_v27 = vpop.f32.mrb[132].mxu1 }
 0x213   : > { %4183 = vst.msk [vmem:[%s5726_s10 + $0x1d0] sm:$0xff] %vm232_vm3, %v4055_v9  ;;  %v4056_v13 = vmax.f32 %v3928_v10, 0.0  ;;  %v3212_v14 = vadd.f32 %v3211_v38, %v2666_v12  ;;  %v2668_v16 = vpop.f32.mrb[125].mxu0  ;;  %v3229_v30 = vpop.f32.mrb[133].mxu1  ;;  %v425_v38 = vld [vmem:[#allocation2 + $0x200] sm:$0xff]  ;;  %v738_v10 = vld [vmem:[%s5236_s24 + $0x7c8] sm:$0xff] }
 0x214   : > { %v2669_v19 = vpop.f32.mrb[126].mxu0  ;;  %v3230_v33 = vpop.f32.mrb[134].mxu1  ;;  %v5091_v9 = vld [vmem:[%s5236_s24 + $0x7a4] ss:$16 sps:$4 sm:$0xff]  }
 0x215   : > { %4184 = vst.msk [vmem:[%s5726_s10 + $0x1d8] sm:$0xff] %vm232_vm3, %v4056_v13  ;;  %v3536_v23 = vadd.f32 %v3212_v14, %v423_v11  ;;  %v3215_v24 = vadd.f32 %v3214_v44, %v2669_v19  ;;  %v2671_v25 = vpop.f32.mrb[127].mxu0  ;;  %v3232_v37 = vpop.f32.mrb[135].mxu1  ;;  %v5083_v44 = vld [vmem:[%s5236_s24 + $0x760] ss:$16 sps:$4 sm:$0xff]  }
 0x216   : > { %v3794_v26 = vld [vmem:[#allocation2 + $0x1e0] sm:$0xff]  ;;  %v744_v37 = vld [vmem:[%s5236_s24 + $0x7f8] sm:$0xff] }
 0x217   : > { %v3929_v28 = vadd.f32 %v5939_v15, %v3794_v26  ;;  %3665 = vst.msk [vmem:[#allocation2 + $0x1f0] sm:$0xff] %vm232_vm3, %v3536_v23  ;;  %v3537_v29 = vadd.f32 %v3215_v24, %v424_v17  ;;  %2881 = vmatmul.mubr.bf16.gmra.mrb[232].mxu0 %v5078_v18  ;;  %3442 = vmatmul.mubr.bf16.gmra.mrb[240].mxu1 %v4592_v31  ;;  %v5099_v23 = vld [vmem:[%s5236_s24 + $0x7ec] ss:$16 sps:$4 sm:$0xff]  }
 0x218   : > { %v3795_v32 = vld [vmem:[#allocation2 + $0x1e8] sm:$0xff]  ;;  %2888 = vmatprep.mubr.bf16.mxu0 %v5081_v20  ;;  %4695 = vmatprep.mubr.msk.bf16.mxu1 %vm2184_vm0, %v5089_v34  ;;  %v4600_v20 = vcombine.low %v738_v10, %v740_v54  ;;  %v433_v54 = vld [vmem:[#allocation2 + $0x240] sm:$0xff] }
 0x219   : > { %v4057_v35 = vmax.f32 %v3929_v28, 0.0  ;;  %v3930_v15 = vadd.f32 %v6157_v36, %v3795_v32  ;;  %3666 = vst.msk [vmem:[#allocation2 + $0x1f8] sm:$0xff] %vm232_vm3, %v3537_v29  ;;  %v430_v32 = vld [vmem:[#allocation2 + $0x228] sm:$0xff] }
 0x21a   : > { %v2674_v39 = vpop.f32.mrb[128].mxu0  ;;  %v3235_v53 = vpop.f32.mrb[136].mxu1 }
 0x21b   : > { %4185 = vst.msk [vmem:[%s5726_s10 + $0x1e0] sm:$0xff] %vm232_vm3, %v4057_v35  ;;  %v4058_v40 = vmax.f32 %v3930_v15, 0.0  ;;  %v3220_v41 = vadd.f32 %v3219_v1, %v2674_v39  ;;  %v2676_v42 = vpop.f32.mrb[129].mxu0  ;;  %v3237_v57 = vpop.f32.mrb[137].mxu1  ;;  %v427_v1 = vld [vmem:[#allocation2 + $0x210] sm:$0xff]  ;;  %v742_v15 = vld [vmem:[%s5236_s24 + $0x7e8] sm:$0xff] }
 0x21c   : > { %v2677_v45 = vpop.f32.mrb[130].mxu0  ;;  %v3238_v60 = vpop.f32.mrb[138].mxu1  ;;  %v5096_v35 = vld [vmem:[%s5236_s24 + $0x7c4] ss:$16 sps:$4 sm:$0xff]  }
 0x21d   : > { %4186 = vst.msk [vmem:[%s5726_s10 + $0x1e8] sm:$0xff] %vm232_vm3, %v4058_v40  ;;  %v3538_v49 = vadd.f32 %v3220_v41, %v425_v38  ;;  %v3223_v50 = vadd.f32 %v3222_v7, %v2677_v45  ;;  %v2679_v51 = vpop.f32.mrb[131].mxu0  ;;  %v3240_v0 = vpop.f32.mrb[139].mxu1  ;;  %v5088_v7 = vld [vmem:[%s5236_s24 + $0x780] ss:$16 sps:$4 sm:$0xff]  }
 0x21e   : > { %v3796_v52 = vld [vmem:[#allocation2 + $0x1f0] sm:$0xff] }
 0x21f   : > { %v3931_v55 = vadd.f32 %v6157_v36, %v3796_v52  ;;  %3667 = vst.msk [vmem:[#allocation2 + $0x200] sm:$0xff] %vm232_vm3, %v3538_v49  ;;  %v3539_v56 = vadd.f32 %v3223_v50, %v426_v43  ;;  %2889 = vmatmul.mubr.bf16.gmra.mrb[236].mxu0 %v5083_v44  ;;  %3450 = vmatmul.mubr.bf16.gmra.mrb[244].mxu1 %v4596_v58  ;;  %v431_v52 = vld [vmem:[#allocation2 + $0x230] sm:$0xff] }
 0x220   : > { %v3797_v59 = vld [vmem:[#allocation2 + $0x1f8] sm:$0xff]  ;;  %2896 = vmatprep.mubr.bf16.mxu0 %v5086_v46  ;;  %4696 = vmatprep.mubr.msk.bf16.mxu1 %vm2184_vm0, %v5094_v61  ;;  %v4604_v46 = vcombine.low %v742_v15, %v744_v37  ;;  %v5098_v58 = vld [vmem:[%s5236_s24 + $0x7c0] ss:$16 sps:$4 sm:$0xff]   ;;  %v5101_v61 = vld [vmem:[%s5236_s24 + $0x7e4] ss:$16 sps:$4 sm:$0xff]  }
 0x221   : > { %v4059_v62 = vmax.f32 %v3931_v55, 0.0  ;;  %v3932_v63 = vadd.f32 %v6157_v36, %v3797_v59  ;;  %3668 = vst.msk [vmem:[#allocation2 + $0x208] sm:$0xff] %vm232_vm3, %v3539_v56  ;;  %v432_v59 = vld [vmem:[#allocation2 + $0x238] sm:$0xff] }
 0x222   : > { %v2682_v2 = vpop.f32.mrb[132].mxu0  ;;  %v3243_v16 = vpop.f32.mrb[140].mxu1  ;;  %v436_v37 = vld [vmem:[#allocation2 + $0x258] sm:$0xff] }
 0x223   : > { %4187 = vst.msk [vmem:[%s5726_s10 + $0x1f0] sm:$0xff] %vm232_vm3, %v4059_v62  ;;  %v4060_v3 = vmax.f32 %v3932_v63, 0.0  ;;  %v3228_v4 = vadd.f32 %v3227_v27, %v2682_v2  ;;  %v2684_v5 = vpop.f32.mrb[133].mxu0  ;;  %v3245_v19 = vpop.f32.mrb[141].mxu1  ;;  %v429_v27 = vld [vmem:[#allocation2 + $0x220] sm:$0xff] }
 0x224   : > { %v2685_v8 = vpop.f32.mrb[134].mxu0  ;;  %v3246_v22 = vpop.f32.mrb[142].mxu1 }
 0x225   : > { %4188 = vst.msk [vmem:[%s5726_s10 + $0x1f8] sm:$0xff] %vm232_vm3, %v4060_v3  ;;  %v3540_v11 = vadd.f32 %v3228_v4, %v427_v1  ;;  %v3231_v12 = vadd.f32 %v3230_v33, %v2685_v8  ;;  %v2687_v13 = vpop.f32.mrb[135].mxu0  ;;  %v3248_v26 = vpop.f32.mrb[143].mxu1  ;;  %v5093_v33 = vld [vmem:[%s5236_s24 + $0x7a0] ss:$16 sps:$4 sm:$0xff]  }
 0x226   : > { %v3798_v14 = vld [vmem:[#allocation2 + $0x200] sm:$0xff] }
 0x227   : > { %v3933_v17 = vadd.f32 %v6157_v36, %v3798_v14  ;;  %3669 = vst.msk [vmem:[#allocation2 + $0x210] sm:$0xff] %vm232_vm3, %v3540_v11  ;;  %v3541_v18 = vadd.f32 %v3231_v12, %v428_v6  ;;  %2897 = vmatmul.mubr.bf16.gmra.mrb[240].mxu0 %v5088_v7  ;;  %3458 = vmatmul.mubr.bf16.gmra.mrb[248].mxu1 %v4600_v20 }
 0x228   : > { %v3799_v21 = vld [vmem:[#allocation2 + $0x208] sm:$0xff]  ;;  %2904 = vmatprep.mubr.bf16.mxu0 %v5091_v9  ;;  %4697 = vmatprep.mubr.msk.bf16.mxu1 %vm2184_vm0, %v5099_v23 }
 0x229   : > { %v4061_v24 = vmax.f32 %v3933_v17, 0.0  ;;  %v3934_v25 = vadd.f32 %v6157_v36, %v3799_v21  ;;  %3670 = vst.msk [vmem:[#allocation2 + $0x218] sm:$0xff] %vm232_vm3, %v3541_v18  ;;  %v434_v17 = vld [vmem:[#allocation2 + $0x248] sm:$0xff] }
 0x22a   : > { %v2690_v28 = vpop.f32.mrb[136].mxu0  ;;  %v3251_v42 = vpop.f32.mrb[144].mxu1 }
 0x22b   : > { %4189 = vst.msk [vmem:[%s5726_s10 + $0x200] sm:$0xff] %vm232_vm3, %v4061_v24  ;;  %v4062_v29 = vmax.f32 %v3934_v25, 0.0  ;;  %v3236_v30 = vadd.f32 %v3235_v53, %v2690_v28  ;;  %v2692_v31 = vpop.f32.mrb[137].mxu0  ;;  %v3253_v45 = vpop.f32.mrb[145].mxu1 }
 0x22c   : > { %v2693_v34 = vpop.f32.mrb[138].mxu0  ;;  %v3254_v48 = vpop.f32.mrb[146].mxu1 }
 0x22d   : > { %4190 = vst.msk [vmem:[%s5726_s10 + $0x208] sm:$0xff] %vm232_vm3, %v4062_v29  ;;  %v3542_v38 = vadd.f32 %v3236_v30, %v429_v27  ;;  %v3239_v39 = vadd.f32 %v3238_v60, %v2693_v34  ;;  %v2695_v40 = vpop.f32.mrb[139].mxu0  ;;  %v3256_v51 = vpop.f32.mrb[147].mxu1 }
 0x22e   : > { %v3800_v41 = vld [vmem:[#allocation2 + $0x210] sm:$0xff] }
 0x22f   : > { %v3935_v43 = vadd.f32 %v6157_v36, %v3800_v41  ;;  %3671 = vst.msk [vmem:[#allocation2 + $0x220] sm:$0xff] %vm232_vm3, %v3542_v38  ;;  %v3543_v44 = vadd.f32 %v3239_v39, %v430_v32  ;;  %2905 = vmatmul.mubr.bf16.gmra.mrb[244].mxu0 %v5093_v33  ;;  %3466 = vmatmul.mubr.bf16.gmra.mrb[252].mxu1 %v4604_v46  ;;  %v435_v32 = vld [vmem:[#allocation2 + $0x250] sm:$0xff] }
 0x230   : > { %v3801_v47 = vld [vmem:[#allocation2 + $0x218] sm:$0xff]  ;;  %2912 = vmatprep.mubr.bf16.mxu0 %v5096_v35 }
 0x231   : > { %v4063_v49 = vmax.f32 %v3935_v43, 0.0  ;;  %v3936_v50 = vadd.f32 %v6157_v36, %v3801_v47  ;;  %3672 = vst.msk [vmem:[#allocation2 + $0x228] sm:$0xff] %vm232_vm3, %v3543_v44 }
 0x232   : > { %v2698_v53 = vpop.f32.mrb[140].mxu0  ;;  %v3259_v2 = vpop.f32.mrb[148].mxu1 }
 0x233   : > { %4191 = vst.msk [vmem:[%s5726_s10 + $0x210] sm:$0xff] %vm232_vm3, %v4063_v49  ;;  %v4064_v55 = vmax.f32 %v3936_v50, 0.0  ;;  %v3244_v56 = vadd.f32 %v3243_v16, %v2698_v53  ;;  %v2700_v57 = vpop.f32.mrb[141].mxu0  ;;  %v3261_v5 = vpop.f32.mrb[149].mxu1  ;;  %v5103_v16 = vld [vmem:[%s5236_s24 + $0x7e0] ss:$16 sps:$4 sm:$0xff]  }
 0x234   : > { %v2701_v60 = vpop.f32.mrb[142].mxu0  ;;  %v3262_v7 = vpop.f32.mrb[150].mxu1 }
 0x235   : > { %4192 = vst.msk [vmem:[%s5726_s10 + $0x218] sm:$0xff] %vm232_vm3, %v4064_v55  ;;  %v3544_v62 = vadd.f32 %v3244_v56, %v431_v52  ;;  %v3247_v63 = vadd.f32 %v3246_v22, %v2701_v60  ;;  %v2703_v0 = vpop.f32.mrb[143].mxu0  ;;  %v3264_v10 = vpop.f32.mrb[151].mxu1  ;;  %v437_v52 = vld [vmem:[#allocation2 + $0x260] sm:$0xff] }
 0x236   : > { %v3802_v1 = vld [vmem:[#allocation2 + $0x220] sm:$0xff] }
 0x237   : > { %v3937_v3 = vadd.f32 %v6157_v36, %v3802_v1  ;;  %3673 = vst.msk [vmem:[#allocation2 + $0x230] sm:$0xff] %vm232_vm3, %v3544_v62  ;;  %v3545_v4 = vadd.f32 %v3247_v63, %v432_v59  ;;  %2913 = vmatmul.mubr.bf16.gmra.mrb[248].mxu0 %v5098_v58  ;;  %v438_v58 = vld [vmem:[#allocation2 + $0x268] sm:$0xff] }
 0x238   : > { %v3803_v6 = vld [vmem:[#allocation2 + $0x228] sm:$0xff]  ;;  %2920 = vmatprep.mubr.bf16.mxu0 %v5101_v61 }
 0x239   : > { %v4065_v8 = vmax.f32 %v3937_v3, 0.0  ;;  %v3938_v9 = vadd.f32 %v6157_v36, %v3803_v6  ;;  %3674 = vst.msk [vmem:[#allocation2 + $0x238] sm:$0xff] %vm232_vm3, %v3545_v4 }
 0x23a   : > { %v2706_v11 = vpop.f32.mrb[144].mxu0  ;;  %v3267_v23 = vpop.f32.mrb[152].mxu1 }
 0x23b   : > { %4193 = vst.msk [vmem:[%s5726_s10 + $0x220] sm:$0xff] %vm232_vm3, %v4065_v8  ;;  %v4066_v12 = vmax.f32 %v3938_v9, 0.0  ;;  %v3252_v13 = vadd.f32 %v3251_v42, %v2706_v11  ;;  %v2708_v14 = vpop.f32.mrb[145].mxu0  ;;  %v3269_v26 = vpop.f32.mrb[153].mxu1  ;;  %v439_v9 = vld [vmem:[#allocation2 + $0x270] sm:$0xff] }
 0x23c   : > { %v2709_v18 = vpop.f32.mrb[146].mxu0  ;;  %v3270_v28 = vpop.f32.mrb[154].mxu1 }
 0x23d   : > { %4194 = vst.msk [vmem:[%s5726_s10 + $0x228] sm:$0xff] %vm232_vm3, %v4066_v12  ;;  %v3546_v19 = vadd.f32 %v3252_v13, %v433_v54  ;;  %v3255_v20 = vadd.f32 %v3254_v48, %v2709_v18  ;;  %v2711_v21 = vpop.f32.mrb[147].mxu0  ;;  %v3272_v31 = vpop.f32.mrb[155].mxu1  ;;  %v440_v13 = vld [vmem:[#allocation2 + $0x278] sm:$0xff] }
 0x23e   : > { %v3804_v22 = vld [vmem:[#allocation2 + $0x230] sm:$0xff] }
 0x23f   : > { %v3939_v24 = vadd.f32 %v6157_v36, %v3804_v22  ;;  %3675 = vst.msk [vmem:[#allocation2 + $0x240] sm:$0xff] %vm232_vm3, %v3546_v19  ;;  %v3547_v25 = vadd.f32 %v3255_v20, %v434_v17  ;;  %2921 = vmatmul.mubr.bf16.gmra.mrb[252].mxu0 %v5103_v16 }
 0x240   : > { %v3805_v27 = vld [vmem:[#allocation2 + $0x238] sm:$0xff] }
 0x241   : > { %v4067_v29 = vmax.f32 %v3939_v24, 0.0  ;;  %v3940_v30 = vadd.f32 %v6157_v36, %v3805_v27  ;;  %3676 = vst.msk [vmem:[#allocation2 + $0x248] sm:$0xff] %vm232_vm3, %v3547_v25 }
 0x242   : > { %v2714_v33 = vpop.f32.mrb[148].mxu0  ;;  %v3275_v43 = vpop.f32.mrb[156].mxu1 }
 0x243   : > { %4195 = vst.msk [vmem:[%s5726_s10 + $0x230] sm:$0xff] %vm232_vm3, %v4067_v29  ;;  %v4068_v34 = vmax.f32 %v3940_v30, 0.0  ;;  %v3260_v35 = vadd.f32 %v3259_v2, %v2714_v33  ;;  %v2716_v15 = vpop.f32.mrb[149].mxu0  ;;  %v3277_v46 = vpop.f32.mrb[157].mxu1  ;;  %v441_v29 = vld [vmem:[#allocation2 + $0x280] sm:$0xff] }
 0x244   : > { %v2717_v38 = vpop.f32.mrb[150].mxu0  ;;  %v3278_v48 = vpop.f32.mrb[158].mxu1 }
 0x245   : > { %4196 = vst.msk [vmem:[%s5726_s10 + $0x238] sm:$0xff] %vm232_vm3, %v4068_v34  ;;  %v3548_v39 = vadd.f32 %v3260_v35, %v435_v32  ;;  %v3263_v40 = vadd.f32 %v3262_v7, %v2717_v38  ;;  %v2719_v41 = vpop.f32.mrb[151].mxu0  ;;  %v3280_v51 = vpop.f32.mrb[159].mxu1  ;;  %v442_v34 = vld [vmem:[#allocation2 + $0x288] sm:$0xff] }
 0x246   : > { %v3806_v42 = vld [vmem:[#allocation2 + $0x240] sm:$0xff] }
 0x247   : > { %v3941_v44 = vadd.f32 %v6157_v36, %v3806_v42  ;;  %3677 = vst.msk [vmem:[#allocation2 + $0x250] sm:$0xff] %vm232_vm3, %v3548_v39  ;;  %v3549_v45 = vadd.f32 %v3263_v40, %v436_v37 }
 0x248   : > { %v3807_v47 = vld [vmem:[#allocation2 + $0x248] sm:$0xff] }
 0x249   : > { %v4069_v49 = vmax.f32 %v3941_v44, 0.0  ;;  %v3942_v50 = vadd.f32 %v6157_v36, %v3807_v47  ;;  %3678 = vst.msk [vmem:[#allocation2 + $0x258] sm:$0xff] %vm232_vm3, %v3549_v45 }
 0x24a   : > { %v2722_v53 = vpop.f32.mrb[152].mxu0  ;;  %v3283_v0 = vpop.f32.mrb[160].mxu1 }
 0x24b   : > { %4197 = vst.msk [vmem:[%s5726_s10 + $0x240] sm:$0xff] %vm232_vm3, %v4069_v49  ;;  %v4070_v55 = vmax.f32 %v3942_v50, 0.0  ;;  %v3268_v56 = vadd.f32 %v3267_v23, %v2722_v53  ;;  %v2724_v57 = vpop.f32.mrb[153].mxu0  ;;  %v3285_v3 = vpop.f32.mrb[161].mxu1  ;;  %v443_v49 = vld [vmem:[#allocation2 + $0x290] sm:$0xff] }
 0x24c   : > { %v2725_v59 = vpop.f32.mrb[154].mxu0  ;;  %v3286_v5 = vpop.f32.mrb[162].mxu1 }
 0x24d   : > { %4198 = vst.msk [vmem:[%s5726_s10 + $0x248] sm:$0xff] %vm232_vm3, %v4070_v55  ;;  %v3550_v60 = vadd.f32 %v3268_v56, %v437_v52  ;;  %v3271_v61 = vadd.f32 %v3270_v28, %v2725_v59  ;;  %v2727_v62 = vpop.f32.mrb[155].mxu0  ;;  %v3288_v8 = vpop.f32.mrb[163].mxu1  ;;  %v444_v55 = vld [vmem:[#allocation2 + $0x298] sm:$0xff] }
 0x24e   : > { %v3808_v63 = vld [vmem:[#allocation2 + $0x250] sm:$0xff] }
 0x24f   : > { %v3943_v1 = vadd.f32 %v6157_v36, %v3808_v63  ;;  %3679 = vst.msk [vmem:[#allocation2 + $0x260] sm:$0xff] %vm232_vm3, %v3550_v60  ;;  %v3551_v2 = vadd.f32 %v3271_v61, %v438_v58 }
 0x250   : > { %v3809_v4 = vld [vmem:[#allocation2 + $0x258] sm:$0xff] }
 0x251   : > { %v4071_v6 = vmax.f32 %v3943_v1, 0.0  ;;  %v3944_v7 = vadd.f32 %v6157_v36, %v3809_v4  ;;  %3680 = vst.msk [vmem:[#allocation2 + $0x268] sm:$0xff] %vm232_vm3, %v3551_v2 }
 0x252   : > { %v2730_v10 = vpop.f32.mrb[156].mxu0  ;;  %v3291_v20 = vpop.f32.mrb[164].mxu1 }
 0x253   : > { %4199 = vst.msk [vmem:[%s5726_s10 + $0x250] sm:$0xff] %vm232_vm3, %v4071_v6  ;;  %v4072_v54 = vmax.f32 %v3944_v7, 0.0  ;;  %v3276_v11 = vadd.f32 %v3275_v43, %v2730_v10  ;;  %v2732_v12 = vpop.f32.mrb[157].mxu0  ;;  %v3293_v23 = vpop.f32.mrb[165].mxu1  ;;  %v445_v6 = vld [vmem:[#allocation2 + $0x2a0] sm:$0xff] }
 0x254   : > { %v2733_v14 = vpop.f32.mrb[158].mxu0  ;;  %v3294_v25 = vpop.f32.mrb[166].mxu1 }
 0x255   : > { %4200 = vst.msk [vmem:[%s5726_s10 + $0x258] sm:$0xff] %vm232_vm3, %v4072_v54  ;;  %v3552_v16 = vadd.f32 %v3276_v11, %v439_v9  ;;  %v3279_v17 = vadd.f32 %v3278_v48, %v2733_v14  ;;  %v2735_v18 = vpop.f32.mrb[159].mxu0  ;;  %v3296_v28 = vpop.f32.mrb[167].mxu1  ;;  %v446_v54 = vld [vmem:[#allocation2 + $0x2a8] sm:$0xff] }
 0x256   : > { %v3810_v19 = vld [vmem:[#allocation2 + $0x260] sm:$0xff] }
 0x257   : > { %v3945_v21 = vadd.f32 %v6157_v36, %v3810_v19  ;;  %3681 = vst.msk [vmem:[#allocation2 + $0x270] sm:$0xff] %vm232_vm3, %v3552_v16  ;;  %v3553_v22 = vadd.f32 %v3279_v17, %v440_v13 }
 0x258   : > { %v3811_v24 = vld [vmem:[#allocation2 + $0x268] sm:$0xff] }
 0x259   : > { %v4073_v26 = vmax.f32 %v3945_v21, 0.0  ;;  %v3946_v27 = vadd.f32 %v6157_v36, %v3811_v24  ;;  %3682 = vst.msk [vmem:[#allocation2 + $0x278] sm:$0xff] %vm232_vm3, %v3553_v22 }
 0x25a   : > { %v2738_v30 = vpop.f32.mrb[160].mxu0  ;;  %v3299_v40 = vpop.f32.mrb[168].mxu1 }
 0x25b   : > { %4201 = vst.msk [vmem:[%s5726_s10 + $0x260] sm:$0xff] %vm232_vm3, %v4073_v26  ;;  %v4074_v31 = vmax.f32 %v3946_v27, 0.0  ;;  %v3284_v32 = vadd.f32 %v3283_v0, %v2738_v30  ;;  %v2740_v33 = vpop.f32.mrb[161].mxu0  ;;  %v3301_v43 = vpop.f32.mrb[169].mxu1  ;;  %v447_v26 = vld [vmem:[#allocation2 + $0x2b0] sm:$0xff] }
 0x25c   : > { %v2741_v35 = vpop.f32.mrb[162].mxu0  ;;  %v3302_v45 = vpop.f32.mrb[170].mxu1 }
 0x25d   : > { %4202 = vst.msk [vmem:[%s5726_s10 + $0x268] sm:$0xff] %vm232_vm3, %v4074_v31  ;;  %v3554_v15 = vadd.f32 %v3284_v32, %v441_v29  ;;  %v3287_v37 = vadd.f32 %v3286_v5, %v2741_v35  ;;  %v2743_v38 = vpop.f32.mrb[163].mxu0  ;;  %v3304_v48 = vpop.f32.mrb[171].mxu1  ;;  %v448_v31 = vld [vmem:[#allocation2 + $0x2b8] sm:$0xff] }
 0x25e   : > { %v3812_v39 = vld [vmem:[#allocation2 + $0x270] sm:$0xff] }
 0x25f   : > { %v3947_v41 = vadd.f32 %v6157_v36, %v3812_v39  ;;  %3683 = vst.msk [vmem:[#allocation2 + $0x280] sm:$0xff] %vm232_vm3, %v3554_v15  ;;  %v3555_v42 = vadd.f32 %v3287_v37, %v442_v34 }
 0x260   : > { %v3813_v44 = vld [vmem:[#allocation2 + $0x278] sm:$0xff] }
 0x261   : > { %v4075_v46 = vmax.f32 %v3947_v41, 0.0  ;;  %v3948_v47 = vadd.f32 %v6157_v36, %v3813_v44  ;;  %3684 = vst.msk [vmem:[#allocation2 + $0x288] sm:$0xff] %vm232_vm3, %v3555_v42 }
 0x262   : > { %v2746_v50 = vpop.f32.mrb[164].mxu0  ;;  %v3307_v61 = vpop.f32.mrb[172].mxu1 }
 0x263   : > { %4203 = vst.msk [vmem:[%s5726_s10 + $0x270] sm:$0xff] %vm232_vm3, %v4075_v46  ;;  %v4076_v51 = vmax.f32 %v3948_v47, 0.0  ;;  %v3292_v52 = vadd.f32 %v3291_v20, %v2746_v50  ;;  %v2748_v53 = vpop.f32.mrb[165].mxu0  ;;  %v3309_v0 = vpop.f32.mrb[173].mxu1  ;;  %v449_v46 = vld [vmem:[#allocation2 + $0x2c0] sm:$0xff] }
 0x264   : > { %v2749_v56 = vpop.f32.mrb[166].mxu0  ;;  %v3310_v2 = vpop.f32.mrb[174].mxu1 }
 0x265   : > { %4204 = vst.msk [vmem:[%s5726_s10 + $0x278] sm:$0xff] %vm232_vm3, %v4076_v51  ;;  %v3556_v57 = vadd.f32 %v3292_v52, %v443_v49  ;;  %v3295_v58 = vadd.f32 %v3294_v25, %v2749_v56  ;;  %v2751_v59 = vpop.f32.mrb[167].mxu0  ;;  %v3312_v5 = vpop.f32.mrb[175].mxu1  ;;  %v450_v51 = vld [vmem:[#allocation2 + $0x2c8] sm:$0xff] }
 0x266   : > { %v3814_v60 = vld [vmem:[#allocation2 + $0x280] sm:$0xff] }
 0x267   : > { %v3949_v62 = vadd.f32 %v6157_v36, %v3814_v60  ;;  %3685 = vst.msk [vmem:[#allocation2 + $0x290] sm:$0xff] %vm232_vm3, %v3556_v57  ;;  %v3557_v63 = vadd.f32 %v3295_v58, %v444_v55 }
 0x268   : > { %v3815_v1 = vld [vmem:[#allocation2 + $0x288] sm:$0xff] }
 0x269   : > { %v4077_v3 = vmax.f32 %v3949_v62, 0.0  ;;  %v3950_v4 = vadd.f32 %v6157_v36, %v3815_v1  ;;  %3686 = vst.msk [vmem:[#allocation2 + $0x298] sm:$0xff] %vm232_vm3, %v3557_v63 }
 0x26a   : > { %v2754_v7 = vpop.f32.mrb[168].mxu0  ;;  %v3315_v17 = vpop.f32.mrb[176].mxu1 }
 0x26b   : > { %4205 = vst.msk [vmem:[%s5726_s10 + $0x280] sm:$0xff] %vm232_vm3, %v4077_v3  ;;  %v4078_v8 = vmax.f32 %v3950_v4, 0.0  ;;  %v3300_v9 = vadd.f32 %v3299_v40, %v2754_v7  ;;  %v2756_v10 = vpop.f32.mrb[169].mxu0  ;;  %v3317_v20 = vpop.f32.mrb[177].mxu1  ;;  %v451_v3 = vld [vmem:[#allocation2 + $0x2d0] sm:$0xff] }
 0x26c   : > { %v2757_v11 = vpop.f32.mrb[170].mxu0  ;;  %v3318_v22 = vpop.f32.mrb[178].mxu1 }
 0x26d   : > { %4206 = vst.msk [vmem:[%s5726_s10 + $0x288] sm:$0xff] %vm232_vm3, %v4078_v8  ;;  %v3558_v12 = vadd.f32 %v3300_v9, %v445_v6  ;;  %v3303_v13 = vadd.f32 %v3302_v45, %v2757_v11  ;;  %v2759_v14 = vpop.f32.mrb[171].mxu0  ;;  %v3320_v25 = vpop.f32.mrb[179].mxu1  ;;  %v452_v8 = vld [vmem:[#allocation2 + $0x2d8] sm:$0xff] }
 0x26e   : > { %v3816_v16 = vld [vmem:[#allocation2 + $0x290] sm:$0xff] }
 0x26f   : > { %v3951_v18 = vadd.f32 %v6157_v36, %v3816_v16  ;;  %3687 = vst.msk [vmem:[#allocation2 + $0x2a0] sm:$0xff] %vm232_vm3, %v3558_v12  ;;  %v3559_v19 = vadd.f32 %v3303_v13, %v446_v54 }
 0x270   : > { %v3817_v21 = vld [vmem:[#allocation2 + $0x298] sm:$0xff] }
 0x271   : > { %v4079_v23 = vmax.f32 %v3951_v18, 0.0  ;;  %v3952_v24 = vadd.f32 %v6157_v36, %v3817_v21  ;;  %3688 = vst.msk [vmem:[#allocation2 + $0x2a8] sm:$0xff] %vm232_vm3, %v3559_v19 }
 0x272   : > { %v2762_v27 = vpop.f32.mrb[172].mxu0  ;;  %v3323_v37 = vpop.f32.mrb[180].mxu1 }
 0x273   : > { %4207 = vst.msk [vmem:[%s5726_s10 + $0x290] sm:$0xff] %vm232_vm3, %v4079_v23  ;;  %v4080_v28 = vmax.f32 %v3952_v24, 0.0  ;;  %v3308_v29 = vadd.f32 %v3307_v61, %v2762_v27  ;;  %v2764_v30 = vpop.f32.mrb[173].mxu0  ;;  %v3325_v40 = vpop.f32.mrb[181].mxu1  ;;  %v453_v23 = vld [vmem:[#allocation2 + $0x2e0] sm:$0xff] }
 0x274   : > { %v2765_v32 = vpop.f32.mrb[174].mxu0  ;;  %v3326_v42 = vpop.f32.mrb[182].mxu1 }
 0x275   : > { %4208 = vst.msk [vmem:[%s5726_s10 + $0x298] sm:$0xff] %vm232_vm3, %v4080_v28  ;;  %v3560_v33 = vadd.f32 %v3308_v29, %v447_v26  ;;  %v3311_v34 = vadd.f32 %v3310_v2, %v2765_v32  ;;  %v2767_v35 = vpop.f32.mrb[175].mxu0  ;;  %v3328_v45 = vpop.f32.mrb[183].mxu1  ;;  %v454_v28 = vld [vmem:[#allocation2 + $0x2e8] sm:$0xff] }
 0x276   : > { %v3818_v15 = vld [vmem:[#allocation2 + $0x2a0] sm:$0xff] }
 0x277   : > { %v3953_v38 = vadd.f32 %v6157_v36, %v3818_v15  ;;  %3689 = vst.msk [vmem:[#allocation2 + $0x2b0] sm:$0xff] %vm232_vm3, %v3560_v33  ;;  %v3561_v39 = vadd.f32 %v3311_v34, %v448_v31 }
 0x278   : > { %v3819_v41 = vld [vmem:[#allocation2 + $0x2a8] sm:$0xff] }
 0x279   : > { %v4081_v43 = vmax.f32 %v3953_v38, 0.0  ;;  %v3954_v44 = vadd.f32 %v6157_v36, %v3819_v41  ;;  %3690 = vst.msk [vmem:[#allocation2 + $0x2b8] sm:$0xff] %vm232_vm3, %v3561_v39 }
 0x27a   : > { %v2770_v47 = vpop.f32.mrb[176].mxu0  ;;  %v3331_v58 = vpop.f32.mrb[184].mxu1 }
 0x27b   : > { %4209 = vst.msk [vmem:[%s5726_s10 + $0x2a0] sm:$0xff] %vm232_vm3, %v4081_v43  ;;  %v4082_v48 = vmax.f32 %v3954_v44, 0.0  ;;  %v3316_v49 = vadd.f32 %v3315_v17, %v2770_v47  ;;  %v2772_v50 = vpop.f32.mrb[177].mxu0  ;;  %v3333_v61 = vpop.f32.mrb[185].mxu1  ;;  %v455_v43 = vld [vmem:[#allocation2 + $0x2f0] sm:$0xff] }
 0x27c   : > { %v2773_v52 = vpop.f32.mrb[178].mxu0  ;;  %v3334_v63 = vpop.f32.mrb[186].mxu1 }
 0x27d   : > { %4210 = vst.msk [vmem:[%s5726_s10 + $0x2a8] sm:$0xff] %vm232_vm3, %v4082_v48  ;;  %v3562_v53 = vadd.f32 %v3316_v49, %v449_v46  ;;  %v3319_v55 = vadd.f32 %v3318_v22, %v2773_v52  ;;  %v2775_v56 = vpop.f32.mrb[179].mxu0  ;;  %v3336_v2 = vpop.f32.mrb[187].mxu1  ;;  %v456_v48 = vld [vmem:[#allocation2 + $0x2f8] sm:$0xff] }
 0x27e   : > { %v3820_v57 = vld [vmem:[#allocation2 + $0x2b0] sm:$0xff] }
 0x27f   : > { %v3955_v59 = vadd.f32 %v6157_v36, %v3820_v57  ;;  %3691 = vst.msk [vmem:[#allocation2 + $0x2c0] sm:$0xff] %vm232_vm3, %v3562_v53  ;;  %v3563_v60 = vadd.f32 %v3319_v55, %v450_v51 }
 0x280   : > { %v3821_v62 = vld [vmem:[#allocation2 + $0x2b8] sm:$0xff] }
 0x281   : > { %v4083_v0 = vmax.f32 %v3955_v59, 0.0  ;;  %v3956_v1 = vadd.f32 %v6157_v36, %v3821_v62  ;;  %3692 = vst.msk [vmem:[#allocation2 + $0x2c8] sm:$0xff] %vm232_vm3, %v3563_v60 }
 0x282   : > { %v2778_v4 = vpop.f32.mrb[180].mxu0  ;;  %v3339_v13 = vpop.f32.mrb[188].mxu1 }
 0x283   : > { %4211 = vst.msk [vmem:[%s5726_s10 + $0x2b0] sm:$0xff] %vm232_vm3, %v4083_v0  ;;  %v4084_v5 = vmax.f32 %v3956_v1, 0.0  ;;  %v3324_v6 = vadd.f32 %v3323_v37, %v2778_v4  ;;  %v2780_v7 = vpop.f32.mrb[181].mxu0  ;;  %v3341_v17 = vpop.f32.mrb[189].mxu1  ;;  %v457_v0 = vld [vmem:[#allocation2 + $0x300] sm:$0xff] }
 0x284   : > { %v2781_v9 = vpop.f32.mrb[182].mxu0  ;;  %v3342_v19 = vpop.f32.mrb[190].mxu1 }
 0x285   : > { %4212 = vst.msk [vmem:[%s5726_s10 + $0x2b8] sm:$0xff] %vm232_vm3, %v4084_v5  ;;  %v3564_v10 = vadd.f32 %v3324_v6, %v451_v3  ;;  %v3327_v54 = vadd.f32 %v3326_v42, %v2781_v9  ;;  %v2783_v11 = vpop.f32.mrb[183].mxu0  ;;  %v3344_v22 = vpop.f32.mrb[191].mxu1  ;;  %v458_v5 = vld [vmem:[#allocation2 + $0x308] sm:$0xff] }
 0x286   : > { %v3822_v12 = vld [vmem:[#allocation2 + $0x2c0] sm:$0xff] }
 0x287   : > { %v3957_v14 = vadd.f32 %v6157_v36, %v3822_v12  ;;  %3693 = vst.msk [vmem:[#allocation2 + $0x2d0] sm:$0xff] %vm232_vm3, %v3564_v10  ;;  %v3565_v16 = vadd.f32 %v3327_v54, %v452_v8 }
 0x288   : > { %v3823_v18 = vld [vmem:[#allocation2 + $0x2c8] sm:$0xff] }
 0x289   : > { %v4085_v20 = vmax.f32 %v3957_v14, 0.0  ;;  %v3958_v21 = vadd.f32 %v6157_v36, %v3823_v18  ;;  %3694 = vst.msk [vmem:[#allocation2 + $0x2d8] sm:$0xff] %vm232_vm3, %v3565_v16 }
 0x28a   : > { %v2786_v24 = vpop.f32.mrb[184].mxu0  ;;  %v3347_v34 = vpop.f32.mrb[192].mxu1 }
 0x28b   : > { %4213 = vst.msk [vmem:[%s5726_s10 + $0x2c0] sm:$0xff] %vm232_vm3, %v4085_v20  ;;  %v4086_v25 = vmax.f32 %v3958_v21, 0.0  ;;  %v3332_v26 = vadd.f32 %v3331_v58, %v2786_v24  ;;  %v2788_v27 = vpop.f32.mrb[185].mxu0  ;;  %v3349_v37 = vpop.f32.mrb[193].mxu1  ;;  %v459_v20 = vld [vmem:[#allocation2 + $0x310] sm:$0xff] }
 0x28c   : > { %v2789_v29 = vpop.f32.mrb[186].mxu0  ;;  %v3350_v39 = vpop.f32.mrb[194].mxu1 }
 0x28d   : > { %4214 = vst.msk [vmem:[%s5726_s10 + $0x2c8] sm:$0xff] %vm232_vm3, %v4086_v25  ;;  %v3566_v30 = vadd.f32 %v3332_v26, %v453_v23  ;;  %v3335_v31 = vadd.f32 %v3334_v63, %v2789_v29  ;;  %v2791_v32 = vpop.f32.mrb[187].mxu0  ;;  %v3352_v42 = vpop.f32.mrb[195].mxu1  ;;  %v460_v25 = vld [vmem:[#allocation2 + $0x318] sm:$0xff] }
 0x28e   : > { %v3824_v33 = vld [vmem:[#allocation2 + $0x2d0] sm:$0xff] }
 0x28f   : > { %v3959_v35 = vadd.f32 %v6157_v36, %v3824_v33  ;;  %3695 = vst.msk [vmem:[#allocation2 + $0x2e0] sm:$0xff] %vm232_vm3, %v3566_v30  ;;  %v3567_v15 = vadd.f32 %v3335_v31, %v454_v28 }
 0x290   : > { %v3825_v38 = vld [vmem:[#allocation2 + $0x2d8] sm:$0xff] }
 0x291   : > { %v4087_v40 = vmax.f32 %v3959_v35, 0.0  ;;  %v3960_v41 = vadd.f32 %v6157_v36, %v3825_v38  ;;  %3696 = vst.msk [vmem:[#allocation2 + $0x2e8] sm:$0xff] %vm232_vm3, %v3567_v15 }
 0x292   : > { %v2794_v44 = vpop.f32.mrb[188].mxu0  ;;  %v3355_v55 = vpop.f32.mrb[196].mxu1 }
 0x293   : > { %4215 = vst.msk [vmem:[%s5726_s10 + $0x2d0] sm:$0xff] %vm232_vm3, %v4087_v40  ;;  %v4088_v45 = vmax.f32 %v3960_v41, 0.0  ;;  %v3340_v46 = vadd.f32 %v3339_v13, %v2794_v44  ;;  %v2796_v47 = vpop.f32.mrb[189].mxu0  ;;  %v3357_v58 = vpop.f32.mrb[197].mxu1  ;;  %v461_v40 = vld [vmem:[#allocation2 + $0x320] sm:$0xff] }
 0x294   : > { %v2797_v49 = vpop.f32.mrb[190].mxu0  ;;  %v3358_v60 = vpop.f32.mrb[198].mxu1 }
 0x295   : > { %4216 = vst.msk [vmem:[%s5726_s10 + $0x2d8] sm:$0xff] %vm232_vm3, %v4088_v45  ;;  %v3568_v50 = vadd.f32 %v3340_v46, %v455_v43  ;;  %v3343_v51 = vadd.f32 %v3342_v19, %v2797_v49  ;;  %v2799_v52 = vpop.f32.mrb[191].mxu0  ;;  %v3360_v63 = vpop.f32.mrb[199].mxu1  ;;  %v462_v45 = vld [vmem:[#allocation2 + $0x328] sm:$0xff] }
 0x296   : > { %v3826_v53 = vld [vmem:[#allocation2 + $0x2e0] sm:$0xff] }
 0x297   : > { %v3961_v56 = vadd.f32 %v6157_v36, %v3826_v53  ;;  %3697 = vst.msk [vmem:[#allocation2 + $0x2f0] sm:$0xff] %vm232_vm3, %v3568_v50  ;;  %v3569_v57 = vadd.f32 %v3343_v51, %v456_v48 }
 0x298   : > { %v3827_v59 = vld [vmem:[#allocation2 + $0x2e8] sm:$0xff] }
 0x299   : > { %v4089_v61 = vmax.f32 %v3961_v56, 0.0  ;;  %v3962_v62 = vadd.f32 %v6157_v36, %v3827_v59  ;;  %3698 = vst.msk [vmem:[#allocation2 + $0x2f8] sm:$0xff] %vm232_vm3, %v3569_v57 }
 0x29a   : > { %v2802_v1 = vpop.f32.mrb[192].mxu0  ;;  %v3363_v54 = vpop.f32.mrb[200].mxu1 }
 0x29b   : > { %4217 = vst.msk [vmem:[%s5726_s10 + $0x2e0] sm:$0xff] %vm232_vm3, %v4089_v61  ;;  %v4090_v2 = vmax.f32 %v3962_v62, 0.0  ;;  %v3348_v3 = vadd.f32 %v3347_v34, %v2802_v1  ;;  %v2804_v4 = vpop.f32.mrb[193].mxu0  ;;  %v3365_v13 = vpop.f32.mrb[201].mxu1  ;;  %v463_v61 = vld [vmem:[#allocation2 + $0x330] sm:$0xff] }
 0x29c   : > { %v2805_v6 = vpop.f32.mrb[194].mxu0  ;;  %v3366_v16 = vpop.f32.mrb[202].mxu1 }
 0x29d   : > { %4218 = vst.msk [vmem:[%s5726_s10 + $0x2e8] sm:$0xff] %vm232_vm3, %v4090_v2  ;;  %v3570_v7 = vadd.f32 %v3348_v3, %v457_v0  ;;  %v3351_v8 = vadd.f32 %v3350_v39, %v2805_v6  ;;  %v2807_v9 = vpop.f32.mrb[195].mxu0  ;;  %v3368_v19 = vpop.f32.mrb[203].mxu1  ;;  %v464_v2 = vld [vmem:[#allocation2 + $0x338] sm:$0xff] }
 0x29e   : > { %v3828_v10 = vld [vmem:[#allocation2 + $0x2f0] sm:$0xff] }
 0x29f   : > { %v3963_v11 = vadd.f32 %v6157_v36, %v3828_v10  ;;  %3699 = vst.msk [vmem:[#allocation2 + $0x300] sm:$0xff] %vm232_vm3, %v3570_v7  ;;  %v3571_v12 = vadd.f32 %v3351_v8, %v458_v5 }
 0x2a0   : > { %v3829_v14 = vld [vmem:[#allocation2 + $0x2f8] sm:$0xff] }
 0x2a1   : > { %v4091_v17 = vmax.f32 %v3963_v11, 0.0  ;;  %v3964_v18 = vadd.f32 %v6157_v36, %v3829_v14  ;;  %3700 = vst.msk [vmem:[#allocation2 + $0x308] sm:$0xff] %vm232_vm3, %v3571_v12  ;;  %v6342_v14 = vld [vmem:[%s6463_s2] ss:$0 sm:$0xff] }
 0x2a2   : > { %v2810_v21 = vpop.f32.mrb[196].mxu0  ;;  %v3371_v31 = vpop.f32.mrb[204].mxu1 }
 0x2a3   : > { %4219 = vst.msk [vmem:[%s5726_s10 + $0x2f0] sm:$0xff] %vm232_vm3, %v4091_v17  ;;  %v4092_v22 = vmax.f32 %v3964_v18, 0.0  ;;  %v3356_v23 = vadd.f32 %v3355_v55, %v2810_v21  ;;  %v2812_v24 = vpop.f32.mrb[197].mxu0  ;;  %v3373_v34 = vpop.f32.mrb[205].mxu1  ;;  %v465_v18 = vld [vmem:[#allocation2 + $0x340] sm:$0xff] }
 0x2a4   : > { %v2813_v26 = vpop.f32.mrb[198].mxu0  ;;  %v3374_v15 = vpop.f32.mrb[206].mxu1 }
 0x2a5   : > { %4220 = vst.msk [vmem:[%s5726_s10 + $0x2f8] sm:$0xff] %vm232_vm3, %v4092_v22  ;;  %v3572_v27 = vadd.f32 %v3356_v23, %v459_v20  ;;  %v3359_v28 = vadd.f32 %v3358_v60, %v2813_v26  ;;  %v2815_v29 = vpop.f32.mrb[199].mxu0  ;;  %v3376_v39 = vpop.f32.mrb[207].mxu1  ;;  %v466_v22 = vld [vmem:[#allocation2 + $0x348] sm:$0xff] }
 0x2a6   : > { %v3830_v30 = vld [vmem:[#allocation2 + $0x300] sm:$0xff] }
 0x2a7   : > { %v3965_v32 = vadd.f32 %v6157_v36, %v3830_v30  ;;  %3701 = vst.msk [vmem:[#allocation2 + $0x310] sm:$0xff] %vm232_vm3, %v3572_v27  ;;  %v3573_v33 = vadd.f32 %v3359_v28, %v460_v25 }
 0x2a8   : > { %v3831_v35 = vld [vmem:[#allocation2 + $0x308] sm:$0xff] }
 0x2a9   : > { %v4093_v37 = vmax.f32 %v3965_v32, 0.0  ;;  %v3966_v38 = vadd.f32 %v6157_v36, %v3831_v35  ;;  %3702 = vst.msk [vmem:[#allocation2 + $0x318] sm:$0xff] %vm232_vm3, %v3573_v33 }
 0x2aa   : > { %v2818_v41 = vpop.f32.mrb[200].mxu0  ;;  %v3379_v51 = vpop.f32.mrb[208].mxu1 }
 0x2ab   : > { %4221 = vst.msk [vmem:[%s5726_s10 + $0x300] sm:$0xff] %vm232_vm3, %v4093_v37  ;;  %v4094_v42 = vmax.f32 %v3966_v38, 0.0  ;;  %v3364_v43 = vadd.f32 %v3363_v54, %v2818_v41  ;;  %v2820_v44 = vpop.f32.mrb[201].mxu0  ;;  %v3381_v55 = vpop.f32.mrb[209].mxu1  ;;  %v467_v37 = vld [vmem:[#allocation2 + $0x350] sm:$0xff] }
 0x2ac   : > { %v2821_v46 = vpop.f32.mrb[202].mxu0  ;;  %v3382_v57 = vpop.f32.mrb[210].mxu1 }
 0x2ad   : > { %4222 = vst.msk [vmem:[%s5726_s10 + $0x308] sm:$0xff] %vm232_vm3, %v4094_v42  ;;  %v3574_v47 = vadd.f32 %v3364_v43, %v461_v40  ;;  %v3367_v48 = vadd.f32 %v3366_v16, %v2821_v46  ;;  %v2823_v49 = vpop.f32.mrb[203].mxu0  ;;  %v3384_v60 = vpop.f32.mrb[211].mxu1  ;;  %v468_v42 = vld [vmem:[#allocation2 + $0x358] sm:$0xff] }
 0x2ae   : > { %v3832_v50 = vld [vmem:[#allocation2 + $0x310] sm:$0xff] }
 0x2af   : > { %v3967_v52 = vadd.f32 %v6157_v36, %v3832_v50  ;;  %3703 = vst.msk [vmem:[#allocation2 + $0x320] sm:$0xff] %vm232_vm3, %v3574_v47  ;;  %v3575_v53 = vadd.f32 %v3367_v48, %v462_v45 }
 0x2b0   : > { %v3833_v56 = vld [vmem:[#allocation2 + $0x318] sm:$0xff] }
 0x2b1   : > { %v4095_v58 = vmax.f32 %v3967_v52, 0.0  ;;  %v3968_v59 = vadd.f32 %v6157_v36, %v3833_v56  ;;  %3704 = vst.msk [vmem:[#allocation2 + $0x328] sm:$0xff] %vm232_vm3, %v3575_v53 }
 0x2b2   : > { %v2826_v62 = vpop.f32.mrb[204].mxu0  ;;  %v3387_v8 = vpop.f32.mrb[212].mxu1 }
 0x2b3   : > { %4223 = vst.msk [vmem:[%s5726_s10 + $0x310] sm:$0xff] %vm232_vm3, %v4095_v58  ;;  %v4096_v63 = vmax.f32 %v3968_v59, 0.0  ;;  %v3372_v0 = vadd.f32 %v3371_v31, %v2826_v62  ;;  %v2828_v1 = vpop.f32.mrb[205].mxu0  ;;  %v3389_v54 = vpop.f32.mrb[213].mxu1  ;;  %v469_v58 = vld [vmem:[#allocation2 + $0x360] sm:$0xff] }
 0x2b4   : > { %v2829_v3 = vpop.f32.mrb[206].mxu0  ;;  %v3390_v12 = vpop.f32.mrb[214].mxu1 }
 0x2b5   : > { %4224 = vst.msk [vmem:[%s5726_s10 + $0x318] sm:$0xff] %vm232_vm3, %v4096_v63  ;;  %v3576_v4 = vadd.f32 %v3372_v0, %v463_v61  ;;  %v3375_v5 = vadd.f32 %v3374_v15, %v2829_v3  ;;  %v2831_v6 = vpop.f32.mrb[207].mxu0  ;;  %v3392_v17 = vpop.f32.mrb[215].mxu1  ;;  %v470_v63 = vld [vmem:[#allocation2 + $0x368] sm:$0xff] }
 0x2b6   : > { %v3834_v7 = vld [vmem:[#allocation2 + $0x320] sm:$0xff] }
 0x2b7   : > { %v3969_v9 = vadd.f32 %v6157_v36, %v3834_v7  ;;  %3705 = vst.msk [vmem:[#allocation2 + $0x330] sm:$0xff] %vm232_vm3, %v3576_v4  ;;  %v3577_v10 = vadd.f32 %v3375_v5, %v464_v2 }
 0x2b8   : > { %v3835_v11 = vld [vmem:[#allocation2 + $0x328] sm:$0xff] }
 0x2b9   : > { %v4097_v13 = vmax.f32 %v3969_v9, 0.0  ;;  %v3970_v16 = vadd.f32 %v6342_v14, %v3835_v11  ;;  %3706 = vst.msk [vmem:[#allocation2 + $0x338] sm:$0xff] %vm232_vm3, %v3577_v10 }
 0x2ba   : > { %v2834_v36 = vpop.f32.mrb[208].mxu0  ;;  %v3395_v28 = vpop.f32.mrb[216].mxu1 }
 0x2bb   : > { %4225 = vst.msk [vmem:[%s5726_s10 + $0x320] sm:$0xff] %vm232_vm3, %v4097_v13  ;;  %v4098_v19 = vmax.f32 %v3970_v16, 0.0  ;;  %v3380_v20 = vadd.f32 %v3379_v51, %v2834_v36  ;;  %v2836_v21 = vpop.f32.mrb[209].mxu0  ;;  %v3397_v31 = vpop.f32.mrb[217].mxu1  ;;  %v471_v13 = vld [vmem:[#allocation2 + $0x370] sm:$0xff] }
 0x2bc   : > { %v2837_v23 = vpop.f32.mrb[210].mxu0  ;;  %v3398_v33 = vpop.f32.mrb[218].mxu1 }
 0x2bd   : > { %4226 = vst.msk [vmem:[%s5726_s10 + $0x328] sm:$0xff] %vm232_vm3, %v4098_v19  ;;  %v3578_v24 = vadd.f32 %v3380_v20, %v465_v18  ;;  %v3383_v25 = vadd.f32 %v3382_v57, %v2837_v23  ;;  %v2839_v26 = vpop.f32.mrb[211].mxu0  ;;  %v3400_v15 = vpop.f32.mrb[219].mxu1  ;;  %v472_v19 = vld [vmem:[#allocation2 + $0x378] sm:$0xff] }
 0x2be   : > { %v3836_v27 = vld [vmem:[#allocation2 + $0x330] sm:$0xff] }
 0x2bf   : > { %v3971_v29 = vadd.f32 %v6342_v14, %v3836_v27  ;;  %3707 = vst.msk [vmem:[#allocation2 + $0x340] sm:$0xff] %vm232_vm3, %v3578_v24  ;;  %v3579_v30 = vadd.f32 %v3383_v25, %v466_v22 }
 0x2c0   : > { %v3837_v32 = vld [vmem:[#allocation2 + $0x338] sm:$0xff] }
 0x2c1   : > { %v4099_v34 = vmax.f32 %v3971_v29, 0.0  ;;  %v3972_v35 = vadd.f32 %v6342_v14, %v3837_v32  ;;  %3708 = vst.msk [vmem:[#allocation2 + $0x348] sm:$0xff] %vm232_vm3, %v3579_v30 }
 0x2c2   : > { %v2842_v38 = vpop.f32.mrb[212].mxu0  ;;  %v3403_v48 = vpop.f32.mrb[220].mxu1 }
 0x2c3   : > { %4227 = vst.msk [vmem:[%s5726_s10 + $0x330] sm:$0xff] %vm232_vm3, %v4099_v34  ;;  %v4100_v39 = vmax.f32 %v3972_v35, 0.0  ;;  %v3388_v40 = vadd.f32 %v3387_v8, %v2842_v38  ;;  %v2844_v41 = vpop.f32.mrb[213].mxu0  ;;  %v3405_v51 = vpop.f32.mrb[221].mxu1  ;;  %v473_v34 = vld [vmem:[#allocation2 + $0x380] sm:$0xff] }
 0x2c4   : > { %v2845_v43 = vpop.f32.mrb[214].mxu0  ;;  %v3406_v53 = vpop.f32.mrb[222].mxu1 }
 0x2c5   : > { %4228 = vst.msk [vmem:[%s5726_s10 + $0x338] sm:$0xff] %vm232_vm3, %v4100_v39  ;;  %v3580_v44 = vadd.f32 %v3388_v40, %v467_v37  ;;  %v3391_v45 = vadd.f32 %v3390_v12, %v2845_v43  ;;  %v2847_v46 = vpop.f32.mrb[215].mxu0  ;;  %v3408_v57 = vpop.f32.mrb[223].mxu1  ;;  %v474_v39 = vld [vmem:[#allocation2 + $0x388] sm:$0xff] }
 0x2c6   : > { %v3838_v47 = vld [vmem:[#allocation2 + $0x340] sm:$0xff] }
 0x2c7   : > { %v3973_v49 = vadd.f32 %v6342_v14, %v3838_v47  ;;  %3709 = vst.msk [vmem:[#allocation2 + $0x350] sm:$0xff] %vm232_vm3, %v3580_v44  ;;  %v3581_v50 = vadd.f32 %v3391_v45, %v468_v42 }
 0x2c8   : > { %v3839_v52 = vld [vmem:[#allocation2 + $0x348] sm:$0xff] }
 0x2c9   : > { %v4101_v55 = vmax.f32 %v3973_v49, 0.0  ;;  %v3974_v56 = vadd.f32 %v6342_v14, %v3839_v52  ;;  %3710 = vst.msk [vmem:[#allocation2 + $0x358] sm:$0xff] %vm232_vm3, %v3581_v50 }
 0x2ca   : > { %v2850_v59 = vpop.f32.mrb[216].mxu0  ;;  %v3411_v5 = vpop.f32.mrb[224].mxu1 }
 0x2cb   : > { %4229 = vst.msk [vmem:[%s5726_s10 + $0x340] sm:$0xff] %vm232_vm3, %v4101_v55  ;;  %v4102_v60 = vmax.f32 %v3974_v56, 0.0  ;;  %v3396_v61 = vadd.f32 %v3395_v28, %v2850_v59  ;;  %v2852_v62 = vpop.f32.mrb[217].mxu0  ;;  %v3413_v8 = vpop.f32.mrb[225].mxu1  ;;  %v475_v55 = vld [vmem:[#allocation2 + $0x390] sm:$0xff] }
 0x2cc   : > { %v2853_v0 = vpop.f32.mrb[218].mxu0  ;;  %v3414_v10 = vpop.f32.mrb[226].mxu1 }
 0x2cd   : > { %4230 = vst.msk [vmem:[%s5726_s10 + $0x348] sm:$0xff] %vm232_vm3, %v4102_v60  ;;  %v3582_v1 = vadd.f32 %v3396_v61, %v469_v58  ;;  %v3399_v2 = vadd.f32 %v3398_v33, %v2853_v0  ;;  %v2855_v3 = vpop.f32.mrb[219].mxu0  ;;  %v3416_v12 = vpop.f32.mrb[227].mxu1  ;;  %v476_v60 = vld [vmem:[#allocation2 + $0x398] sm:$0xff] }
 0x2ce   : > { %v3840_v4 = vld [vmem:[#allocation2 + $0x350] sm:$0xff] }
 0x2cf   : > { %v3975_v6 = vadd.f32 %v6342_v14, %v3840_v4  ;;  %3711 = vst.msk [vmem:[#allocation2 + $0x360] sm:$0xff] %vm232_vm3, %v3582_v1  ;;  %v3583_v7 = vadd.f32 %v3399_v2, %v470_v63 }
 0x2d0   : > { %v3841_v9 = vld [vmem:[#allocation2 + $0x358] sm:$0xff] }
 0x2d1   : > { %v4103_v54 = vmax.f32 %v3975_v6, 0.0  ;;  %v3976_v11 = vadd.f32 %v6342_v14, %v3841_v9  ;;  %3712 = vst.msk [vmem:[#allocation2 + $0x368] sm:$0xff] %vm232_vm3, %v3583_v7 }
 0x2d2   : > { %v2858_v16 = vpop.f32.mrb[220].mxu0  ;;  %v3419_v25 = vpop.f32.mrb[228].mxu1 }
 0x2d3   : > { %4231 = vst.msk [vmem:[%s5726_s10 + $0x350] sm:$0xff] %vm232_vm3, %v4103_v54  ;;  %v4104_v17 = vmax.f32 %v3976_v11, 0.0  ;;  %v3404_v18 = vadd.f32 %v3403_v48, %v2858_v16  ;;  %v2860_v36 = vpop.f32.mrb[221].mxu0  ;;  %v3421_v28 = vpop.f32.mrb[229].mxu1  ;;  %v477_v54 = vld [vmem:[#allocation2 + $0x3a0] sm:$0xff] }
 0x2d4   : > { %v2861_v20 = vpop.f32.mrb[222].mxu0  ;;  %v3422_v30 = vpop.f32.mrb[230].mxu1 }
 0x2d5   : > { %4232 = vst.msk [vmem:[%s5726_s10 + $0x358] sm:$0xff] %vm232_vm3, %v4104_v17  ;;  %v3584_v21 = vadd.f32 %v3404_v18, %v471_v13  ;;  %v3407_v22 = vadd.f32 %v3406_v53, %v2861_v20  ;;  %v2863_v23 = vpop.f32.mrb[223].mxu0  ;;  %v3424_v33 = vpop.f32.mrb[231].mxu1  ;;  %v478_v17 = vld [vmem:[#allocation2 + $0x3a8] sm:$0xff] }
 0x2d6   : > { %v3842_v24 = vld [vmem:[#allocation2 + $0x360] sm:$0xff] }
 0x2d7   : > { %v3977_v26 = vadd.f32 %v6342_v14, %v3842_v24  ;;  %3713 = vst.msk [vmem:[#allocation2 + $0x370] sm:$0xff] %vm232_vm3, %v3584_v21  ;;  %v3585_v27 = vadd.f32 %v3407_v22, %v472_v19 }
 0x2d8   : > { %v3843_v29 = vld [vmem:[#allocation2 + $0x368] sm:$0xff] }
 0x2d9   : > { %v4105_v31 = vmax.f32 %v3977_v26, 0.0  ;;  %v3978_v32 = vadd.f32 %v6342_v14, %v3843_v29  ;;  %3714 = vst.msk [vmem:[#allocation2 + $0x378] sm:$0xff] %vm232_vm3, %v3585_v27 }
 0x2da   : > { %v2866_v35 = vpop.f32.mrb[224].mxu0  ;;  %v3427_v45 = vpop.f32.mrb[232].mxu1 }
 0x2db   : > { %4233 = vst.msk [vmem:[%s5726_s10 + $0x360] sm:$0xff] %vm232_vm3, %v4105_v31  ;;  %v4106_v15 = vmax.f32 %v3978_v32, 0.0  ;;  %v3412_v37 = vadd.f32 %v3411_v5, %v2866_v35  ;;  %v2868_v38 = vpop.f32.mrb[225].mxu0  ;;  %v3429_v48 = vpop.f32.mrb[233].mxu1  ;;  %v479_v31 = vld [vmem:[#allocation2 + $0x3b0] sm:$0xff] }
 0x2dc   : > { %v2869_v40 = vpop.f32.mrb[226].mxu0  ;;  %v3430_v50 = vpop.f32.mrb[234].mxu1 }
 0x2dd   : > { %4234 = vst.msk [vmem:[%s5726_s10 + $0x368] sm:$0xff] %vm232_vm3, %v4106_v15  ;;  %v3586_v41 = vadd.f32 %v3412_v37, %v473_v34  ;;  %v3415_v42 = vadd.f32 %v3414_v10, %v2869_v40  ;;  %v2871_v43 = vpop.f32.mrb[227].mxu0  ;;  %v3432_v53 = vpop.f32.mrb[235].mxu1  ;;  %v480_v15 = vld [vmem:[#allocation2 + $0x3b8] sm:$0xff] }
 0x2de   : > { %v3844_v44 = vld [vmem:[#allocation2 + $0x370] sm:$0xff] }
 0x2df   : > { %v3979_v46 = vadd.f32 %v6342_v14, %v3844_v44  ;;  %3715 = vst.msk [vmem:[#allocation2 + $0x380] sm:$0xff] %vm232_vm3, %v3586_v41  ;;  %v3587_v47 = vadd.f32 %v3415_v42, %v474_v39 }
 0x2e0   : > { %v3845_v49 = vld [vmem:[#allocation2 + $0x378] sm:$0xff] }
 0x2e1   : > { %v4107_v51 = vmax.f32 %v3979_v46, 0.0  ;;  %v3980_v52 = vadd.f32 %v6342_v14, %v3845_v49  ;;  %3716 = vst.msk [vmem:[#allocation2 + $0x388] sm:$0xff] %vm232_vm3, %v3587_v47 }
 0x2e2   : > { %v2874_v56 = vpop.f32.mrb[228].mxu0  ;;  %v3435_v2 = vpop.f32.mrb[236].mxu1 }
 0x2e3   : > { %4235 = vst.msk [vmem:[%s5726_s10 + $0x370] sm:$0xff] %vm232_vm3, %v4107_v51  ;;  %v4108_v57 = vmax.f32 %v3980_v52, 0.0  ;;  %v3420_v58 = vadd.f32 %v3419_v25, %v2874_v56  ;;  %v2876_v59 = vpop.f32.mrb[229].mxu0  ;;  %v3437_v5 = vpop.f32.mrb[237].mxu1  ;;  %v481_v51 = vld [vmem:[#allocation2 + $0x3c0] sm:$0xff] }
 0x2e4   : > { %v2877_v61 = vpop.f32.mrb[230].mxu0  ;;  %v3438_v7 = vpop.f32.mrb[238].mxu1 }
 0x2e5   : > { %4236 = vst.msk [vmem:[%s5726_s10 + $0x378] sm:$0xff] %vm232_vm3, %v4108_v57  ;;  %v3588_v62 = vadd.f32 %v3420_v58, %v475_v55  ;;  %v3423_v63 = vadd.f32 %v3422_v30, %v2877_v61  ;;  %v2879_v0 = vpop.f32.mrb[231].mxu0  ;;  %v3440_v10 = vpop.f32.mrb[239].mxu1  ;;  %v482_v57 = vld [vmem:[#allocation2 + $0x3c8] sm:$0xff] }
 0x2e6   : > { %v3846_v1 = vld [vmem:[#allocation2 + $0x380] sm:$0xff] }
 0x2e7   : > { %v3981_v3 = vadd.f32 %v6342_v14, %v3846_v1  ;;  %3717 = vst.msk [vmem:[#allocation2 + $0x390] sm:$0xff] %vm232_vm3, %v3588_v62  ;;  %v3589_v4 = vadd.f32 %v3423_v63, %v476_v60 }
 0x2e8   : > { %v3847_v6 = vld [vmem:[#allocation2 + $0x388] sm:$0xff] }
 0x2e9   : > { %v4109_v8 = vmax.f32 %v3981_v3, 0.0  ;;  %v3982_v9 = vadd.f32 %v6342_v14, %v3847_v6  ;;  %3718 = vst.msk [vmem:[#allocation2 + $0x398] sm:$0xff] %vm232_vm3, %v3589_v4 }
 0x2ea   : > { %v2882_v11 = vpop.f32.mrb[232].mxu0  ;;  %v3443_v22 = vpop.f32.mrb[240].mxu1 }
 0x2eb   : > { %4237 = vst.msk [vmem:[%s5726_s10 + $0x380] sm:$0xff] %vm232_vm3, %v4109_v8  ;;  %v4110_v12 = vmax.f32 %v3982_v9, 0.0  ;;  %v3428_v13 = vadd.f32 %v3427_v45, %v2882_v11  ;;  %v2884_v16 = vpop.f32.mrb[233].mxu0  ;;  %v3445_v25 = vpop.f32.mrb[241].mxu1  ;;  %v483_v8 = vld [vmem:[#allocation2 + $0x3d0] sm:$0xff] }
 0x2ec   : > { %v2885_v18 = vpop.f32.mrb[234].mxu0  ;;  %v3446_v27 = vpop.f32.mrb[242].mxu1 }
 0x2ed   : > { %4238 = vst.msk [vmem:[%s5726_s10 + $0x388] sm:$0xff] %vm232_vm3, %v4110_v12  ;;  %v3590_v36 = vadd.f32 %v3428_v13, %v477_v54  ;;  %v3431_v19 = vadd.f32 %v3430_v50, %v2885_v18  ;;  %v2887_v20 = vpop.f32.mrb[235].mxu0  ;;  %v3448_v30 = vpop.f32.mrb[243].mxu1  ;;  %v484_v12 = vld [vmem:[#allocation2 + $0x3d8] sm:$0xff] }
 0x2ee   : > { %v3848_v21 = vld [vmem:[#allocation2 + $0x390] sm:$0xff] }
 0x2ef   : > { %v3983_v23 = vadd.f32 %v6342_v14, %v3848_v21  ;;  %3719 = vst.msk [vmem:[#allocation2 + $0x3a0] sm:$0xff] %vm232_vm3, %v3590_v36  ;;  %v3591_v24 = vadd.f32 %v3431_v19, %v478_v17 }
 0x2f0   : > { %v3849_v26 = vld [vmem:[#allocation2 + $0x398] sm:$0xff] }
 0x2f1   : > { %v4111_v28 = vmax.f32 %v3983_v23, 0.0  ;;  %v3984_v29 = vadd.f32 %v6342_v14, %v3849_v26  ;;  %3720 = vst.msk [vmem:[#allocation2 + $0x3a8] sm:$0xff] %vm232_vm3, %v3591_v24 }
 0x2f2   : > { %v2890_v32 = vpop.f32.mrb[236].mxu0  ;;  %v3451_v42 = vpop.f32.mrb[244].mxu1 }
 0x2f3   : > { %4239 = vst.msk [vmem:[%s5726_s10 + $0x390] sm:$0xff] %vm232_vm3, %v4111_v28  ;;  %v4112_v33 = vmax.f32 %v3984_v29, 0.0  ;;  %v3436_v34 = vadd.f32 %v3435_v2, %v2890_v32  ;;  %v2892_v35 = vpop.f32.mrb[237].mxu0  ;;  %v3453_v45 = vpop.f32.mrb[245].mxu1  ;;  %v485_v28 = vld [vmem:[#allocation2 + $0x3e0] sm:$0xff] }
 0x2f4   : > { %v2893_v37 = vpop.f32.mrb[238].mxu0  ;;  %v3454_v47 = vpop.f32.mrb[246].mxu1 }
 0x2f5   : > { %4240 = vst.msk [vmem:[%s5726_s10 + $0x398] sm:$0xff] %vm232_vm3, %v4112_v33  ;;  %v3592_v38 = vadd.f32 %v3436_v34, %v479_v31  ;;  %v3439_v39 = vadd.f32 %v3438_v7, %v2893_v37  ;;  %v2895_v40 = vpop.f32.mrb[239].mxu0  ;;  %v3456_v50 = vpop.f32.mrb[247].mxu1  ;;  %v486_v33 = vld [vmem:[#allocation2 + $0x3e8] sm:$0xff] }
 0x2f6   : > { %v3850_v41 = vld [vmem:[#allocation2 + $0x3a0] sm:$0xff] }
 0x2f7   : > { %v3985_v43 = vadd.f32 %v6342_v14, %v3850_v41  ;;  %3721 = vst.msk [vmem:[#allocation2 + $0x3b0] sm:$0xff] %vm232_vm3, %v3592_v38  ;;  %v3593_v44 = vadd.f32 %v3439_v39, %v480_v15 }
 0x2f8   : > { %v3851_v46 = vld [vmem:[#allocation2 + $0x3a8] sm:$0xff] }
 0x2f9   : > { %v4113_v48 = vmax.f32 %v3985_v43, 0.0  ;;  %v3986_v49 = vadd.f32 %v6342_v14, %v3851_v46  ;;  %3722 = vst.msk [vmem:[#allocation2 + $0x3b8] sm:$0xff] %vm232_vm3, %v3593_v44  ;;  %v487_v44 = vld [vmem:[#allocation2 + $0x3f0] sm:$0xff] }
 0x2fa   : > { %v2898_v52 = vpop.f32.mrb[240].mxu0  ;;  %v3459_v63 = vpop.f32.mrb[248].mxu1 }
 0x2fb   : > { %4241 = vst.msk [vmem:[%s5726_s10 + $0x3a0] sm:$0xff] %vm232_vm3, %v4113_v48  ;;  %v4114_v53 = vmax.f32 %v3986_v49, 0.0  ;;  %v3444_v55 = vadd.f32 %v3443_v22, %v2898_v52  ;;  %v2900_v56 = vpop.f32.mrb[241].mxu0  ;;  %v3461_v2 = vpop.f32.mrb[249].mxu1  ;;  %v488_v49 = vld [vmem:[#allocation2 + $0x3f8] sm:$0xff] }
 0x2fc   : > { %v2901_v58 = vpop.f32.mrb[242].mxu0  ;;  %v3462_v4 = vpop.f32.mrb[250].mxu1 }
 0x2fd   : > { %4242 = vst.msk [vmem:[%s5726_s10 + $0x3a8] sm:$0xff] %vm232_vm3, %v4114_v53  ;;  %v3594_v59 = vadd.f32 %v3444_v55, %v481_v51  ;;  %v3447_v60 = vadd.f32 %v3446_v27, %v2901_v58  ;;  %v2903_v61 = vpop.f32.mrb[243].mxu0  ;;  %v3464_v7 = vpop.f32.mrb[251].mxu1 }
 0x2fe   : > { %v3852_v62 = vld [vmem:[#allocation2 + $0x3b0] sm:$0xff] }
 0x2ff   : > { %v3987_v0 = vadd.f32 %v6342_v14, %v3852_v62  ;;  %3723 = vst.msk [vmem:[#allocation2 + $0x3c0] sm:$0xff] %vm232_vm3, %v3594_v59  ;;  %v3595_v1 = vadd.f32 %v3447_v60, %v482_v57 }
 0x300   : > { %v3853_v3 = vld [vmem:[#allocation2 + $0x3b8] sm:$0xff] }
 0x301   : > { %v4115_v5 = vmax.f32 %v3987_v0, 0.0  ;;  %v3988_v6 = vadd.f32 %v6342_v14, %v3853_v3  ;;  %3724 = vst.msk [vmem:[#allocation2 + $0x3c8] sm:$0xff] %vm232_vm3, %v3595_v1 }
 0x302   : > { %v2906_v9 = vpop.f32.mrb[244].mxu0  ;;  %v3467_v19 = vpop.f32.mrb[252].mxu1 }
 0x303   : > { %4243 = vst.msk [vmem:[%s5726_s10 + $0x3b0] sm:$0xff] %vm232_vm3, %v4115_v5  ;;  %v4116_v10 = vmax.f32 %v3988_v6, 0.0  ;;  %v3452_v54 = vadd.f32 %v3451_v42, %v2906_v9  ;;  %v2908_v11 = vpop.f32.mrb[245].mxu0  ;;  %v3469_v22 = vpop.f32.mrb[253].mxu1 }
 0x304   : > { %v2909_v13 = vpop.f32.mrb[246].mxu0  ;;  %v3470_v24 = vpop.f32.mrb[254].mxu1 }
 0x305   : > { %4244 = vst.msk [vmem:[%s5726_s10 + $0x3b8] sm:$0xff] %vm232_vm3, %v4116_v10  ;;  %v3596_v16 = vadd.f32 %v3452_v54, %v483_v8  ;;  %v3455_v17 = vadd.f32 %v3454_v47, %v2909_v13  ;;  %v2911_v18 = vpop.f32.mrb[247].mxu0  ;;  %v3472_v27 = vpop.f32.mrb[255].mxu1 }
 0x306   : > { %v3854_v36 = vld [vmem:[#allocation2 + $0x3c0] sm:$0xff] }
 0x307   : > { %v3989_v20 = vadd.f32 %v6342_v14, %v3854_v36  ;;  %3725 = vst.msk [vmem:[#allocation2 + $0x3d0] sm:$0xff] %vm232_vm3, %v3596_v16  ;;  %v3597_v21 = vadd.f32 %v3455_v17, %v484_v12 }
 0x308   : > { %v3855_v23 = vld [vmem:[#allocation2 + $0x3c8] sm:$0xff] }
 0x309   : > { %v4117_v25 = vmax.f32 %v3989_v20, 0.0  ;;  %v3990_v26 = vadd.f32 %v6342_v14, %v3855_v23  ;;  %3726 = vst.msk [vmem:[#allocation2 + $0x3d8] sm:$0xff] %vm232_vm3, %v3597_v21 }
 0x30a   : > { %v2914_v29 = vpop.f32.mrb[248].mxu0 }
 0x30b   : > { %4245 = vst.msk [vmem:[%s5726_s10 + $0x3c0] sm:$0xff] %vm232_vm3, %v4117_v25  ;;  %v4118_v30 = vmax.f32 %v3990_v26, 0.0  ;;  %v3460_v31 = vadd.f32 %v3459_v63, %v2914_v29  ;;  %v2916_v32 = vpop.f32.mrb[249].mxu0 }
 0x30c   : > { %v2917_v34 = vpop.f32.mrb[250].mxu0 }
 0x30d   : > { %4246 = vst.msk [vmem:[%s5726_s10 + $0x3c8] sm:$0xff] %vm232_vm3, %v4118_v30  ;;  %v3598_v35 = vadd.f32 %v3460_v31, %v485_v28  ;;  %v3463_v15 = vadd.f32 %v3462_v4, %v2917_v34  ;;  %v2919_v37 = vpop.f32.mrb[251].mxu0 }
 0x30e   : > { %v3856_v38 = vld [vmem:[#allocation2 + $0x3d0] sm:$0xff] }
 0x30f   : > { %v3991_v39 = vadd.f32 %v6342_v14, %v3856_v38  ;;  %3727 = vst.msk [vmem:[#allocation2 + $0x3e0] sm:$0xff] %vm232_vm3, %v3598_v35  ;;  %v3599_v40 = vadd.f32 %v3463_v15, %v486_v33 }
 0x310   : > { %v3857_v41 = vld [vmem:[#allocation2 + $0x3d8] sm:$0xff] }
 0x311   : > { %v4119_v42 = vmax.f32 %v3991_v39, 0.0  ;;  %v3992_v43 = vadd.f32 %v6342_v14, %v3857_v41  ;;  %3728 = vst.msk [vmem:[#allocation2 + $0x3e8] sm:$0xff] %vm232_vm3, %v3599_v40 }
 0x312   : > { %v2922_v45 = vpop.f32.mrb[252].mxu0 }
 0x313   : > { %4247 = vst.msk [vmem:[%s5726_s10 + $0x3d0] sm:$0xff] %vm232_vm3, %v4119_v42  ;;  %v4120_v46 = vmax.f32 %v3992_v43, 0.0  ;;  %v3468_v47 = vadd.f32 %v3467_v19, %v2922_v45  ;;  %v2924_v48 = vpop.f32.mrb[253].mxu0 }
 0x314   : > { %v2925_v50 = vpop.f32.mrb[254].mxu0 }
 0x315   : > { %4248 = vst.msk [vmem:[%s5726_s10 + $0x3d8] sm:$0xff] %vm232_vm3, %v4120_v46  ;;  %v3600_v51 = vadd.f32 %v3468_v47, %v487_v44  ;;  %v3471_v52 = vadd.f32 %v3470_v24, %v2925_v50  ;;  %v2927_v53 = vpop.f32.mrb[255].mxu0 }
 0x316   : > { %v3858_v55 = vld [vmem:[#allocation2 + $0x3e0] sm:$0xff] }
 0x317   : > { %v3993_v56 = vadd.f32 %v6342_v14, %v3858_v55  ;;  %3729 = vst.msk [vmem:[#allocation2 + $0x3f0] sm:$0xff] %vm232_vm3, %v3600_v51  ;;  %v3601_v57 = vadd.f32 %v3471_v52, %v488_v49 }
 0x318   : > { %v3859_v58 = vld [vmem:[#allocation2 + $0x3e8] sm:$0xff] }
 0x319   : > { %v4121_v59 = vmax.f32 %v3993_v56, 0.0  ;;  %v3994_v60 = vadd.f32 %v6342_v14, %v3859_v58  ;;  %3730 = vst.msk [vmem:[#allocation2 + $0x3f8] sm:$0xff] %vm232_vm3, %v3601_v57 }
 0x31b   : > { %4249 = vst.msk [vmem:[%s5726_s10 + $0x3e0] sm:$0xff] %vm232_vm3, %v4121_v59  ;;  %v4122_v61 = vmax.f32 %v3994_v60, 0.0 }
 0x31d   : > { %4250 = vst.msk [vmem:[%s5726_s10 + $0x3e8] sm:$0xff] %vm232_vm3, %v4122_v61 }
 0x31e   : > { %v3860_v62 = vld [vmem:[#allocation2 + $0x3f0] sm:$0xff] }
 0x31f   : > { %v3995_v63 = vadd.f32 %v6342_v14, %v3860_v62 }
 0x320   : > { %v3861_v0 = vld [vmem:[#allocation2 + $0x3f8] sm:$0xff] }
 0x321   : > { %v4123_v1 = vmax.f32 %v3995_v63, 0.0  ;;  %v3996_v2 = vadd.f32 %v6342_v14, %v3861_v0 }
 0x323   : > { %4251 = vst.msk [vmem:[%s5726_s10 + $0x3f0] sm:$0xff] %vm232_vm3, %v4123_v1  ;;  %v4124_v3 = vmax.f32 %v3996_v2, 0.0 }
 0x325   : > { %4252 = vst.msk [vmem:[%s5726_s10 + $0x3f8] sm:$0xff] %vm232_vm3, %v4124_v3 }
 0x326 PF: > { %s13_s14 = sadd.s32 1, %s5129_s14   ;;  %s6465_s12 = smov %s5125_s13 }
 0x327   : > { %p10_p5 = scmp.ge.s32.totalorder %s13_s14, 10   ;;  %s6466_s13 = smov %s6468_s15 }
 0x329   :  { %12 = sbr.rel (!%p10_p5) target bundleno = 2 (0x2), region = 73 }

</bundles_post_ra>
